<compile_context>
chip_gen: v6e
topology: v6e:2x2x1
jax: 0.10.0
libtpu: 0.0.40
codegen_flags: <defaults>
</compile_context>

<pallas_src>
import functools
import math

import jax
import jax.numpy as jnp
from jax import lax
from jax.experimental import pallas as pl
from jax.experimental.pallas import tpu as pltpu


# ----------------------------------------------------------------------------------
# Fast path: table resident in VMEM, vectorized one-hot gather on the MXU.
# ----------------------------------------------------------------------------------
def _embedding_vmem_kernel(ids_ref, emb_ref, out_ref, *, scale):
    """Gather a (tb, D) tile of embedding rows from a VMEM-resident table.

    ids_ref : VMEM (tb, 1) int32   token ids for this block
    emb_ref : VMEM (V, D)          full table (constant index_map -> stays resident)
    out_ref : VMEM (tb, D)         output tile
    """
    tb = out_ref.shape[0]
    V = emb_ref.shape[0]
    ids = ids_ref[...]                                            # (tb, 1) int32
    # Exact 0/1 row-selection matrix; the gather runs as a single MXU matmul so
    # the store stays one dense (tb, D) tile (lane-dense output is the big lever).
    onehot = (ids == lax.broadcasted_iota(jnp.int32, (tb, V), 1)).astype(emb_ref.dtype)
    rows = jnp.dot(
        onehot,
        emb_ref[...],
        preferred_element_type=jnp.float32,
        precision=jax.lax.Precision.HIGHEST,   # keep the row pick (1.0 * x) exact
    )                                                             # (tb, D) f32
    out_ref[...] = (rows * scale).astype(out_ref.dtype)


# ----------------------------------------------------------------------------------
# General path: table in HBM, double-buffered row-gather DMA per token block.
# ----------------------------------------------------------------------------------
def _embedding_dma_kernel(ids_ref, emb_hbm, out_ref, buf, sems, *, tb, scale):
    """Gather `tb` embedding rows per grid step and scale by sqrt(d_model).

    ids_ref : SMEM (n_pad,) int32    scalar-prefetched token ids
    emb_hbm : HBM  (V, D)            raw embedding table (manual row DMAs)
    out_ref : VMEM (tb, D)           current output tile
    buf     : VMEM (2, tb, D)        double-buffered gather landing zone
    sems    : DMA semaphores (2,)    ONE aggregate semaphore per buffer slot
    """
    i = pl.program_id(0)
    nblk = pl.num_programs(0)

    def issue(block, slot):
        base = pl.multiple_of(block * tb, tb)

        def body(t, carry):
            row = ids_ref[base + t]
            pltpu.make_async_copy(
                emb_hbm.at[pl.ds(row, 1), :],
                buf.at[slot, pl.ds(t, 1), :],
                sems.at[slot],            # all tb row copies signal the slot's sem
            ).start()
            return carry

        # Partially unrolled issue loop: keeps descriptor issue dense without a
        # tb-way static unroll bloating the bundle stream.
        lax.fori_loop(0, tb, body, None, unroll=8)

    # Prime the pipeline with token block 0 into slot 0.
    @pl.when(i == 0)
    def _():
        issue(i, 0)

    slot = lax.rem(i, 2)

    # Prefetch the next token block into the other slot while this one drains.
    @pl.when(i + 1 < nblk)
    def _():
        issue(i + 1, 1 - slot)

    # Single aggregate wait per block: each of the tb row copies signals
    # D*itemsize bytes on sems[slot]; one (tb, D)-shaped descriptor waits for
    # exactly their sum (same byte-count trick as the Pallas distributed guide).
    pltpu.make_async_copy(buf.at[slot], buf.at[slot], sems.at[slot]).wait()

    # Lane/sublane-dense (tb, D) store; scale applied in f32 for dtype parity.
    out_ref[...] = (buf[slot].astype(jnp.float32) * scale).astype(out_ref.dtype)


# ----------------------------------------------------------------------------------
# Wrapper
# ----------------------------------------------------------------------------------
def embeddings_forward(ids, emb_table, *, token_block=256,
                       vmem_table_bytes=8 * 1024 * 1024):
    """ids: int array of any shape; emb_table: (V, D).  Returns ids.shape + (D,)."""
    orig_shape = ids.shape
    V, D = emb_table.shape
    dtype = emb_table.dtype
    itemsize = jnp.dtype(dtype).itemsize
    scale = float(math.sqrt(D))

    flat = ids.reshape(-1).astype(jnp.int32)
    n = flat.shape[0]

    # Token-block size: as large as requested, but no larger than needed, and a
    # multiple of the dtype's sublane pack (8 f32 / 16 bf16 / 32 int8) so the
    # (tb, D) output tiles stay unmasked and sublane-dense.
    pack = max(8, 32 // itemsize)
    tb = max(pack, min(token_block, pl.cdiv(n, pack) * pack))
    tb = pl.cdiv(tb, pack) * pack
    n_pad = pl.cdiv(n, tb) * tb
    if n_pad != n:
        flat = jnp.pad(flat, (0, n_pad - n))  # padded slots gather row 0, dropped below
    nblk = n_pad // tb

    def vmem_limit(working_set_bytes):
        est = int(working_set_bytes) + (4 << 20)
        if est <= (16 << 20):
            return None                # default scoped VMEM is plenty
        return min(est, 48 << 20)      # stay inside v7x's 64 MiB physical VMEM

    table_bytes = V * D * itemsize
    out_tile_bytes = 2 * tb * D * itemsize   # Pallas double-buffers the output tile

    if table_bytes <= vmem_table_bytes:
        # ---- Fast path: whole table resident in VMEM, MXU one-hot gather ----
        ids2d = flat.reshape(n_pad, 1)
        out = pl.pallas_call(
            functools.partial(_embedding_vmem_kernel, scale=scale),
            out_shape=jax.ShapeDtypeStruct((n_pad, D), dtype),
            grid=(nblk,),
            in_specs=[
                pl.BlockSpec((tb, 1), lambda i: (i, 0)),   # ids for this block
                pl.BlockSpec((V, D), lambda i: (0, 0)),    # table, resident across steps
            ],
            out_specs=pl.BlockSpec((tb, D), lambda i: (i, 0)),
            compiler_params=pltpu.CompilerParams(
                # No cross-step state -> shardable across TensorCores on v7x.
                dimension_semantics=("parallel",),
                vmem_limit_bytes=vmem_limit(
                    2 * table_bytes + out_tile_bytes + 2 * tb * 128 * 4),
            ),
        )(ids2d, emb_table)
    else:
        # ---- General path: HBM-resident table, double-buffered row-gather DMA ----
        # TODO(synk): on v7x, split the token axis across both TensorCores
        # (grid=(2, nblk//2) with per-core pipeline priming) for ~2x on this
        # latency-bound path.
        out = pl.pallas_call(
            functools.partial(_embedding_dma_kernel, tb=tb, scale=scale),
            out_shape=jax.ShapeDtypeStruct((n_pad, D), dtype),
            grid_spec=pltpu.PrefetchScalarGridSpec(
                num_scalar_prefetch=1,                          # token ids -> SMEM
                grid=(nblk,),
                in_specs=[pl.BlockSpec(memory_space=pl.ANY)],   # table stays in HBM
                out_specs=pl.BlockSpec((tb, D), lambda i, ids: (i, 0)),
                scratch_shapes=[
                    pltpu.VMEM((2, tb, D), dtype),
                    pltpu.SemaphoreType.DMA((2,)),
                ],
            ),
            compiler_params=pltpu.CompilerParams(
                # Cross-step double buffering carries state -> sequential axis.
                dimension_semantics=("arbitrary",),
                vmem_limit_bytes=vmem_limit(2 * tb * D * itemsize + out_tile_bytes),
            ),
        )(flat, emb_table)

    if n_pad != n:
        out = out[:n]
    return out.reshape(*orig_shape, D)


# ----------------------------------------------------------------------------------
if __name__ == "__main__":
    vocab_size, d_model = 1000, 128
    B, T = 2, 8

    key = jax.random.PRNGKey(0)
    k_emb, k_ids = jax.random.split(key)

    emb_table = 0.02 * jax.random.normal(k_emb, (vocab_size, d_model), jnp.float32)
    ids = jax.random.randint(k_ids, (B, T), 0, vocab_size, dtype=jnp.int32)

    # Pure-JAX reference: emb = table[ids]; emb * sqrt(d_model)
    ref = emb_table[ids] * math.sqrt(d_model)

    # 1) VMEM-resident-table fast path (512 KiB table -> taken by default).
    out_fast = jax.block_until_ready(embeddings_forward(ids, emb_table))
    assert out_fast.shape == (B, T, d_model)
    assert jnp.allclose(out_fast, ref, atol=1e-5, rtol=1e-5), "fast path mismatch"

    # 2) General HBM row-gather path (forced by disabling the VMEM-table threshold).
    out_dma = jax.block_until_ready(
        embeddings_forward(ids, emb_table, vmem_table_bytes=0))
    assert out_dma.shape == (B, T, d_model)
    assert jnp.allclose(out_dma, ref, atol=1e-5, rtol=1e-5), "hbm gather path mismatch"

    print("KERNEL_OK")
</pallas_src>

<mosaic_0001>
module attributes {stable_mosaic.version = 11 : i64} {
  func.func @_embedding_vmem_kernel(%arg0: i32, %arg1: memref<16x1xi32, #tpu.memory_space<vmem>>, %arg2: memref<1000x128xf32, #tpu.memory_space<vmem>>, %arg3: memref<16x128xf32, #tpu.memory_space<vmem>>) attributes {dimension_semantics = [#tpu.dimension_semantics<parallel>], iteration_bounds = array<i64: 1>, scalar_prefetch = 0 : i64, scratch_operands = 0 : i64, tpu.core_type = #tpu.core_type<tc>, window_params = [{transform_indices = @transform_0, window_bounds = array<i64: 16, 1>}, {pipeline_mode = #tpu.pipeline_mode<synchronous>, transform_indices = @transform_1, window_bounds = array<i64: 1000, 128>}, {transform_indices = @transform_2, window_bounds = array<i64: 16, 128>}]} {
    %c0 = arith.constant 0 : index
    %c0_0 = arith.constant 0 : index
    %0 = vector.load %arg1[%c0, %c0_0] : memref<16x1xi32, #tpu.memory_space<vmem>>, vector<16x1xi32>
    %1 = tpu.iota {dimensions = array<i32: 1>} : vector<16x1000xi32>
    %2 = vector.broadcast %0 : vector<16x1xi32> to vector<16x1000xi32>
    %3 = arith.cmpi eq, %2, %1 : vector<16x1000xi32>
    %4 = arith.extui %3 : vector<16x1000xi1> to vector<16x1000xi32>
    %5 = arith.sitofp %4 : vector<16x1000xi32> to vector<16x1000xf32>
    %c0_1 = arith.constant 0 : index
    %c0_2 = arith.constant 0 : index
    %6 = vector.load %arg2[%c0_1, %c0_2] : memref<1000x128xf32, #tpu.memory_space<vmem>>, vector<1000x128xf32>
    %cst = arith.constant dense<0.000000e+00> : vector<16x128xf32>
    %7 = tpu.matmul %5, %6, %cst {dimension_numbers = #tpu.dot_dimension_numbers<[1], [0], [0], [1], [0, 0, 1, 1], [], []>, precision = #tpu.contract_precision<fp32>} : vector<16x1000xf32>, vector<1000x128xf32>, vector<16x128xf32> -> vector<16x128xf32>
    %cst_3 = arith.constant 11.3137083 : f32
    %8 = vector.broadcast %cst_3 : f32 to vector<16x128xf32>
    %9 = arith.mulf %7, %8 : vector<16x128xf32>
    %c0_4 = arith.constant 0 : index
    %c0_5 = arith.constant 0 : index
    %10 = vector.load %arg3[%c0_4, %c0_5] : memref<16x128xf32, #tpu.memory_space<vmem>>, vector<16x128xf32>
    tpu.vector_store %arg3[%c0_4, %c0_5], %9 {strides = array<i32>} : memref<16x128xf32, #tpu.memory_space<vmem>>, vector<16x128xf32>,
    return
  }
  func.func @transform_0(%arg0: i32) -> (i32, i32) {
    %c0_i32 = arith.constant 0 : i32
    %c0_i32_0 = arith.constant 0 : i32
    return %arg0, %c0_i32 : i32, i32
  }
  func.func @transform_1(%arg0: i32) -> (i32, i32) {
    %c0_i32 = arith.constant 0 : i32
    %c0_i32_0 = arith.constant 0 : i32
    %c0_i32_1 = arith.constant 0 : i32
    return %c0_i32, %c0_i32_0 : i32, i32
  }
  func.func @transform_2(%arg0: i32) -> (i32, i32) {
    %c0_i32 = arith.constant 0 : i32
    %c0_i32_0 = arith.constant 0 : i32
    return %arg0, %c0_i32 : i32, i32
  }
}

</mosaic_0001>

<bundles_post_ra>
// kernel: tpu_custom_call.1
= control target key start
LH: loop header
LB: loop body
LE: loop exit
PB: predicated region body
PF: predicated region fallthrough
CT: control target
= control target key end

     0   :  { %7 = vsyncpa [#allocation3], 0  ;;  %s7348_s0 = inlined_call_operand.vmem [shape: s32[16,1], index: 0, kind: input, shape index: {}]   ;;  %s7349_s1 = inlined_call_operand.hbm [shape: f32[1000,128], index: 1, kind: input, shape index: {}]   ;;  %s7350_s2 = inlined_call_operand.hbm [shape: f32[16,128], index: 2, kind: output, shape index: {}]  }
   0x1   :  { %8 = vsyncpa [#allocation4], 0  ;;  %s4677_s9 = smov [#allocation2]  }
   0x2   :  { %s16_s10 = sshll.u32 %s4677_s9, 4  ;;  %s17_s10 = int_to_ptr.vmem [resolvable:$true] %s16_s10 }
   0x3   :  { %s4641_s11 = scalar_lea.vmem %s17_s10, 16000  ;;  %p4646_p1 = scmp.lt.s32.totalorder %s17_s10, %s17_s10 }
   0x4   :  { %p4642_p0 = scmp.ne.s32.totalorder %s17_s10, %s4641_s11  ;;  %p4647_p2 = scmp.lt.s32.totalorder %s4641_s11, %s4641_s11 }
   0x6   :  { %p4648_p3 = por %p4647_p2, %p4646_p1 }
   0x8   :  { %p4649_p4 = pnand %p4648_p3, %p4642_p0 }
   0xa   :  { %4652 = shalt.err (!%p4649_p4)
}
   0xb   :  { %s4678_s12 = smov 128   ;;  %s4679_s13 = smov 8  }
   0xc   :  { %22 = dma.hbm_to_vmem [thread:$0]  %s7349_s1, 16000, %s17_s10, [#allocation3], %s4678_s12, %s4678_s12, %s4679_s13  }
   0xd   :  { %4673 = dma.done.wait [#allocation3], 16000  }
   0xe   :  { %4674 = vsyncadd [#allocation3], 4294951296  ;;  %v4680_v0 = vmov 0   ;;  %v26_v1 = vld [vmem:[%s7348_s0] sm:$0xff]  ;;  %v27_v2 = vld [vmem:[%s7348_s0 + $0x8] sm:$0xff]  ;;  %vm216_vm13 = vcmask 850944  }
   0xf   :  { %4632 = vset.pattern.permute.xlu0 %v4680_v0  ;;  %v122_v3 = vld [vmem:[#allocation2 + $0xf8] sm:$0xff]  ;;  %v121_v6 = vld [vmem:[#allocation2 + $0xf0] sm:$0xff]  ;;  %v120_v11 = vld [vmem:[#allocation2 + $0xe8] sm:$0xff]  ;;  %s4683_s0 = smov [#allocation5]  }
  0x10   :  { %38 = vperm.xlu0 %4632, %v26_v1   ;;  %v4711_v4 = vand.u32 4294901760, %v122_v3  ;;  %v106_v5 = vld [vmem:[#allocation2 + $0x78] sm:$0xff]  ;;  %v105_v7 = vld [vmem:[#allocation2 + $0x70] sm:$0xff]  ;;  %v4715_v9 = vand.u32 4294901760, %v121_v6  ;;  %v104_v12 = vld [vmem:[#allocation2 + $0x68] sm:$0xff]  ;;  %v4722_v15 = vand.u32 4294901760, %v120_v11 }
  0x11   :  { %v4713_v8 = vand.u32 4294901760, %v106_v5  ;;  %v4717_v10 = vand.u32 4294901760, %v105_v7  ;;  %v119_v13 = vld [vmem:[#allocation2 + $0xe0] sm:$0xff]  ;;  %v4724_v16 = vand.u32 4294901760, %v104_v12  ;;  %v118_v39 = vld [vmem:[#allocation2 + $0xd8] sm:$0xff]  ;;  %v117_v45 = vld [vmem:[#allocation2 + $0xd0] sm:$0xff] }
  0x12   :  { %v4720_v14 = vsub.f32 %v122_v3, %v4711_v4  ;;  %v4726_v17 = vand.u32 4294901760, %v119_v13  ;;  %v103_v18 = vld [vmem:[#allocation2 + $0x60] sm:$0xff]  ;;  %3941 = vmatprep.subr.mxu0 %v4711_v4  ;;  %v4733_v20 = vsub.f32 %v121_v6, %v4715_v9  ;;  %v4743_v24 = vsub.f32 %v120_v11, %v4722_v15  ;;  %v102_v44 = vld [vmem:[#allocation2 + $0x58] sm:$0xff]  ;;  %v101_v46 = vld [vmem:[#allocation2 + $0x50] sm:$0xff]  ;;  %s3865_s1 = sshll.u32 %s4683_s0, 4  ;;  %s3866_s1 = int_to_ptr.vmem [resolvable:$true] %s3865_s1 }
  0x13   :  { %v4730_v19 = vsub.f32 %v106_v5, %v4713_v8  ;;  %v4736_v21 = vsub.f32 %v105_v7, %v4717_v10  ;;  %v4738_v22 = vand.u32 4294901760, %v103_v18  ;;  %3942 = vmatpush3.msra.mxu0 %v4713_v8  ;;  %v4746_v25 = vsub.f32 %v104_v12, %v4724_v16  ;;  %v116_v51 = vld [vmem:[#allocation2 + $0xc8] sm:$0xff]  ;;  %v115_v53 = vld [vmem:[#allocation2 + $0xc0] sm:$0xff]  ;;  %s4653_s20 = scalar_lea.vmem %s3866_s1, 256  ;;  %p4658_p6 = scmp.lt.s32.totalorder %s3866_s1, %s3866_s1 }
  0x14   :  { %7631 = vst [vmem:[#allocation8_spill] sm:$0xff] %v4720_v14  ;;  %41 = vperm.xlu0 %4632, %v27_v2   ;;  %v7370_v23 = vand.u32 4294901760, %v4720_v14  ;;  %v4749_v26 = vsub.f32 %v119_v13, %v4726_v17  ;;  %3943 = vmatprep.subr.mxu0 %v4715_v9  ;;  %v7365_v28 = vand.u32 4294901760, %v4733_v20  ;;  %v7363_v32 = vand.u32 4294901760, %v4743_v24  ;;  %v100_v52 = vld [vmem:[#allocation2 + $0x48] sm:$0xff]  ;;  %v99_v58 = vld [vmem:[#allocation2 + $0x40] sm:$0xff]  ;;  %p4654_p5 = scmp.ne.s32.totalorder %s3866_s1, %s4653_s20  ;;  %p4659_p7 = scmp.lt.s32.totalorder %s4653_s20, %s4653_s20 }
  0x15   :  { %v7368_v27 = vand.u32 4294901760, %v4730_v19  ;;  %v7364_v29 = vand.u32 4294901760, %v4736_v21  ;;  %v4756_v30 = vsub.f32 %v103_v18, %v4738_v22  ;;  %3944 = vmatpush3.msra.mxu0 %v4717_v10  ;;  %v7361_v33 = vand.u32 4294901760, %v4746_v25 }
  0x16   :  { %v466_v31 = vsub.f32 %v4720_v14, %v7370_v23  ;;  %v7360_v34 = vand.u32 4294901760, %v4749_v26  ;;  %3945 = vmatprep.subr.mxu0 %v4722_v15  ;;  %v473_v36 = vsub.f32 %v4733_v20, %v7365_v28  ;;  %v480_v41 = vsub.f32 %v4743_v24, %v7363_v32  ;;  %v93_v23 = vld [vmem:[#allocation2 + $0x10] sm:$0xff]  ;;  %p4660_p8 = por %p4659_p7, %p4658_p6 }
  0x17   :  { %v354_v35 = vsub.f32 %v4730_v19, %v7368_v27  ;;  %v361_v37 = vsub.f32 %v4736_v21, %v7364_v29  ;;  %v7358_v38 = vand.u32 4294901760, %v4756_v30  ;;  %3946 = vmatpush3.msra.mxu0 %v4724_v16  ;;  %v368_v42 = vsub.f32 %v4746_v25, %v7361_v33  ;;  %v110_v29 = vld [vmem:[#allocation2 + $0x98] sm:$0xff] }
  0x18   :  { %v467_v40 = vand.u32 4294901760, %v466_v31  ;;  %v487_v43 = vsub.f32 %v4749_v26, %v7360_v34  ;;  %3947 = vmatprep.subr.mxu0 %v4726_v17  ;;  %v474_v48 = vand.u32 4294901760, %v473_v36  ;;  %v481_v54 = vand.u32 4294901760, %v480_v41  ;;  %v94_v27 = vld [vmem:[#allocation2 + $0x18] sm:$0xff]  ;;  %p4661_p9 = pnand %p4660_p8, %p4654_p5 }
  0x19   :  { %v355_v47 = vand.u32 4294901760, %v354_v35  ;;  %v362_v49 = vand.u32 4294901760, %v361_v37  ;;  %v375_v50 = vsub.f32 %v4756_v30, %v7358_v38  ;;  %3948 = vmatpush3.msra.mxu0 %v4738_v22  ;;  %v369_v55 = vand.u32 4294901760, %v368_v42 }
  0x1a   :  { %3979 = vmatprep.subr.mxu1 %v467_v40  ;;  %v488_v56 = vand.u32 4294901760, %v487_v43  ;;  %v4791_v57 = vand.u32 4294901760, %v118_v39  ;;  %v4793_v60 = vand.u32 4294901760, %v102_v44  ;;  %v4795_v61 = vand.u32 4294901760, %v117_v45 }
  0x1b   :  { %3980 = vmatpush3.msra.mxu1 %v355_v47  ;;  %v376_v59 = vand.u32 4294901760, %v375_v50  ;;  %v4797_v62 = vand.u32 4294901760, %v101_v46  ;;  %v4802_v0 = vand.u32 4294901760, %v116_v51  ;;  %v4804_v1 = vand.u32 4294901760, %v100_v52  ;;  %v114_v47 = vld [vmem:[#allocation2 + $0xb8] sm:$0xff] }
  0x1c   :  { %3981 = vmatprep.subr.mxu1 %v474_v48  ;;  %v4800_v63 = vsub.f32 %v118_v39, %v4791_v57  ;;  %v4806_v2 = vand.u32 4294901760, %v115_v53  ;;  %3949 = vmatprep.subr.mxu0 %v4791_v57  ;;  %v4810_v3 = vsub.f32 %v102_v44, %v4793_v60  ;;  %v4813_v5 = vsub.f32 %v117_v45, %v4795_v61 }
  0x1d   :  { %3982 = vmatpush3.msra.mxu1 %v362_v49  ;;  %v4816_v6 = vsub.f32 %v101_v46, %v4797_v62  ;;  %v4818_v7 = vand.u32 4294901760, %v99_v58  ;;  %3950 = vmatpush3.msra.mxu0 %v4793_v60  ;;  %v4823_v12 = vsub.f32 %v116_v51, %v4802_v0  ;;  %v4826_v13 = vsub.f32 %v100_v52, %v4804_v1  ;;  %v98_v52 = vld [vmem:[#allocation2 + $0x38] sm:$0xff] }
  0x1e   :  { %3983 = vmatprep.subr.mxu1 %v481_v54  ;;  %v7357_v11 = vand.u32 4294901760, %v4800_v63  ;;  %v4829_v18 = vsub.f32 %v115_v53, %v4806_v2  ;;  %3951 = vmatprep.subr.mxu0 %v4795_v61  ;;  %v7356_v31 = vand.u32 4294901760, %v4810_v3  ;;  %v7355_v35 = vand.u32 4294901760, %v4813_v5  ;;  %v113_v53 = vld [vmem:[#allocation2 + $0xb0] sm:$0xff] }
  0x1f   :  { %3984 = vmatpush3.msra.mxu1 %v369_v55  ;;  %v7352_v36 = vand.u32 4294901760, %v4816_v6  ;;  %v4836_v37 = vsub.f32 %v99_v58, %v4818_v7  ;;  %3952 = vmatpush3.msra.mxu0 %v4797_v62  ;;  %v7351_v40 = vand.u32 4294901760, %v4823_v12  ;;  %v7353_v41 = vand.u32 4294901760, %v4826_v13  ;;  %v97_v54 = vld [vmem:[#allocation2 + $0x30] sm:$0xff] }
  0x20   :  { %7632 = vst [vmem:[#allocation9_spill] sm:$0xff] %v4829_v18  ;;  %3985 = vmatprep.subr.mxu1 %v488_v56  ;;  %v494_v39 = vsub.f32 %v4800_v63, %v7357_v11  ;;  %v7354_v42 = vand.u32 4294901760, %v4829_v18  ;;  %3953 = vmatprep.subr.mxu0 %v4802_v0  ;;  %v382_v43 = vsub.f32 %v4810_v3, %v7356_v31  ;;  %v4871_v31 = vand.u32 4294901760, %v114_v47  ;;  %v95_v11 = vld [vmem:[#allocation2 + $0x20] sm:$0xff] }
  0x21   :  { %7633 = vst [vmem:[#allocation10_spill] sm:$0xff] %v4836_v37  ;;  %3986 = vmatpush3.msra.mxu1 %v376_v59  ;;  %v501_v44 = vsub.f32 %v4813_v5, %v7355_v35  ;;  %v389_v45 = vsub.f32 %v4816_v6, %v7352_v36  ;;  %v7359_v46 = vand.u32 4294901760, %v4836_v37  ;;  %3954 = vmatpush3.msra.mxu0 %v4804_v1  ;;  %v111_v36 = vld [vmem:[#allocation2 + $0xa0] sm:$0xff]  ;;  %v4877_v38 = vand.u32 4294901760, %v97_v54 }
  0x22   :  { %v495_v48 = vand.u32 4294901760, %v494_v39  ;;  %v508_v49 = vsub.f32 %v4823_v12, %v7351_v40  ;;  %v396_v50 = vsub.f32 %v4826_v13, %v7353_v41  ;;  %v515_v51 = vsub.f32 %v4829_v18, %v7354_v42  ;;  %3955 = vmatprep.subr.mxu0 %v4806_v2  ;;  %v112_v39 = vld [vmem:[#allocation2 + $0xa8] sm:$0xff] }
  0x23   :  { %v383_v55 = vand.u32 4294901760, %v382_v43  ;;  %v502_v56 = vand.u32 4294901760, %v501_v44  ;;  %v390_v58 = vand.u32 4294901760, %v389_v45  ;;  %v403_v59 = vsub.f32 %v4836_v37, %v7359_v46  ;;  %v96_v40 = vld [vmem:[#allocation2 + $0x28] sm:$0xff]  ;;  %3956 = vmatpush3.msra.mxu0 %v4818_v7  ;;  %v91_v37 = vld [vmem:[#allocation2] sm:$0xff] }
  0x24   :  { %3987 = vmatprep.subr.mxu1 %v495_v48  ;;  %v509_v41 = vand.u32 4294901760, %v508_v49  ;;  %v397_v42 = vand.u32 4294901760, %v396_v50  ;;  %v516_v35 = vand.u32 4294901760, %v515_v51  ;;  %v4873_v44 = vand.u32 4294901760, %v98_v52  ;;  %3957 = vmatprep.subr.mxu0 %v4871_v31 }
  0x25   :  { %3988 = vmatpush3.msra.mxu1 %v383_v55  ;;  %v404_v43 = vand.u32 4294901760, %v403_v59  ;;  %v4875_v45 = vand.u32 4294901760, %v113_v53  ;;  %v4880_v46 = vsub.f32 %v114_v47, %v4871_v31  ;;  %v4882_v34 = vand.u32 4294901760, %v112_v39 }
  0x26   :  { %3989 = vmatprep.subr.mxu1 %v502_v56  ;;  %v4884_v48 = vand.u32 4294901760, %v96_v40  ;;  %v4886_v49 = vand.u32 4294901760, %v111_v36  ;;  %v4890_v50 = vsub.f32 %v98_v52, %v4873_v44  ;;  %v4896_v55 = vsub.f32 %v97_v54, %v4877_v38  ;;  %3958 = vmatpush3.msra.mxu0 %v4873_v44 }
  0x27   :  { %7634 = vst [vmem:[#allocation11_spill] sm:$0xff] %v4880_v46  ;;  %3990 = vmatpush3.msra.mxu1 %v390_v58  ;;  %v4893_v51 = vsub.f32 %v113_v53, %v4875_v45  ;;  %v4898_v47 = vand.u32 4294901760, %v95_v11  ;;  %v7362_v56 = vand.u32 4294901760, %v4880_v46  ;;  %v4903_v59 = vsub.f32 %v112_v39, %v4882_v34  ;;  %3959 = vmatprep.subr.mxu0 %v4875_v45 }
  0x28   :  { %7635 = vst [vmem:[#allocation12_spill] sm:$0xff] %v4890_v50  ;;  %7637 = vst [vmem:[#allocation14_spill] sm:$0xff] %v4896_v55  ;;  %3991 = vmatprep.subr.mxu1 %v509_v41  ;;  %v4906_v58 = vsub.f32 %v96_v40, %v4884_v48  ;;  %v4909_v52 = vsub.f32 %v111_v36, %v4886_v49  ;;  %v7366_v53 = vand.u32 4294901760, %v4890_v50  ;;  %v7369_v41 = vand.u32 4294901760, %v4896_v55 }
  0x29   :  { %7636 = vst [vmem:[#allocation13_spill] sm:$0xff] %v4893_v51  ;;  %7638 = vst [vmem:[#allocation15_spill] sm:$0xff] %v4903_v59  ;;  %3992 = vmatpush3.msra.mxu1 %v397_v42  ;;  %v7367_v54 = vand.u32 4294901760, %v4893_v51  ;;  %v4916_v33 = vsub.f32 %v95_v11, %v4898_v47  ;;  %3960 = vmatpush3.msra.mxu0 %v4877_v38  ;;  %v522_v36 = vsub.f32 %v4880_v46, %v7362_v56  ;;  %v107_v46 = vld [vmem:[#allocation2 + $0x80] sm:$0xff] }
  0x2a   :  { %7639 = vst [vmem:[#allocation16_spill] sm:$0xff] %v4906_v58  ;;  %7640 = vst [vmem:[#allocation17_spill] sm:$0xff] %v4909_v52  ;;  %3993 = vmatprep.subr.mxu1 %v516_v35  ;;  %v7375_v40 = vand.u32 4294901760, %v4903_v59  ;;  %v7382_v42 = vand.u32 4294901760, %v4906_v58  ;;  %v7383_v39 = vand.u32 4294901760, %v4909_v52  ;;  %3961 = vmatprep.subr.mxu0 %v4882_v34  ;;  %v410_v11 = vsub.f32 %v4890_v50, %v7366_v53  ;;  %v92_v50 = vld [vmem:[#allocation2 + $0x8] sm:$0xff] }
  0x2b   :  { %7641 = vst [vmem:[#allocation18_spill] sm:$0xff] %v4916_v33  ;;  %3994 = vmatpush3.msra.mxu1 %v404_v43  ;;  %v529_v35 = vsub.f32 %v4893_v51, %v7367_v54  ;;  %v417_v56 = vsub.f32 %v4896_v55, %v7369_v41  ;;  %3962 = vmatpush3.msra.mxu0 %v4884_v48  ;;  %v523_v28 = vand.u32 4294901760, %v522_v36  ;;  %v109_v41 = vld [vmem:[#allocation2 + $0x90] sm:$0xff]  ;;  %v7642_v51 = vand.u32 4294901760, %v4916_v33 }
  0x2c   :  { %v536_v43 = vsub.f32 %v4903_v59, %v7375_v40  ;;  %v424_v53 = vsub.f32 %v4906_v58, %v7382_v42  ;;  %v543_v54 = vsub.f32 %v4909_v52, %v7383_v39  ;;  %3963 = vmatprep.subr.mxu0 %v4886_v49  ;;  %v411_v32 = vand.u32 4294901760, %v410_v11  ;;  %v108_v59 = vld [vmem:[#allocation2 + $0x88] sm:$0xff] }
  0x2d   :  { %v530_v55 = vand.u32 4294901760, %v529_v35  ;;  %v418_v36 = vand.u32 4294901760, %v417_v56  ;;  %v431_v40 = vsub.f32 %v4916_v33, %v7642_v51  ;;  %3964 = vmatpush3.msra.mxu0 %v4898_v47  ;;  %3995 = vmatprep.subr.mxu1 %v523_v28  ;;  %v4951_v58 = vand.u32 4294901760, %v110_v29 }
  0x2e   :  { %v537_v42 = vand.u32 4294901760, %v536_v43  ;;  %v425_v39 = vand.u32 4294901760, %v424_v53  ;;  %v544_v52 = vand.u32 4294901760, %v543_v54  ;;  %3996 = vmatpush3.msra.mxu1 %v411_v32  ;;  %v4953_v35 = vand.u32 4294901760, %v94_v27 }
  0x2f   :  { %v432_v11 = vand.u32 4294901760, %v431_v40  ;;  %v4955_v56 = vand.u32 4294901760, %v109_v41  ;;  %v4957_v18 = vand.u32 4294901760, %v93_v23  ;;  %3997 = vmatprep.subr.mxu1 %v530_v55  ;;  %v4960_v51 = vsub.f32 %v110_v29, %v4951_v58  ;;  %3965 = vmatprep.subr.mxu0 %v4951_v58 }
  0x30   :  { %v4962_v33 = vand.u32 4294901760, %v108_v59  ;;  %v4964_v28 = vand.u32 4294901760, %v92_v50  ;;  %v4966_v53 = vand.u32 4294901760, %v107_v46  ;;  %3998 = vmatpush3.msra.mxu1 %v418_v36  ;;  %v4970_v32 = vsub.f32 %v94_v27, %v4953_v35  ;;  %3966 = vmatpush3.msra.mxu0 %v4953_v35 }
  0x31   :  { %7643 = vst [vmem:[#allocation19_spill] sm:$0xff] %v4955_v56  ;;  %7644 = vst [vmem:[#allocation20_spill] sm:$0xff] %v4957_v18  ;;  %v4973_v54 = vsub.f32 %v109_v41, %v4955_v56  ;;  %v4976_v55 = vsub.f32 %v93_v23, %v4957_v18  ;;  %v4978_v29 = vand.u32 4294901760, %v91_v37  ;;  %3999 = vmatprep.subr.mxu1 %v537_v42  ;;  %3967 = vmatprep.subr.mxu0 %v4955_v56 }
  0x32   :  { %7645 = vst [vmem:[#allocation21_spill] sm:$0xff] %v4960_v51  ;;  %7646 = vst [vmem:[#allocation22_spill] sm:$0xff] %v4962_v33  ;;  %v4983_v43 = vsub.f32 %v108_v59, %v4962_v33  ;;  %v4986_v36 = vsub.f32 %v92_v50, %v4964_v28  ;;  %v4989_v27 = vsub.f32 %v107_v46, %v4966_v53  ;;  %4000 = vmatpush3.msra.mxu1 %v425_v39 }
  0x33   :  { %7647 = vst [vmem:[#allocation23_spill] sm:$0xff] %v4964_v28  ;;  %7648 = vst [vmem:[#allocation24_spill] sm:$0xff] %v4966_v53  ;;  %v7400_v41 = vand.u32 4294901760, %v4973_v54  ;;  %v4996_v40 = vsub.f32 %v91_v37, %v4978_v29  ;;  %3968 = vmatpush3.msra.mxu0 %v4957_v18  ;;  %4001 = vmatprep.subr.mxu1 %v544_v52  ;;  %v7654_v50 = vand.u32 4294901760, %v4960_v51  ;;  %v7655_v42 = vand.u32 4294901760, %v4970_v32 }
  0x34   :  { %7649 = vst [vmem:[#allocation25_spill] sm:$0xff] %v4970_v32  ;;  %7650 = vst [vmem:[#allocation26_spill] sm:$0xff] %v4973_v54  ;;  %3969 = vmatprep.subr.mxu0 %v4962_v33  ;;  %4002 = vmatpush3.msra.mxu1 %v432_v11  ;;  %v7656_v18 = vand.u32 4294901760, %v4976_v55  ;;  %v7657_v39 = vand.u32 4294901760, %v4983_v43 }
  0x35   :  { %7651 = vst [vmem:[#allocation27_spill] sm:$0xff] %v4976_v55  ;;  %7652 = vst [vmem:[#allocation28_spill] sm:$0xff] %v4978_v29  ;;  %v550_v46 = vsub.f32 %v4960_v51, %v7654_v50  ;;  %v438_v37 = vsub.f32 %v4970_v32, %v7655_v42  ;;  %v557_v52 = vsub.f32 %v4973_v54, %v7400_v41  ;;  %3970 = vmatpush3.msra.mxu0 %v4964_v28 }
  0x36   :  { %7653 = vst [vmem:[#allocation29_spill] sm:$0xff] %v4986_v36  ;;  %v445_v50 = vsub.f32 %v4976_v55, %v7656_v18  ;;  %v564_v11 = vsub.f32 %v4983_v43, %v7657_v39  ;;  %v7658_v51 = vand.u32 4294901760, %v4986_v36  ;;  %v7659_v32 = vand.u32 4294901760, %v4989_v27  ;;  %3971 = vmatprep.subr.mxu0 %v4966_v53 }
  0x37   :  { %v551_v23 = vand.u32 4294901760, %v550_v46  ;;  %v439_v18 = vand.u32 4294901760, %v438_v37  ;;  %v558_v55 = vand.u32 4294901760, %v557_v52  ;;  %v7660_v54 = vand.u32 4294901760, %v4996_v40  ;;  %3972 = vmatpush3.msra.mxu0 %v4978_v29 }
  0x38   :  { %v452_v42 = vsub.f32 %v4986_v36, %v7658_v51  ;;  %v571_v41 = vsub.f32 %v4989_v27, %v7659_v32  ;;  %v446_v59 = vand.u32 4294901760, %v445_v50  ;;  %v565_v39 = vand.u32 4294901760, %v564_v11  ;;  %4017 = vmatprep.subr.mxu0 %v4720_v14 }
  0x39   :  { %v459_v46 = vsub.f32 %v4996_v40, %v7660_v54  ;;  %4003 = vmatprep.subr.mxu1 %v551_v23  ;;  %v28_v37 = vlaneseq }
  0x3a   :  { %4004 = vmatpush3.msra.mxu1 %v439_v18  ;;  %v453_v51 = vand.u32 4294901760, %v452_v42  ;;  %v572_v36 = vand.u32 4294901760, %v571_v41  ;;  %v7410_v41 = vmov 1.0  }
  0x3b   :  { %4005 = vmatprep.subr.mxu1 %v558_v55  ;;  %v460_v32 = vand.u32 4294901760, %v459_v46  ;;  %v5033_v54 = vand.u32 127, %v28_v37  ;;  %v7407_v55 = vmov 0.0  }
  0x3c   :  { %4006 = vmatpush3.msra.mxu1 %v446_v59 }
  0x3d   :  { %4007 = vmatprep.subr.mxu1 %v565_v39  ;;  %7661 = vst [vmem:[#allocation30_spill] sm:$0xff] %v5033_v54  ;;  %v5036_v23 = vadd.s32 128, %v5033_v54 }
  0x3e   :  { %4008 = vmatpush3.msra.mxu1 %v453_v51 }
  0x3f   :  { %4009 = vmatprep.subr.mxu1 %v572_v36 }
  0x40   :  { %4010 = vmatpush3.msra.mxu1 %v460_v32 }
  0x41   :  { %4055 = vmatprep.subr.mxu1 %v4711_v4 }
  0x8b   :  { %v5038_v52 = vpop.permute.xlu0 %38 }
  0x8c   :  { %7662 = vst [vmem:[#allocation31_spill] sm:$0xff] %v5038_v52  ;;  %vm44_vm0 = vcmp.eq.s32.totalorder %v5038_v52, %v5036_v23  ;;  %vm43_vm1 = vcmp.eq.s32.totalorder %v5038_v52, %v5033_v54 }
  0x8d   :  { %v3878_v36 = vsel %vm44_vm0, 1.0, %v7407_v55  ;;  %3893 = vmatprep.mubr.msk.f32.mxu1 %vm44_vm0, %v7410_v41  ;;  %v3877_v59 = vsel %vm43_vm1, 1.0, %v7407_v55 }
  0x8e   :  { %v320_v50 = vsub.f32 %v3878_v36, %v3878_v36  ;;  %v5056_v11 = vsub.f32 %v3877_v59, %v3877_v59  ;;  %3894 = vmatmul.mubr.msk.f32.vlgmr.msra.gmra.mxu1 %vm43_vm1, %v7410_v41 }
  0x8f   :  { %4056 = vmatpush3.msra.mxu1 %v4713_v8  ;;  %v5063_v42 = vpop.permute.xlu0 %41 }
  0x90   :  { %7663 = vst [vmem:[#allocation32_spill] sm:$0xff] %v5063_v42  ;;  %4057 = vmatprep.subr.mxu1 %v4715_v9  ;;  %vm52_vm2 = vcmp.eq.s32.totalorder %v5063_v42, %v5036_v23  ;;  %vm51_vm3 = vcmp.eq.s32.totalorder %v5063_v42, %v5033_v54  ;;  %v321_v18 = vand.u32 4294901760, %v320_v50  ;;  %v7412_v46 = vand.u32 4294901760, %v5056_v11  ;;  %v7673_v42 = vld [vmem:[#allocation17_spill] sm:$0xff] }
  0x91   :  { %4058 = vmatpush3.msra.mxu1 %v4717_v10  ;;  %v3886_v39 = vsel %vm52_vm2, 1.0, %v7407_v55  ;;  %3895 = vmatprep.mubr.msk.f32.mxu1 %vm52_vm2, %v7410_v41  ;;  %v3885_v51 = vsel %vm51_vm3, 1.0, %v7407_v55 }
  0x92   :  { %v5084_v32 = vsub.f32 %v3886_v39, %v3886_v39  ;;  %4059 = vmatprep.subr.mxu1 %v4722_v15  ;;  %v5087_v37 = vsub.f32 %v3885_v51, %v3885_v51  ;;  %3896 = vmatmul.mubr.msk.f32.gmra.mxu1 %vm51_vm3, %v7410_v41  ;;  %v322_v36 = vsub.f32 %v320_v50, %v321_v18 }
  0x93   :  { %4060 = vmatpush3.msra.mxu1 %v4724_v16  ;;  %835 = vmatprep.mubr.f32.mxu1 %v321_v18  ;;  %v328_v59 = vsub.f32 %v5056_v11, %v7412_v46 }
  0x94   :  { %4061 = vmatprep.subr.mxu1 %v4726_v17  ;;  %v323_v39 = vand.u32 4294901760, %v322_v36  ;;  %v336_v55 = vand.u32 4294901760, %v5084_v32  ;;  %v7413_v51 = vand.u32 4294901760, %v5087_v37 }
  0x95   :  { %4062 = vmatpush3.msra.mxu1 %v4738_v22  ;;  %v329_v14 = vand.u32 4294901760, %v328_v59  ;;  %v7668_v59 = vld [vmem:[#allocation13_spill] sm:$0xff] }
  0x96   :  { %4063 = vmatprep.subr.mxu1 %v4791_v57  ;;  %324 = vmatprep.mubr.f32.mxu0 %v323_v39  ;;  %v337_v41 = vsub.f32 %v5084_v32, %v336_v55  ;;  %v343_v18 = vsub.f32 %v5087_v37, %v7413_v51  ;;  %v7669_v39 = vld [vmem:[#allocation20_spill] sm:$0xff] }
  0x97   :  { %4064 = vmatpush3.msra.mxu1 %v4793_v60  ;;  %330 = vmatmul.mubr.f32.vlgmr.msra.gmra.mxu0 %v329_v14  ;;  %v7664_v14 = vld [vmem:[#allocation9_spill] sm:$0xff]  ;;  %v7672_v51 = vld [vmem:[#allocation16_spill] sm:$0xff] }
  0x98   :  { %4018 = vmatpush3.msra.mxu0 %v4730_v19  ;;  %4065 = vmatprep.subr.mxu1 %v4795_v61  ;;  %v338_v36 = vand.u32 4294901760, %v337_v41  ;;  %v344_v46 = vand.u32 4294901760, %v343_v18  ;;  %v7665_v41 = vld [vmem:[#allocation10_spill] sm:$0xff] }
  0x99   :  { %4019 = vmatprep.subr.mxu0 %v4733_v20  ;;  %4066 = vmatpush3.msra.mxu1 %v4797_v62  ;;  %v7670_v18 = vld [vmem:[#allocation14_spill] sm:$0xff] }
  0x9a   :  { %4020 = vmatpush3.msra.mxu0 %v4736_v21  ;;  %4067 = vmatprep.subr.mxu1 %v4802_v0 }
  0x9b   :  { %339 = vmatprep.mubr.f32.mxu0 %v338_v36  ;;  %4021 = vmatprep.subr.mxu0 %v4743_v24  ;;  %v7671_v36 = vld [vmem:[#allocation15_spill] sm:$0xff] }
  0x9c   :  { %4068 = vmatpush3.msra.mxu1 %v4804_v1  ;;  %345 = vmatmul.mubr.f32.gmra.mxu0 %v344_v46  ;;  %v7667_v46 = vld [vmem:[#allocation12_spill] sm:$0xff] }
  0x9d   :  { %4022 = vmatpush3.msra.mxu0 %v4746_v25  ;;  %4069 = vmatprep.subr.mxu1 %v4806_v2 }
  0x9e   :  { %4023 = vmatprep.subr.mxu0 %v4749_v26  ;;  %719 = vmatprep.mubr.f32.mxu0 %v320_v50  ;;  %v7666_v50 = vld [vmem:[#allocation11_spill] sm:$0xff] }
  0x9f   :  { %4070 = vmatpush3.msra.mxu1 %v4818_v7  ;;  %4024 = vmatpush3.msra.mxu0 %v4756_v30 }
  0xa0   :  { %4071 = vmatprep.subr.mxu1 %v4871_v31  ;;  %4025 = vmatprep.subr.mxu0 %v4800_v63 }
  0xa1   :  { %4072 = vmatpush3.msra.mxu1 %v4873_v44  ;;  %4026 = vmatpush3.msra.mxu0 %v4810_v3 }
  0xa2   :  { %4073 = vmatprep.subr.mxu1 %v4875_v45  ;;  %4027 = vmatprep.subr.mxu0 %v4813_v5 }
  0xa3   :  { %4074 = vmatpush3.msra.mxu1 %v4877_v38  ;;  %4028 = vmatpush3.msra.mxu0 %v4816_v6 }
  0xa4   :  { %4075 = vmatprep.subr.mxu1 %v4882_v34  ;;  %4029 = vmatprep.subr.mxu0 %v4823_v12 }
  0xa5   :  { %4076 = vmatpush3.msra.mxu1 %v4884_v48  ;;  %4030 = vmatpush3.msra.mxu0 %v4826_v13 }
  0xa6   :  { %4077 = vmatprep.subr.mxu1 %v4886_v49  ;;  %4031 = vmatprep.subr.mxu0 %v7664_v14 }
  0xa7   :  { %4078 = vmatpush3.msra.mxu1 %v4898_v47  ;;  %4032 = vmatpush3.msra.mxu0 %v7665_v41 }
  0xa8   :  { %4079 = vmatprep.subr.mxu1 %v4951_v58  ;;  %4033 = vmatprep.subr.mxu0 %v7666_v50 }
  0xa9   :  { %4080 = vmatpush3.msra.mxu1 %v4953_v35  ;;  %4034 = vmatpush3.msra.mxu0 %v7667_v46 }
  0xaa   :  { %4081 = vmatprep.subr.mxu1 %v4955_v56  ;;  %4035 = vmatprep.subr.mxu0 %v7668_v59  ;;  %v7674_v56 = vld [vmem:[#allocation18_spill] sm:$0xff] }
  0xab   :  { %4082 = vmatpush3.msra.mxu1 %v7669_v39  ;;  %4036 = vmatpush3.msra.mxu0 %v7670_v18  ;;  %v7675_v39 = vand.u32 4294901760, %v5056_v11 }
  0xac   :  { %4083 = vmatprep.subr.mxu1 %v4962_v33  ;;  %4037 = vmatprep.subr.mxu0 %v7671_v36  ;;  %v7676_v33 = vld [vmem:[#allocation21_spill] sm:$0xff] }
  0xad   :  { %4084 = vmatpush3.msra.mxu1 %v4964_v28  ;;  %4038 = vmatpush3.msra.mxu0 %v7672_v51  ;;  %v7677_v28 = vld [vmem:[#allocation25_spill] sm:$0xff] }
  0xae   :  { %4085 = vmatprep.subr.mxu1 %v4966_v53  ;;  %4039 = vmatprep.subr.mxu0 %v7673_v42  ;;  %v7678_v53 = vld [vmem:[#allocation26_spill] sm:$0xff] }
  0xaf   :  { %4086 = vmatpush3.msra.mxu1 %v4978_v29  ;;  %4040 = vmatpush3.msra.mxu0 %v7674_v56  ;;  %v7679_v29 = vld [vmem:[#allocation27_spill] sm:$0xff]  ;;  %v7680_v56 = vand.u32 4294901760, %v5087_v37 }
  0xb0   :  { %839 = vmatmul.mubr.f32.vlgmr.msra.gmra.mxu1 %v7675_v39  ;;  %4131 = vmatprep.subr.mxu1 %v4711_v4  ;;  %v7681_v4 = vmov 1.0   ;;  %v7695_v39 = vand.u32 4294901760, %v4756_v30  ;;  %v7699_v30 = vand.u32 4294901760, %v4810_v3  ;;  %v7702_v3 = vand.u32 4294901760, %v4816_v6 }
  0xb1   :  { %4041 = vmatprep.subr.mxu0 %v7676_v33  ;;  %846 = vmatprep.mubr.f32.mxu1 %v336_v55  ;;  %v137_v55 = vld [vmem:[#allocation2 + $0x170] sm:$0xff]  ;;  %v7705_v6 = vand.u32 4294901760, %v4826_v13 }
  0xb2   :  { %4132 = vmatpush3.msra.mxu1 %v4713_v8  ;;  %4042 = vmatpush3.msra.mxu0 %v7677_v28  ;;  %v7682_v8 = vld [vmem:[#allocation29_spill] sm:$0xff] }
  0xb3   :  { %4133 = vmatprep.subr.mxu1 %v4715_v9  ;;  %4043 = vmatprep.subr.mxu0 %v7678_v53  ;;  %v154_v9 = vld [vmem:[#allocation2 + $0x1f8] sm:$0xff] }
  0xb4   :  { %4134 = vmatpush3.msra.mxu1 %v4717_v10  ;;  %4044 = vmatpush3.msra.mxu0 %v7679_v29  ;;  %v7683_v10 = vld [vmem:[#allocation8_spill] sm:$0xff] }
  0xb5   :  { %850 = vmatmul.mubr.f32.gmra.mxu1 %v7680_v56  ;;  %4135 = vmatprep.subr.mxu1 %v4722_v15  ;;  %v7684_v15 = vand.u32 4294901760, %v7683_v10  ;;  %v153_v56 = vld [vmem:[#allocation2 + $0x1f0] sm:$0xff] }
  0xb6   :  { %4045 = vmatprep.subr.mxu0 %v4983_v43  ;;  %4136 = vmatpush3.msra.mxu1 %v4724_v16  ;;  %v138_v16 = vld [vmem:[#allocation2 + $0x178] sm:$0xff] }
  0xb7   :  { %3901 = vmatprep.mubr.msk.f32.mxu1 %vm44_vm0, %v7681_v4  ;;  %4046 = vmatpush3.msra.mxu0 %v7682_v8 }
  0xb8   :  { %4137 = vmatprep.subr.mxu1 %v4726_v17  ;;  %4047 = vmatprep.subr.mxu0 %v4989_v27  ;;  %v7685_v17 = vand.u32 4294901760, %v4730_v19  ;;  %v152_v19 = vld [vmem:[#allocation2 + $0x1e8] sm:$0xff] }
  0xb9   :  { %4138 = vmatpush3.msra.mxu1 %v4738_v22  ;;  %4048 = vmatpush3.msra.mxu0 %v4996_v40  ;;  %v7686_v22 = vand.u32 4294901760, %v4733_v20  ;;  %v5199_v20 = vand.u32 4294901760, %v153_v56 }
  0xba   :  { %4139 = vmatprep.subr.mxu1 %v4791_v57  ;;  %722 = vmatmul.mubr.f32.vlgmr.msra.gmra.mxu0 %v5056_v11  ;;  %v5187_v57 = vand.u32 4294901760, %v154_v9  ;;  %v7688_v11 = vand.u32 4294901760, %v4736_v21  ;;  %v7691_v21 = vand.u32 4294901760, %v4746_v25  ;;  %v151_v25 = vld [vmem:[#allocation2 + $0x1e0] sm:$0xff] }
  0xbb   :  { %4093 = vmatprep.subr.mxu0 %v7684_v15  ;;  %4140 = vmatpush3.msra.mxu1 %v4793_v60  ;;  %v5192_v60 = vand.u32 4294901760, %v138_v16 }
  0xbc   :  { %728 = vmatprep.mubr.f32.mxu0 %v5084_v32  ;;  %4094 = vmatpush3.msra.mxu0 %v7685_v17  ;;  %7687 = vst [vmem:[#allocation9_spill] sm:$0xff] %v5187_v57  ;;  %v5201_v32 = vand.u32 4294901760, %v137_v55  ;;  %v5238_v17 = vand.u32 4294901760, %v151_v25 }
  0xbd   :  { %4141 = vmatprep.subr.mxu1 %v4795_v61  ;;  %4095 = vmatprep.subr.mxu0 %v7686_v22  ;;  %7689 = vst [vmem:[#allocation10_spill] sm:$0xff] %v5192_v60  ;;  %v7690_v61 = vand.u32 4294901760, %v4743_v24  ;;  %v7693_v24 = vand.u32 4294901760, %v4749_v26  ;;  %v5229_v26 = vsub.f32 %v153_v56, %v5199_v20 }
  0xbe   :  { %4142 = vmatpush3.msra.mxu1 %v4797_v62  ;;  %4096 = vmatpush3.msra.mxu0 %v7688_v11  ;;  %v136_v62 = vld [vmem:[#allocation2 + $0x168] sm:$0xff]  ;;  %v5232_v15 = vsub.f32 %v137_v55, %v5201_v32 }
  0xbf   :  { %4143 = vmatprep.subr.mxu1 %v4802_v0  ;;  %731 = vmatmul.mubr.f32.gmra.mxu0 %v5087_v37  ;;  %v5210_v0 = vsub.f32 %v154_v9, %v5187_v57  ;;  %v5218_v37 = vand.u32 4294901760, %v152_v19  ;;  %v5223_v10 = vand.u32 4294901760, %v136_v62  ;;  %v135_v9 = vld [vmem:[#allocation2 + $0x160] sm:$0xff]  ;;  %7697 = vst [vmem:[#allocation13_spill] sm:$0xff] %v5229_v26 }
  0xc0   :  { %4097 = vmatprep.subr.mxu0 %v7690_v61  ;;  %4144 = vmatpush3.msra.mxu1 %v4804_v1  ;;  %v5216_v1 = vsub.f32 %v138_v16, %v5192_v60  ;;  %7698 = vst [vmem:[#allocation14_spill] sm:$0xff] %v5232_v15  ;;  %v150_v16 = vld [vmem:[#allocation2 + $0x1d8] sm:$0xff]  ;;  %v5247_v55 = vand.u32 4294901760, %v135_v9  ;;  %v7704_v61 = vand.u32 4294901760, %v4823_v12 }
  0xc1   :  { %4098 = vmatpush3.msra.mxu0 %v7691_v21  ;;  %3897 = vmatprep.mubr.msk.f32.mxu0 %vm44_vm0, %v7681_v4  ;;  %7692 = vst [vmem:[#allocation11_spill] sm:$0xff] %v5210_v0  ;;  %v5245_v56 = vsub.f32 %v152_v19, %v5218_v37  ;;  %v5253_v11 = vsub.f32 %v136_v62, %v5223_v10  ;;  %v7421_v19 = vand.u32 4294901760, %v5229_v26  ;;  %v7422_v21 = vand.u32 4294901760, %v5232_v15 }
  0xc2   :  { %4145 = vmatprep.subr.mxu1 %v4806_v2  ;;  %4099 = vmatprep.subr.mxu0 %v7693_v24  ;;  %7694 = vst [vmem:[#allocation12_spill] sm:$0xff] %v5216_v1  ;;  %v7696_v2 = vand.u32 4294901760, %v4800_v63  ;;  %v7700_v63 = vand.u32 4294901760, %v4813_v5  ;;  %v7423_v22 = vand.u32 4294901760, %v5216_v1  ;;  %v133_v5 = vld [vmem:[#allocation2 + $0x150] sm:$0xff] }
  0xc3   :  { %4146 = vmatpush3.msra.mxu1 %v4818_v7  ;;  %4100 = vmatpush3.msra.mxu0 %v7695_v39  ;;  %v7424_v7 = vand.u32 4294901760, %v5210_v0  ;;  %7701 = vst [vmem:[#allocation15_spill] sm:$0xff] %v5245_v56  ;;  %7703 = vst [vmem:[#allocation16_spill] sm:$0xff] %v5253_v11  ;;  %v132_v39 = vld [vmem:[#allocation2 + $0x148] sm:$0xff] }
  0xc4   :  { %4147 = vmatprep.subr.mxu1 %v4871_v31  ;;  %4101 = vmatprep.subr.mxu0 %v7696_v2  ;;  %v134_v31 = vld [vmem:[#allocation2 + $0x158] sm:$0xff]  ;;  %v7707_v2 = vand.u32 4294901760, %v7664_v14  ;;  %v5283_v13 = vsub.f32 %v5216_v1, %v7423_v22  ;;  %v7426_v14 = vand.u32 4294901760, %v5253_v11  ;;  %v7715_v22 = vld [vmem:[#allocation19_spill] sm:$0xff] }
  0xc5   :  { %4148 = vmatpush3.msra.mxu1 %v4873_v44  ;;  %4102 = vmatpush3.msra.mxu0 %v7699_v30  ;;  %v149_v44 = vld [vmem:[#allocation2 + $0x1d0] sm:$0xff]  ;;  %v5262_v24 = vand.u32 4294901760, %v134_v31  ;;  %v5270_v62 = vsub.f32 %v5210_v0, %v7424_v7  ;;  %v5287_v30 = vsub.f32 %v135_v9, %v5247_v55  ;;  %v7711_v9 = vand.u32 4294901760, %v7666_v50 }
  0xc6   :  { %4149 = vmatprep.subr.mxu1 %v4875_v45  ;;  %4103 = vmatprep.subr.mxu0 %v7700_v63  ;;  %v5255_v45 = vand.u32 4294901760, %v150_v16  ;;  %v5275_v12 = vand.u32 4294901760, %v149_v44  ;;  %v147_v63 = vld [vmem:[#allocation2 + $0x1c0] sm:$0xff]  ;;  %v1273_v7 = vand.u32 4294901760, %v5283_v13 }
  0xc7   :  { %4150 = vmatpush3.msra.mxu1 %v4877_v38  ;;  %4104 = vmatpush3.msra.mxu0 %v7702_v3  ;;  %v148_v38 = vld [vmem:[#allocation2 + $0x1c8] sm:$0xff]  ;;  %7708 = vst [vmem:[#allocation21_spill] sm:$0xff] %v5287_v30  ;;  %v5296_v3 = vadd.s32 384, %v5033_v54  ;;  %v1385_v50 = vand.u32 4294901760, %v5270_v62 }
  0xc8   :  { %4151 = vmatprep.subr.mxu1 %v4882_v34  ;;  %4105 = vmatprep.subr.mxu0 %v7704_v61  ;;  %v5273_v34 = vsub.f32 %v151_v25, %v5238_v17  ;;  %v5289_v25 = vand.u32 4294901760, %v133_v5  ;;  %v5299_v61 = vsub.f32 %v150_v16, %v5255_v45  ;;  %v5317_v16 = vsub.f32 %v134_v31, %v5262_v24 }
  0xc9   :  { %4152 = vmatpush3.msra.mxu1 %v4884_v48  ;;  %4106 = vmatpush3.msra.mxu0 %v7705_v6  ;;  %v7425_v48 = vand.u32 4294901760, %v5245_v56  ;;  %v5301_v6 = vand.u32 4294901760, %v148_v38  ;;  %v7716_v31 = vand.u32 4294901760, %v7668_v59  ;;  %v5350_v59 = vsub.f32 %v5253_v11, %v7426_v14 }
  0xca   :  { %7706 = vst [vmem:[#allocation17_spill] sm:$0xff] %v5273_v34  ;;  %4153 = vmatprep.subr.mxu1 %v4886_v49  ;;  %4107 = vmatprep.subr.mxu0 %v7707_v2  ;;  %v7709_v49 = vand.u32 4294901760, %v7665_v41  ;;  %7710 = vst [vmem:[#allocation25_spill] sm:$0xff] %v5299_v61  ;;  %v5314_v41 = vsub.f32 %v5232_v15, %v7422_v21  ;;  %v5319_v2 = vand.u32 4294901760, %v132_v39  ;;  %v5329_v21 = vand.u32 4294901760, %v147_v63 }
  0xcb   :  { %4154 = vmatpush3.msra.mxu1 %v4898_v47  ;;  %v5309_v47 = vsub.f32 %v5229_v26, %v7421_v19  ;;  %7712 = vst [vmem:[#allocation26_spill] sm:$0xff] %v5317_v16  ;;  %v5327_v19 = vsub.f32 %v149_v44, %v5275_v12  ;;  %v5342_v62 = vsub.f32 %v133_v5, %v5289_v25  ;;  %v7718_v44 = vld [vmem:[#allocation20_spill] sm:$0xff]  ;;  %v7721_v5 = vld [vmem:[#allocation22_spill] sm:$0xff] }
  0xcc   :  { %4108 = vmatpush3.msra.mxu0 %v7709_v49  ;;  %4155 = vmatprep.subr.mxu1 %v4951_v58  ;;  %v131_v49 = vld [vmem:[#allocation2 + $0x140] sm:$0xff]  ;;  %v7713_v58 = vand.u32 4294901760, %v7667_v46  ;;  %v5354_v13 = vsub.f32 %v148_v38, %v5301_v6  ;;  %v5365_v46 = vsub.f32 %v132_v39, %v5319_v2  ;;  %v7725_v38 = vand.u32 4294901760, %v7672_v51  ;;  %v130_v39 = vld [vmem:[#allocation2 + $0x138] sm:$0xff] }
  0xcd   :  { %4109 = vmatprep.subr.mxu0 %v7711_v9  ;;  %4156 = vmatpush3.msra.mxu1 %v4953_v35  ;;  %v7427_v9 = vand.u32 4294901760, %v5273_v34  ;;  %7714 = vst [vmem:[#allocation27_spill] sm:$0xff] %v5327_v19  ;;  %v5338_v35 = vsub.f32 %v5245_v56, %v7425_v48  ;;  %7717 = vst [vmem:[#allocation29_spill] sm:$0xff] %v5342_v62  ;;  %v146_v48 = vld [vmem:[#allocation2 + $0x1b8] sm:$0xff]  ;;  %vm46_vm4 = vcmp.eq.s32.totalorder %v5038_v52, %v5296_v3 }
  0xce   :  { %4110 = vmatpush3.msra.mxu0 %v7713_v58  ;;  %4157 = vmatprep.subr.mxu1 %v7715_v22  ;;  %v7719_v58 = vand.u32 4294901760, %v7670_v18  ;;  %7720 = vst [vmem:[#allocation8_spill] sm:$0xff] %v5354_v13  ;;  %v1392_v18 = vand.u32 4294901760, %v5309_v47  ;;  %7723 = vst [vmem:[#allocation19_spill] sm:$0xff] %v5365_v46  ;;  %v7724_v22 = vld [vmem:[#allocation23_spill] sm:$0xff]  ;;  %v5391_v14 = vand.u32 4294901760, %v146_v48 }
  0xcf   :  { %4111 = vmatprep.subr.mxu0 %v7716_v31  ;;  %4158 = vmatpush3.msra.mxu1 %v7718_v44  ;;  %v5356_v31 = vand.u32 4294901760, %v131_v49  ;;  %v7722_v44 = vand.u32 4294901760, %v7671_v36  ;;  %v5375_v36 = vsub.f32 %v5273_v34, %v7427_v9  ;;  %v1399_v51 = vand.u32 4294901760, %v5338_v35  ;;  %v145_v47 = vld [vmem:[#allocation2 + $0x1b0] sm:$0xff]  ;;  %v7732_v34 = vld [vmem:[#allocation18_spill] sm:$0xff] }
  0xd0   :  { %4112 = vmatpush3.msra.mxu0 %v7719_v58  ;;  %4159 = vmatprep.subr.mxu1 %v7721_v5  ;;  %v1280_v58 = vand.u32 4294901760, %v5314_v41  ;;  %v5379_v41 = vsub.f32 %v147_v63, %v5329_v21  ;;  %v7727_v5 = vld [vmem:[#allocation24_spill] sm:$0xff]  ;;  %7730 = vst [vmem:[#allocation22_spill] sm:$0xff] %v5391_v14  ;;  %v7733_v11 = vand.u32 4294901760, %v7732_v34  ;;  %v129_v9 = vld [vmem:[#allocation2 + $0x130] sm:$0xff]  ;;  %v7744_v15 = vand.u32 4294901760, %v5342_v62 }
  0xd1   :  { %4113 = vmatprep.subr.mxu0 %v7722_v44  ;;  %4160 = vmatpush3.msra.mxu1 %v7724_v22  ;;  %v7728_v22 = vand.u32 4294901760, %v7673_v42  ;;  %v7729_v44 = vand.u32 4294901760, %v5287_v30  ;;  %v7731_v63 = vld [vmem:[#allocation28_spill] sm:$0xff]  ;;  %v1287_v42 = vand.u32 4294901760, %v5350_v59  ;;  %v7737_v59 = vand.u32 4294901760, %v5317_v16 }
  0xd2   :  { %4114 = vmatpush3.msra.mxu0 %v7725_v38  ;;  %7726 = vst [vmem:[#allocation20_spill] sm:$0xff] %v5379_v41  ;;  %4161 = vmatprep.subr.mxu1 %v7727_v5  ;;  %v7734_v5 = vand.u32 4294901760, %v5299_v61  ;;  %v5446_v26 = vsub.f32 %v146_v48, %v5391_v14  ;;  %v143_v48 = vld [vmem:[#allocation2 + $0x1a0] sm:$0xff] }
  0xd3   :  { %4115 = vmatprep.subr.mxu0 %v7728_v22  ;;  %v5388_v38 = vsub.f32 %v5287_v30, %v7729_v44  ;;  %4162 = vmatpush3.msra.mxu1 %v7731_v63  ;;  %v5404_v44 = vsub.f32 %v131_v49, %v5356_v31  ;;  %v5417_v63 = vsub.f32 %v5317_v16, %v7737_v59  ;;  %v7739_v22 = vand.u32 4294901760, %v7676_v33  ;;  %v144_v16 = vld [vmem:[#allocation2 + $0x1a8] sm:$0xff] }
  0xd4   :  { %4116 = vmatpush3.msra.mxu0 %v7733_v11  ;;  %v5400_v35 = vsub.f32 %v5299_v61, %v7734_v5  ;;  %3902 = vmatmul.mubr.msk.f32.vlgmr.msra.gmra.mxu1 %vm43_vm1, %v7681_v4  ;;  %v7736_v11 = vmov 0.0   ;;  %v5420_v5 = vand.u32 4294901760, %v130_v39  ;;  %v7740_v61 = vld [vmem:[#allocation32_spill] sm:$0xff]  ;;  %v7741_v30 = vand.u32 4294901760, %v5327_v19  ;;  %7745 = vst [vmem:[#allocation18_spill] sm:$0xff] %v5446_v26  ;;  %v128_v59 = vld [vmem:[#allocation2 + $0x128] sm:$0xff] }
  0xd5   :  { %7735 = vst [vmem:[#allocation23_spill] sm:$0xff] %v5404_v44  ;;  %4207 = vmatprep.subr.mxu1 %v1385_v50  ;;  %v3880_v34 = vsel %vm46_vm4, 1.0, %v7736_v11  ;;  %4117 = vmatprep.subr.mxu0 %v7739_v22  ;;  %v1406_v50 = vand.u32 4294901760, %v5375_v36  ;;  %v5435_v49 = vand.u32 4294901760, %v145_v47  ;;  %v7743_v33 = vand.u32 4294901760, %v7677_v28 }
  0xd6   :  { %7738 = vst [vmem:[#allocation24_spill] sm:$0xff] %v5420_v5  ;;  %3903 = vmatprep.mubr.msk.f32.mxu1 %vm52_vm2, %v7681_v4  ;;  %v5432_v56 = vsub.f32 %v5327_v19, %v7741_v30  ;;  %4208 = vmatpush3.msra.mxu1 %v1273_v7  ;;  %v1294_v22 = vand.u32 4294901760, %v5388_v38  ;;  %v5443_v36 = vsub.f32 %v5342_v62, %v7744_v15  ;;  %v5448_v30 = vand.u32 4294901760, %v129_v9 }
  0xd7   :  { %7742 = vst [vmem:[#allocation28_spill] sm:$0xff] %v5435_v49  ;;  %4118 = vmatpush3.msra.mxu0 %v7743_v33  ;;  %4209 = vmatprep.subr.mxu1 %v1392_v18  ;;  %v7747_v19 = vand.u32 4294901760, %v7678_v53  ;;  %v5452_v7 = vsub.f32 %v3880_v34, %v3880_v34  ;;  %v1413_v28 = vand.u32 4294901760, %v5400_v35  ;;  %v7749_v38 = vand.u32 4294901760, %v5354_v13 }
  0xd8   :  { %7746 = vst [vmem:[#allocation33_spill] sm:$0xff] %v5448_v30  ;;  %4210 = vmatpush3.msra.mxu1 %v1280_v58  ;;  %v7750_v62 = vand.u32 4294901760, %v7679_v29  ;;  %v1301_v18 = vand.u32 4294901760, %v5417_v63  ;;  %v7751_v53 = vand.u32 4294901760, %v5365_v46  ;;  %v5470_v35 = vsub.f32 %v130_v39, %v5420_v5 }
  0xd9   :  { %4119 = vmatprep.subr.mxu0 %v7747_v19  ;;  %7748 = vst [vmem:[#allocation34_spill] sm:$0xff] %v5452_v7  ;;  %v5458_v33 = vsub.f32 %v5354_v13, %v7749_v38  ;;  %v5472_v34 = vand.u32 4294901760, %v144_v16  ;;  %v127_v38 = vld [vmem:[#allocation2 + $0x120] sm:$0xff]  ;;  %3904 = vmatmul.mubr.msk.f32.gmra.mxu1 %vm51_vm3, %v7681_v4  ;;  %v1420_v29 = vand.u32 4294901760, %v5432_v56  ;;  %v5485_v63 = vsub.f32 %v145_v47, %v5435_v49 }
  0xda   :  { %4120 = vmatpush3.msra.mxu0 %v7750_v62  ;;  %v5467_v19 = vsub.f32 %v5365_v46, %v7751_v53  ;;  %7752 = vst [vmem:[#allocation35_spill] sm:$0xff] %v5470_v35  ;;  %4211 = vmatprep.subr.mxu1 %v1399_v51  ;;  %v7754_v62 = vand.u32 4294901760, %v5379_v41  ;;  %v5487_v39 = vand.u32 4294901760, %v128_v59  ;;  %v142_v53 = vld [vmem:[#allocation2 + $0x198] sm:$0xff]  ;;  %v7757_v15 = vand.u32 4294901760, %v4983_v43  ;;  %v141_v51 = vld [vmem:[#allocation2 + $0x190] sm:$0xff] }
  0xdb   :  { %7753 = vst [vmem:[#allocation36_spill] sm:$0xff] %v5472_v34  ;;  %7755 = vst [vmem:[#allocation37_spill] sm:$0xff] %v5485_v63  ;;  %4212 = vmatpush3.msra.mxu1 %v1287_v42  ;;  %v1308_v46 = vand.u32 4294901760, %v5443_v36  ;;  %v5494_v56 = vsub.f32 %v129_v9, %v5448_v30  ;;  %v5496_v13 = vand.u32 4294901760, %v143_v48  ;;  %3905 = vmatprep.mubr.msk.f32.mxu1 %vm46_vm4, %v7681_v4  ;;  %v7760_v47 = vand.u32 4294901760, %v7682_v8  ;;  %v125_v42 = vld [vmem:[#allocation2 + $0x110] sm:$0xff] }
  0xdc   :  { %v5482_v58 = vsub.f32 %v5379_v41, %v7754_v62  ;;  %7756 = vst [vmem:[#allocation38_spill] sm:$0xff] %v5487_v39  ;;  %4121 = vmatprep.subr.mxu0 %v7757_v15  ;;  %v126_v62 = vld [vmem:[#allocation2 + $0x118] sm:$0xff]  ;;  %v1427_v43 = vand.u32 4294901760, %v5458_v33  ;;  %v7761_v36 = vand.u32 4294901760, %v5404_v44  ;;  %v5511_v15 = vand.u32 4294901760, %v127_v38  ;;  %4213 = vmatprep.subr.mxu1 %v1406_v50 }
  0xdd   :  { %7758 = vst [vmem:[#allocation39_spill] sm:$0xff] %v5494_v56  ;;  %7759 = vst [vmem:[#allocation40_spill] sm:$0xff] %v5496_v13  ;;  %4122 = vmatpush3.msra.mxu0 %v7760_v47  ;;  %v7762_v41 = vand.u32 4294901760, %v4989_v27  ;;  %v1315_v1 = vand.u32 4294901760, %v5467_v19  ;;  %v5518_v33 = vsub.f32 %v144_v16, %v5472_v34  ;;  %v5520_v47 = vand.u32 4294901760, %v142_v53  ;;  %4214 = vmatpush3.msra.mxu1 %v1294_v22  ;;  %v140_v19 = vld [vmem:[#allocation2 + $0x188] sm:$0xff] }
  0xde   :  { %v5509_v9 = vsub.f32 %v5404_v44, %v7761_v36  ;;  %v7764_v36 = vand.u32 4294901760, %v4996_v40  ;;  %v1434_v44 = vand.u32 4294901760, %v5482_v58  ;;  %v5527_v27 = vsub.f32 %v128_v59, %v5487_v39  ;;  %4215 = vmatprep.subr.mxu1 %v1413_v28  ;;  %v139_v22 = vld [vmem:[#allocation2 + $0x180] sm:$0xff] }
  0xdf   :  { %4123 = vmatprep.subr.mxu0 %v7762_v41  ;;  %7763 = vst [vmem:[#allocation41_spill] sm:$0xff] %v5518_v33  ;;  %v5529_v41 = vand.u32 4294901760, %v126_v62  ;;  %v7765_v16 = vand.u32 4294901760, %v5446_v26  ;;  %v5540_v58 = vsub.f32 %v143_v48, %v5496_v13  ;;  %v5542_v59 = vand.u32 4294901760, %v141_v51  ;;  %4216 = vmatpush3.msra.mxu1 %v1301_v18 }
  0xe0   :  { %4124 = vmatpush3.msra.mxu0 %v7764_v36  ;;  %v124_v36 = vld [vmem:[#allocation2 + $0x108] sm:$0xff]  ;;  %v7766_v28 = vand.u32 4294901760, %v5452_v7  ;;  %v1322_v8 = vand.u32 4294901760, %v5509_v9  ;;  %v5550_v0 = vsub.f32 %v127_v38, %v5511_v15  ;;  %v7768_v48 = vand.u32 4294901760, %v5470_v35  ;;  %4217 = vmatprep.subr.mxu1 %v1420_v29 }
  0xe1   :  { %3898 = vmatmul.mubr.msk.f32.vlgmr.msra.gmra.mxu0 %vm43_vm1, %v7681_v4  ;;  %v1440_v40 = vsub.f32 %v5446_v26, %v7765_v16  ;;  %4169 = vmatprep.subr.mxu0 %v5187_v57  ;;  %v5552_v16 = vand.u32 4294901760, %v125_v42  ;;  %v5564_v9 = vsub.f32 %v142_v53, %v5520_v47  ;;  %v5566_v38 = vand.u32 4294901760, %v140_v19  ;;  %v123_v26 = vld [vmem:[#allocation2 + $0x100] sm:$0xff] }
  0xe2   :  { %v1240_v50 = vsub.f32 %v5452_v7, %v7766_v28  ;;  %3899 = vmatprep.mubr.msk.f32.mxu0 %vm52_vm2, %v7681_v4  ;;  %4170 = vmatpush3.msra.mxu0 %v5192_v60  ;;  %v1328_v18 = vsub.f32 %v5470_v35, %v7768_v48  ;;  %v7770_v23 = vand.u32 4294901760, %v5485_v63  ;;  %v5574_v57 = vsub.f32 %v126_v62, %v5529_v41 }
  0xe3   :  { %7767 = vst [vmem:[#allocation42_spill] sm:$0xff] %v5552_v16  ;;  %7769 = vst [vmem:[#allocation43_spill] sm:$0xff] %v5564_v9  ;;  %4171 = vmatprep.subr.mxu0 %v5199_v20  ;;  %v5576_v48 = vand.u32 4294901760, %v124_v36  ;;  %4218 = vmatpush3.msra.mxu1 %v1308_v46  ;;  %v7771_v53 = vand.u32 4294901760, %v5494_v56  ;;  %v5584_v35 = vsub.f32 %v141_v51, %v5542_v59  ;;  %v1441_v51 = vand.u32 4294901760, %v1440_v40 }
  0xe4   :  { %v1447_v7 = vsub.f32 %v5485_v63, %v7770_v23  ;;  %4172 = vmatpush3.msra.mxu0 %v5201_v32  ;;  %v5586_v23 = vand.u32 4294901760, %v139_v22  ;;  %4219 = vmatprep.subr.mxu1 %v1427_v43  ;;  %v1241_v46 = vand.u32 4294901760, %v1240_v50  ;;  %v5594_v60 = vsub.f32 %v125_v42, %v5552_v16 }
  0xe5   :  { %v1335_v29 = vsub.f32 %v5494_v56, %v7771_v53  ;;  %3900 = vmatmul.mubr.msk.f32.gmra.mxu0 %vm51_vm3, %v7681_v4  ;;  %v5596_v53 = vand.u32 4294901760, %v123_v26  ;;  %4173 = vmatprep.subr.mxu0 %v5218_v37  ;;  %v7772_v28 = vand.u32 4294901760, %v5518_v33  ;;  %v5604_v63 = vsub.f32 %v140_v19, %v5566_v38 }
  0xe6   :  { %4220 = vmatpush3.msra.mxu1 %v1315_v1  ;;  %4174 = vmatpush3.msra.mxu0 %v5223_v10  ;;  %v1329_v42 = vand.u32 4294901760, %v1328_v18  ;;  %v7773_v50 = vand.u32 4294901760, %v5527_v27  ;;  %v5612_v40 = vsub.f32 %v124_v36, %v5576_v48  ;;  %v7774_v19 = vand.u32 4294901760, %v5540_v58 }
  0xe7   :  { %v1454_v43 = vsub.f32 %v5518_v33, %v7772_v28  ;;  %1242 = vmatprep.mubr.f32.mxu0 %v1241_v46  ;;  %4221 = vmatprep.subr.mxu1 %v1434_v44  ;;  %v1448_v28 = vand.u32 4294901760, %v1447_v7  ;;  %v5620_v18 = vsub.f32 %v139_v22, %v5586_v23  ;;  %v7775_v36 = vand.u32 4294901760, %v5550_v0 }
  0xe8   :  { %v1342_v62 = vsub.f32 %v5527_v27, %v7773_v50  ;;  %4175 = vmatprep.subr.mxu0 %v5238_v17  ;;  %v1461_v56 = vsub.f32 %v5540_v58, %v7774_v19  ;;  %4222 = vmatpush3.msra.mxu1 %v1322_v8  ;;  %v1336_v50 = vand.u32 4294901760, %v1335_v29  ;;  %v5628_v7 = vsub.f32 %v123_v26, %v5596_v53 }
  0xe9   :  { %4176 = vmatpush3.msra.mxu0 %v5247_v55  ;;  %v1349_v44 = vsub.f32 %v5550_v0, %v7775_v36  ;;  %4223 = vmatprep.subr.mxu1 %v1441_v51  ;;  %v1455_v19 = vand.u32 4294901760, %v1454_v43  ;;  %v7776_v22 = vand.u32 4294901760, %v5564_v9  ;;  %v7777_v36 = vand.u32 4294901760, %v5574_v57 }
  0xea   :  { %4177 = vmatprep.subr.mxu0 %v5255_v45  ;;  %4224 = vmatpush3.msra.mxu1 %v1329_v42  ;;  %v1343_v29 = vand.u32 4294901760, %v1342_v62  ;;  %v1462_v51 = vand.u32 4294901760, %v1461_v56  ;;  %v7778_v43 = vand.u32 4294901760, %v5584_v35  ;;  %v5646_v42 = vadd.s32 256, %v5033_v54 }
  0xeb   :  { %v1468_v8 = vsub.f32 %v5564_v9, %v7776_v22  ;;  %4178 = vmatpush3.msra.mxu0 %v5262_v24  ;;  %v1356_v1 = vsub.f32 %v5574_v57, %v7777_v36  ;;  %4225 = vmatprep.subr.mxu1 %v1448_v28  ;;  %v1350_v62 = vand.u32 4294901760, %v1349_v44  ;;  %v7780_v36 = vand.u32 4294901760, %v5594_v60 }
  0xec   :  { %4179 = vmatprep.subr.mxu0 %v5275_v12  ;;  %v1475_v22 = vsub.f32 %v5584_v35, %v7778_v43  ;;  %7779 = vst [vmem:[#allocation44_spill] sm:$0xff] %v5646_v42  ;;  %4226 = vmatpush3.msra.mxu1 %v1336_v50  ;;  %v7476_v26 = vand.u32 4294901760, %v5628_v7  ;;  %v7781_v43 = vand.u32 4294901760, %v5604_v63  ;;  %v7782_v44 = vand.u32 4294901760, %v5612_v40 }
  0xed   :  { %4180 = vmatpush3.msra.mxu0 %v5289_v25  ;;  %v1363_v28 = vsub.f32 %v5594_v60, %v7780_v36  ;;  %4227 = vmatprep.subr.mxu1 %v1455_v19  ;;  %v1469_v56 = vand.u32 4294901760, %v1468_v8  ;;  %v1357_v50 = vand.u32 4294901760, %v1356_v1  ;;  %v7783_v19 = vand.u32 4294901760, %v5620_v18 }
  0xee   :  { %4181 = vmatprep.subr.mxu0 %v5301_v6  ;;  %v1482_v46 = vsub.f32 %v5604_v63, %v7781_v43  ;;  %4228 = vmatpush3.msra.mxu1 %v1343_v29  ;;  %v1370_v54 = vsub.f32 %v5612_v40, %v7782_v44  ;;  %v1476_v36 = vand.u32 4294901760, %v1475_v22  ;;  %vm45_vm5 = vcmp.eq.s32.totalorder %v5038_v52, %v5646_v42  ;;  %v7784_v44 = vld [vmem:[#allocation9_spill] sm:$0xff] }
  0xef   :  { %4182 = vmatpush3.msra.mxu0 %v5319_v2  ;;  %4229 = vmatprep.subr.mxu1 %v1462_v51  ;;  %v1489_v8 = vsub.f32 %v5620_v18, %v7783_v19  ;;  %v1364_v29 = vand.u32 4294901760, %v1363_v28  ;;  %v1377_v1 = vsub.f32 %v5628_v7, %v7476_v26  ;;  %vm54_vm6 = vcmp.eq.s32.totalorder %v7740_v61, %v5296_v3  ;;  %v7789_v26 = vld [vmem:[#allocation12_spill] sm:$0xff] }
  0xf0   :  { %4183 = vmatprep.subr.mxu0 %v5329_v21  ;;  %4230 = vmatpush3.msra.mxu1 %v1350_v62  ;;  %v1483_v51 = vand.u32 4294901760, %v1482_v46  ;;  %v1371_v22 = vand.u32 4294901760, %v1370_v54  ;;  %v3879_v62 = vsel %vm45_vm5, 1.0, %v7736_v11  ;;  %vm53_vm7 = vcmp.eq.s32.totalorder %v7740_v61, %v5646_v42  ;;  %v7798_v61 = vld [vmem:[#allocation27_spill] sm:$0xff]  ;;  %v7800_v42 = vld [vmem:[#allocation8_spill] sm:$0xff] }
  0xf1   :  { %4184 = vmatpush3.msra.mxu0 %v5356_v31  ;;  %4231 = vmatprep.subr.mxu1 %v1469_v56  ;;  %v1490_v28 = vand.u32 4294901760, %v1489_v8  ;;  %v1378_v46 = vand.u32 4294901760, %v1377_v1  ;;  %v3888_v56 = vsel %vm54_vm6, 1.0, %v7736_v11  ;;  %v5688_v54 = vsub.f32 %v3879_v62, %v3879_v62  ;;  %v7785_v8 = vld [vmem:[#allocation10_spill] sm:$0xff] }
  0xf2   :  { %4185 = vmatprep.subr.mxu0 %v5391_v14  ;;  %4232 = vmatpush3.msra.mxu1 %v1357_v50  ;;  %v5692_v43 = vsub.f32 %v3888_v56, %v3888_v56  ;;  %v3887_v50 = vsel %vm53_vm7, 1.0, %v7736_v11  ;;  %v7786_v62 = vld [vmem:[#allocation34_spill] sm:$0xff] }
  0xf3   :  { %4186 = vmatpush3.msra.mxu0 %v5420_v5  ;;  %4233 = vmatprep.subr.mxu1 %v1476_v36  ;;  %v7478_v36 = vand.u32 4294901760, %v5688_v54  ;;  %v5710_v19 = vsub.f32 %v3887_v50, %v3887_v50 }
  0xf4   :  { %4187 = vmatprep.subr.mxu0 %v5435_v49  ;;  %4234 = vmatpush3.msra.mxu1 %v1364_v29  ;;  %v7477_v29 = vand.u32 4294901760, %v5692_v43 }
  0xf5   :  { %4188 = vmatpush3.msra.mxu0 %v5448_v30  ;;  %4235 = vmatprep.subr.mxu1 %v1483_v51  ;;  %v1246_v1 = vsub.f32 %v5688_v54, %v7478_v36  ;;  %v7479_v51 = vand.u32 4294901760, %v5710_v19  ;;  %v7791_v36 = vld [vmem:[#allocation14_spill] sm:$0xff] }
  0xf6   :  { %4189 = vmatprep.subr.mxu0 %v5472_v34  ;;  %4236 = vmatpush3.msra.mxu1 %v1371_v22  ;;  %v1255_v22 = vsub.f32 %v5692_v43, %v7477_v29 }
  0xf7   :  { %4190 = vmatpush3.msra.mxu0 %v5487_v39  ;;  %4237 = vmatprep.subr.mxu1 %v1490_v28  ;;  %v7787_v28 = vand.u32 4294901760, %v7786_v62  ;;  %v1261_v56 = vsub.f32 %v5710_v19, %v7479_v51  ;;  %v7796_v51 = vld [vmem:[#allocation25_spill] sm:$0xff] }
  0xf8   :  { %4191 = vmatprep.subr.mxu0 %v5496_v13  ;;  %4238 = vmatpush3.msra.mxu1 %v1378_v46  ;;  %v1247_v46 = vand.u32 4294901760, %v1246_v1  ;;  %v1256_v50 = vand.u32 4294901760, %v1255_v22  ;;  %v7790_v1 = vld [vmem:[#allocation13_spill] sm:$0xff]  ;;  %v7792_v22 = vld [vmem:[#allocation15_spill] sm:$0xff] }
  0xf9   :  { %4192 = vmatpush3.msra.mxu0 %v5511_v15  ;;  %3906 = vmatmul.mubr.msk.f32.vlgmr.msra.gmra.mxu1 %vm45_vm5, %v7681_v4  ;;  %v1262_v29 = vand.u32 4294901760, %v1261_v56  ;;  %v7795_v56 = vld [vmem:[#allocation21_spill] sm:$0xff] }
  0xfa   :  { %4283 = vmatprep.subr.mxu1 %v7784_v44  ;;  %4193 = vmatprep.subr.mxu0 %v5520_v47 }
  0xfb   :  { %3907 = vmatprep.mubr.msk.f32.mxu1 %vm54_vm6, %v7681_v4  ;;  %4284 = vmatpush3.msra.mxu1 %v7785_v8 }
  0xfc   :  { %4194 = vmatpush3.msra.mxu0 %v5529_v41  ;;  %4285 = vmatprep.subr.mxu1 %v5199_v20 }
  0xfd   :  { %4195 = vmatprep.subr.mxu0 %v5542_v59  ;;  %4286 = vmatpush3.msra.mxu1 %v5201_v32 }
  0xfe   :  { %4196 = vmatpush3.msra.mxu0 %v5552_v16  ;;  %3908 = vmatmul.mubr.msk.f32.gmra.mxu1 %vm53_vm7, %v7681_v4 }
  0xff   :  { %4287 = vmatprep.subr.mxu1 %v5218_v37  ;;  %4197 = vmatprep.subr.mxu0 %v5566_v38 }
 0x100   :  { %4288 = vmatpush3.msra.mxu1 %v5223_v10  ;;  %1753 = vmatprep.mubr.f32.mxu1 %v7787_v28  ;;  %v7788_v28 = vld [vmem:[#allocation11_spill] sm:$0xff] }
 0x101   :  { %4198 = vmatpush3.msra.mxu0 %v5576_v48  ;;  %4289 = vmatprep.subr.mxu1 %v5238_v17 }
 0x102   :  { %4199 = vmatprep.subr.mxu0 %v5586_v23  ;;  %4290 = vmatpush3.msra.mxu1 %v5247_v55 }
 0x103   :  { %4200 = vmatpush3.msra.mxu0 %v5596_v53  ;;  %4291 = vmatprep.subr.mxu1 %v5255_v45 }
 0x104   :  { %1248 = vmatmul.mubr.f32.vlgmr.msra.gmra.mxu0 %v1247_v46  ;;  %4245 = vmatprep.subr.mxu0 %v7788_v28  ;;  %v7793_v46 = vld [vmem:[#allocation16_spill] sm:$0xff] }
 0x105   :  { %4292 = vmatpush3.msra.mxu1 %v5262_v24  ;;  %1257 = vmatprep.mubr.f32.mxu0 %v1256_v50  ;;  %v7794_v50 = vld [vmem:[#allocation17_spill] sm:$0xff] }
 0x106   :  { %4246 = vmatpush3.msra.mxu0 %v7789_v26  ;;  %4293 = vmatprep.subr.mxu1 %v5275_v12 }
 0x107   :  { %4247 = vmatprep.subr.mxu0 %v7790_v1  ;;  %4294 = vmatpush3.msra.mxu1 %v5289_v25 }
 0x108   :  { %4248 = vmatpush3.msra.mxu0 %v7791_v36  ;;  %4295 = vmatprep.subr.mxu1 %v5301_v6 }
 0x109   :  { %1263 = vmatmul.mubr.f32.gmra.mxu0 %v1262_v29  ;;  %4249 = vmatprep.subr.mxu0 %v7792_v22  ;;  %v7797_v29 = vld [vmem:[#allocation26_spill] sm:$0xff] }
 0x10a   :  { %4296 = vmatpush3.msra.mxu1 %v5319_v2  ;;  %4250 = vmatpush3.msra.mxu0 %v7793_v46 }
 0x10b   :  { %1637 = vmatprep.mubr.f32.mxu0 %v7786_v62  ;;  %4297 = vmatprep.subr.mxu1 %v5329_v21  ;;  %v7799_v62 = vld [vmem:[#allocation29_spill] sm:$0xff] }
 0x10c   :  { %4251 = vmatprep.subr.mxu0 %v7794_v50  ;;  %4298 = vmatpush3.msra.mxu1 %v5356_v31 }
 0x10d   :  { %4252 = vmatpush3.msra.mxu0 %v7795_v56  ;;  %4299 = vmatprep.subr.mxu1 %v5391_v14  ;;  %v7801_v14 = vld [vmem:[#allocation19_spill] sm:$0xff] }
 0x10e   :  { %4253 = vmatprep.subr.mxu0 %v7796_v51  ;;  %4300 = vmatpush3.msra.mxu1 %v5420_v5  ;;  %v7802_v5 = vld [vmem:[#allocation20_spill] sm:$0xff] }
 0x10f   :  { %4254 = vmatpush3.msra.mxu0 %v7797_v29  ;;  %4301 = vmatprep.subr.mxu1 %v5435_v49  ;;  %v7803_v49 = vld [vmem:[#allocation23_spill] sm:$0xff] }
 0x110   :  { %4255 = vmatprep.subr.mxu0 %v7798_v61  ;;  %4302 = vmatpush3.msra.mxu1 %v5448_v30  ;;  %v7804_v30 = vld [vmem:[#allocation18_spill] sm:$0xff] }
 0x111   :  { %4256 = vmatpush3.msra.mxu0 %v7799_v62  ;;  %4303 = vmatprep.subr.mxu1 %v5472_v34  ;;  %v7805_v34 = vld [vmem:[#allocation35_spill] sm:$0xff] }
 0x112   :  { %4257 = vmatprep.subr.mxu0 %v7800_v42  ;;  %4304 = vmatpush3.msra.mxu1 %v5487_v39  ;;  %v7806_v39 = vld [vmem:[#allocation37_spill] sm:$0xff] }
 0x113   :  { %4258 = vmatpush3.msra.mxu0 %v7801_v14  ;;  %4305 = vmatprep.subr.mxu1 %v5496_v13  ;;  %v7807_v13 = vld [vmem:[#allocation39_spill] sm:$0xff] }
 0x114   :  { %4259 = vmatprep.subr.mxu0 %v7802_v5  ;;  %4306 = vmatpush3.msra.mxu1 %v5511_v15 }
 0x115   :  { %4260 = vmatpush3.msra.mxu0 %v7803_v49  ;;  %4307 = vmatprep.subr.mxu1 %v5520_v47 }
 0x116   :  { %4261 = vmatprep.subr.mxu0 %v7804_v30  ;;  %4308 = vmatpush3.msra.mxu1 %v5529_v41 }
 0x117   :  { %4262 = vmatpush3.msra.mxu0 %v7805_v34  ;;  %4309 = vmatprep.subr.mxu1 %v5542_v59 }
 0x118   :  { %4263 = vmatprep.subr.mxu0 %v7806_v39  ;;  %4310 = vmatpush3.msra.mxu1 %v5552_v16  ;;  %v7808_v16 = vand.u32 4294901760, %v5688_v54 }
 0x119   :  { %4264 = vmatpush3.msra.mxu0 %v7807_v13  ;;  %4311 = vmatprep.subr.mxu1 %v5566_v38 }
 0x11a   :  { %4265 = vmatprep.subr.mxu0 %v5518_v33  ;;  %4312 = vmatpush3.msra.mxu1 %v5576_v48  ;;  %v7809_v33 = vand.u32 4294901760, %v5692_v43 }
 0x11b   :  { %4266 = vmatpush3.msra.mxu0 %v5527_v27  ;;  %4313 = vmatprep.subr.mxu1 %v5586_v23 }
 0x11c   :  { %4267 = vmatprep.subr.mxu0 %v5540_v58  ;;  %4314 = vmatpush3.msra.mxu1 %v5596_v53 }
 0x11d   :  { %4268 = vmatpush3.msra.mxu0 %v5550_v0  ;;  %1757 = vmatmul.mubr.f32.vlgmr.msra.gmra.mxu1 %v7808_v16  ;;  %v7810_v16 = vand.u32 4294901760, %v5710_v19 }
 0x11e   :  { %4359 = vmatprep.subr.mxu1 %v7784_v44  ;;  %4269 = vmatprep.subr.mxu0 %v5564_v9  ;;  %v7811_v44 = vld [vmem:[#allocation30_spill] sm:$0xff] }
 0x11f   :  { %1764 = vmatprep.mubr.f32.mxu1 %v7809_v33  ;;  %4360 = vmatpush3.msra.mxu1 %v7785_v8  ;;  %v5808_v9 = vadd.s32 640, %v7811_v44  ;;  %v185_v33 = vld [vmem:[#allocation2 + $0x2f0] sm:$0xff]  ;;  %v168_v8 = vld [vmem:[#allocation2 + $0x268] sm:$0xff] }
 0x120   :  { %4270 = vmatpush3.msra.mxu0 %v5574_v57  ;;  %4361 = vmatprep.subr.mxu1 %v5199_v20  ;;  %v186_v20 = vld [vmem:[#allocation2 + $0x2f8] sm:$0xff] }
 0x121   :  { %4271 = vmatprep.subr.mxu0 %v5584_v35  ;;  %4362 = vmatpush3.msra.mxu1 %v5201_v32  ;;  %vm48_vm8 = vcmp.eq.s32.totalorder %v5038_v52, %v5808_v9  ;;  %v7812_v32 = vand.u32 4294901760, %v7788_v28  ;;  %v7823_v28 = vand.u32 4294901760, %v7795_v56  ;;  %v7829_v56 = vand.u32 4294901760, %v7797_v29 }
 0x122   :  { %4272 = vmatpush3.msra.mxu0 %v5594_v60  ;;  %1768 = vmatmul.mubr.f32.gmra.mxu1 %v7810_v16  ;;  %v7825_v16 = vld [vmem:[#allocation22_spill] sm:$0xff]  ;;  %v7834_v29 = vand.u32 4294901760, %v7799_v62 }
 0x123   :  { %4363 = vmatprep.subr.mxu1 %v5218_v37  ;;  %4273 = vmatprep.subr.mxu0 %v5604_v63  ;;  %v7813_v37 = vand.u32 4294901760, %v7789_v26 }
 0x124   :  { %4364 = vmatpush3.msra.mxu1 %v5223_v10  ;;  %3913 = vmatprep.mubr.msk.f32.mxu1 %vm46_vm4, %v7681_v4  ;;  %v3882_v10 = vsel %vm48_vm8, 1.0, %v7736_v11 }
 0x125   :  { %4274 = vmatpush3.msra.mxu0 %v5612_v40  ;;  %4365 = vmatprep.subr.mxu1 %v5238_v17  ;;  %v7814_v17 = vand.u32 4294901760, %v7790_v1  ;;  %v5845_v26 = vsub.f32 %v3882_v10, %v3882_v10  ;;  %v5884_v10 = vand.u32 4294901760, %v168_v8 }
 0x126   :  { %4275 = vmatprep.subr.mxu0 %v5620_v18  ;;  %4366 = vmatpush3.msra.mxu1 %v5247_v55  ;;  %v5838_v55 = vand.u32 4294901760, %v186_v20 }
 0x127   :  { %4276 = vmatpush3.msra.mxu0 %v5628_v7  ;;  %4367 = vmatprep.subr.mxu1 %v5255_v45  ;;  %v170_v45 = vld [vmem:[#allocation2 + $0x278] sm:$0xff]  ;;  %7817 = vst [vmem:[#allocation10_spill] sm:$0xff] %v5845_v26 }
 0x128   :  { %1640 = vmatmul.mubr.f32.vlgmr.msra.gmra.mxu0 %v5688_v54  ;;  %4321 = vmatprep.subr.mxu0 %v7812_v32  ;;  %7815 = vst [vmem:[#allocation9_spill] sm:$0xff] %v5838_v55  ;;  %v5850_v54 = vand.u32 4294901760, %v170_v45  ;;  %v167_v32 = vld [vmem:[#allocation2 + $0x260] sm:$0xff] }
 0x129   :  { %4368 = vmatpush3.msra.mxu1 %v5262_v24  ;;  %1646 = vmatprep.mubr.f32.mxu0 %v5692_v43  ;;  %v7816_v24 = vand.u32 4294901760, %v7791_v36  ;;  %v169_v43 = vld [vmem:[#allocation2 + $0x270] sm:$0xff]  ;;  %v184_v36 = vld [vmem:[#allocation2 + $0x2e8] sm:$0xff] }
 0x12a   :  { %4322 = vmatpush3.msra.mxu0 %v7813_v37  ;;  %4369 = vmatprep.subr.mxu1 %v5275_v12  ;;  %v7818_v12 = vand.u32 4294901760, %v7792_v22  ;;  %7819 = vst [vmem:[#allocation34_spill] sm:$0xff] %v5850_v54  ;;  %v5869_v1 = vand.u32 4294901760, %v169_v43  ;;  %v183_v22 = vld [vmem:[#allocation2 + $0x2e0] sm:$0xff] }
 0x12b   :  { %4323 = vmatprep.subr.mxu0 %v7814_v17  ;;  %4370 = vmatpush3.msra.mxu1 %v5289_v25  ;;  %v7820_v25 = vand.u32 4294901760, %v7793_v46  ;;  %v7493_v46 = vand.u32 4294901760, %v5845_v26  ;;  %v182_v17 = vld [vmem:[#allocation2 + $0x2d8] sm:$0xff] }
 0x12c   :  { %4324 = vmatpush3.msra.mxu0 %v7816_v24  ;;  %4371 = vmatprep.subr.mxu1 %v5301_v6  ;;  %v5859_v6 = vsub.f32 %v186_v20, %v5838_v55  ;;  %7824 = vst [vmem:[#allocation12_spill] sm:$0xff] %v5869_v1  ;;  %v5878_v20 = vand.u32 4294901760, %v184_v36  ;;  %v7830_v24 = vld [vmem:[#allocation28_spill] sm:$0xff] }
 0x12d   :  { %1649 = vmatmul.mubr.f32.gmra.mxu0 %v5710_v19  ;;  %4325 = vmatprep.subr.mxu0 %v7818_v12  ;;  %v7822_v19 = vand.u32 4294901760, %v7794_v50  ;;  %v5876_v50 = vsub.f32 %v170_v45, %v5850_v54  ;;  %v5892_v12 = vand.u32 4294901760, %v183_v22 }
 0x12e   :  { %4372 = vmatpush3.msra.mxu1 %v5319_v2  ;;  %4326 = vmatpush3.msra.mxu0 %v7820_v25  ;;  %7821 = vst [vmem:[#allocation11_spill] sm:$0xff] %v5859_v6  ;;  %v5864_v2 = vand.u32 4294901760, %v185_v33  ;;  %v7494_v37 = vand.u32 4294901760, %v5859_v6  ;;  %v166_v25 = vld [vmem:[#allocation2 + $0x258] sm:$0xff]  ;;  %v5912_v62 = vsub.f32 %v184_v36, %v5878_v20  ;;  %v180_v36 = vld [vmem:[#allocation2 + $0x2c8] sm:$0xff] }
 0x12f   :  { %3909 = vmatprep.mubr.msk.f32.mxu0 %vm46_vm4, %v7681_v4  ;;  %4373 = vmatprep.subr.mxu1 %v5329_v21  ;;  %v7826_v21 = vand.u32 4294901760, %v7796_v51  ;;  %7827 = vst [vmem:[#allocation13_spill] sm:$0xff] %v5876_v50  ;;  %v7831_v51 = vand.u32 4294901760, %v7798_v61  ;;  %v5905_v61 = vsub.f32 %v5845_v26, %v7493_v46  ;;  %v7843_v46 = vand.u32 4294901760, %v7802_v5 }
 0x130   :  { %4327 = vmatprep.subr.mxu0 %v7822_v19  ;;  %4374 = vmatpush3.msra.mxu1 %v5356_v31  ;;  %v7828_v31 = vld [vmem:[#allocation24_spill] sm:$0xff]  ;;  %v5890_v45 = vsub.f32 %v185_v33, %v5864_v2  ;;  %v7833_v19 = vld [vmem:[#allocation33_spill] sm:$0xff]  ;;  %7838 = vst [vmem:[#allocation16_spill] sm:$0xff] %v5912_v62 }
 0x131   :  { %4328 = vmatpush3.msra.mxu0 %v7823_v28  ;;  %4375 = vmatprep.subr.mxu1 %v7825_v16  ;;  %v5898_v28 = vsub.f32 %v169_v43, %v5869_v1  ;;  %v5900_v16 = vand.u32 4294901760, %v167_v32  ;;  %v7836_v33 = vld [vmem:[#allocation36_spill] sm:$0xff]  ;;  %v5914_v43 = vand.u32 4294901760, %v182_v17 }
 0x132   :  { %4329 = vmatprep.subr.mxu0 %v7826_v21  ;;  %4376 = vmatpush3.msra.mxu1 %v7828_v31  ;;  %7832 = vst [vmem:[#allocation14_spill] sm:$0xff] %v5890_v45  ;;  %v181_v21 = vld [vmem:[#allocation2 + $0x2d0] sm:$0xff]  ;;  %v7837_v31 = vand.u32 4294901760, %v7800_v42  ;;  %v5925_v42 = vsub.f32 %v168_v8, %v5884_v10  ;;  %v7845_v8 = vand.u32 4294901760, %v7803_v49 }
 0x133   :  { %4330 = vmatpush3.msra.mxu0 %v7829_v56  ;;  %4377 = vmatprep.subr.mxu1 %v7830_v24  ;;  %7835 = vst [vmem:[#allocation15_spill] sm:$0xff] %v5898_v28  ;;  %v165_v24 = vld [vmem:[#allocation2 + $0x250] sm:$0xff]  ;;  %v5960_v56 = vand.u32 4294901760, %v180_v36 }
 0x134   :  { %4331 = vmatprep.subr.mxu0 %v7831_v51  ;;  %4378 = vmatpush3.msra.mxu1 %v7833_v19  ;;  %v7839_v51 = vld [vmem:[#allocation38_spill] sm:$0xff]  ;;  %v7840_v19 = vand.u32 4294901760, %v7801_v14  ;;  %7841 = vst [vmem:[#allocation17_spill] sm:$0xff] %v5925_v42  ;;  %v5934_v14 = vsub.f32 %v183_v22, %v5892_v12  ;;  %v5945_v5 = vand.u32 4294901760, %v165_v24  ;;  %v7847_v22 = vand.u32 4294901760, %v7804_v30 }
 0x135   :  { %4332 = vmatpush3.msra.mxu0 %v7834_v29  ;;  %4379 = vmatprep.subr.mxu1 %v7836_v33  ;;  %v5922_v29 = vsub.f32 %v5859_v6, %v7494_v37  ;;  %v5927_v33 = vand.u32 4294901760, %v166_v25  ;;  %v164_v37 = vld [vmem:[#allocation2 + $0x248] sm:$0xff]  ;;  %7850 = vst [vmem:[#allocation27_spill] sm:$0xff] %v5960_v56  ;;  %v163_v6 = vld [vmem:[#allocation2 + $0x240] sm:$0xff] }
 0x136   :  { %4333 = vmatprep.subr.mxu0 %v7837_v31  ;;  %4380 = vmatpush3.msra.mxu1 %v7839_v51  ;;  %v7842_v31 = vld [vmem:[#allocation40_spill] sm:$0xff]  ;;  %7844 = vst [vmem:[#allocation21_spill] sm:$0xff] %v5934_v14  ;;  %v179_v51 = vld [vmem:[#allocation2 + $0x2c0] sm:$0xff] }
 0x137   :  { %4334 = vmatpush3.msra.mxu0 %v7840_v19  ;;  %4381 = vmatprep.subr.mxu1 %v7842_v31  ;;  %v5936_v19 = vand.u32 4294901760, %v181_v21  ;;  %v5943_v31 = vsub.f32 %v167_v32, %v5900_v16  ;;  %v5958_v32 = vsub.f32 %v182_v17, %v5914_v43  ;;  %v2303_v30 = vand.u32 4294901760, %v5922_v29 }
 0x138   :  { %4335 = vmatprep.subr.mxu0 %v7843_v46  ;;  %4382 = vmatpush3.msra.mxu1 %v5511_v15  ;;  %v7848_v15 = vand.u32 4294901760, %v5876_v50  ;;  %v5970_v46 = vand.u32 4294901760, %v164_v37  ;;  %v7853_v17 = vand.u32 4294901760, %v7806_v39  ;;  %v7859_v39 = vand.u32 4294901760, %v5898_v28 }
 0x139   :  { %4336 = vmatpush3.msra.mxu0 %v7845_v8  ;;  %7846 = vst [vmem:[#allocation25_spill] sm:$0xff] %v5943_v31  ;;  %4383 = vmatprep.subr.mxu1 %v5520_v47  ;;  %7849 = vst [vmem:[#allocation26_spill] sm:$0xff] %v5958_v32  ;;  %v7851_v47 = vand.u32 4294901760, %v7805_v34  ;;  %v7854_v8 = vand.u32 4294901760, %v5890_v45  ;;  %v5980_v29 = vsub.f32 %v181_v21, %v5936_v19  ;;  %v5994_v34 = vand.u32 4294901760, %v163_v6  ;;  %v7862_v21 = vld [vmem:[#allocation41_spill] sm:$0xff] }
 0x13a   :  { %4337 = vmatprep.subr.mxu0 %v7847_v22  ;;  %v5954_v49 = vsub.f32 %v5876_v50, %v7848_v15  ;;  %4384 = vmatpush3.msra.mxu1 %v5529_v41  ;;  %v5968_v15 = vsub.f32 %v166_v25, %v5927_v33  ;;  %v178_v25 = vld [vmem:[#allocation2 + $0x2b8] sm:$0xff]  ;;  %v7857_v22 = vld [vmem:[#allocation42_spill] sm:$0xff]  ;;  %v7858_v50 = vand.u32 4294901760, %v7807_v13  ;;  %v7864_v13 = vand.u32 4294901760, %v5912_v62 }
 0x13b   :  { %4338 = vmatpush3.msra.mxu0 %v7851_v47  ;;  %4385 = vmatprep.subr.mxu1 %v5542_v59  ;;  %v2309_v41 = vsub.f32 %v5890_v45, %v7854_v8  ;;  %7855 = vst [vmem:[#allocation8_spill] sm:$0xff] %v5980_v29  ;;  %v5982_v47 = vand.u32 4294901760, %v179_v51  ;;  %v2197_v59 = vsub.f32 %v5898_v28, %v7859_v39  ;;  %7861 = vst [vmem:[#allocation23_spill] sm:$0xff] %v5994_v34  ;;  %v162_v39 = vld [vmem:[#allocation2 + $0x238] sm:$0xff] }
 0x13c   :  { %7852 = vst [vmem:[#allocation29_spill] sm:$0xff] %v5968_v15  ;;  %4339 = vmatprep.subr.mxu0 %v7853_v17  ;;  %4386 = vmatpush3.msra.mxu1 %v7857_v22  ;;  %v5992_v8 = vsub.f32 %v165_v24, %v5945_v5  ;;  %v7863_v45 = vand.u32 4294901760, %v7862_v21  ;;  %v2191_v22 = vand.u32 4294901760, %v5954_v49  ;;  %v6005_v17 = vsub.f32 %v180_v36, %v5960_v56 }
 0x13d   :  { %7856 = vst [vmem:[#allocation19_spill] sm:$0xff] %v5982_v47  ;;  %4340 = vmatpush3.msra.mxu0 %v7858_v50  ;;  %4387 = vmatprep.subr.mxu1 %v5566_v38  ;;  %v2316_v50 = vsub.f32 %v5912_v62, %v7864_v13  ;;  %v7866_v24 = vand.u32 4294901760, %v5527_v27  ;;  %v7867_v38 = vand.u32 4294901760, %v5925_v42  ;;  %v6015_v21 = vsub.f32 %v164_v37, %v5970_v46 }
 0x13e   :  { %7860 = vst [vmem:[#allocation20_spill] sm:$0xff] %v5992_v8  ;;  %4341 = vmatprep.subr.mxu0 %v7863_v45  ;;  %7865 = vst [vmem:[#allocation18_spill] sm:$0xff] %v6005_v17  ;;  %4388 = vmatpush3.msra.mxu1 %v5576_v48  ;;  %v6017_v13 = vand.u32 4294901760, %v178_v25  ;;  %v7870_v36 = vand.u32 4294901760, %v5540_v58  ;;  %v2310_v48 = vand.u32 4294901760, %v2309_v41  ;;  %v7871_v27 = vand.u32 4294901760, %v5934_v14 }
 0x13f   :  { %4342 = vmatpush3.msra.mxu0 %v7866_v24  ;;  %v2204_v45 = vsub.f32 %v5925_v42, %v7867_v38  ;;  %7868 = vst [vmem:[#allocation35_spill] sm:$0xff] %v6015_v21  ;;  %4389 = vmatprep.subr.mxu1 %v5586_v23  ;;  %v6029_v49 = vsub.f32 %v179_v51, %v5982_v47  ;;  %v7873_v37 = vand.u32 4294901760, %v5550_v0  ;;  %v2198_v23 = vand.u32 4294901760, %v2197_v59  ;;  %v177_v38 = vld [vmem:[#allocation2 + $0x2b0] sm:$0xff] }
 0x140   :  { %7869 = vst [vmem:[#allocation37_spill] sm:$0xff] %v6017_v13  ;;  %4343 = vmatprep.subr.mxu0 %v7870_v36  ;;  %v6025_v24 = vsub.f32 %v5934_v14, %v7871_v27  ;;  %4390 = vmatpush3.msra.mxu1 %v5596_v53  ;;  %v7874_v58 = vand.u32 4294901760, %v5943_v31  ;;  %v6041_v27 = vsub.f32 %v163_v6, %v5994_v34  ;;  %v2317_v0 = vand.u32 4294901760, %v2316_v50  ;;  %v161_v36 = vld [vmem:[#allocation2 + $0x230] sm:$0xff]  ;;  %v7880_v14 = vld [vmem:[#allocation32_spill] sm:$0xff] }
 0x141   :  { %7872 = vst [vmem:[#allocation39_spill] sm:$0xff] %v6029_v49  ;;  %4344 = vmatpush3.msra.mxu0 %v7873_v37  ;;  %3914 = vmatmul.mubr.msk.f32.vlgmr.msra.gmra.mxu1 %vm45_vm5, %v7681_v4  ;;  %v7877_v53 = vand.u32 4294901760, %v5958_v32  ;;  %v7878_v6 = vld [vmem:[#allocation43_spill] sm:$0xff]  ;;  %v7881_v50 = vand.u32 4294901760, %v5968_v15  ;;  %v6068_v37 = vsub.f32 %v178_v25, %v6017_v13  ;;  %v7884_v62 = vand.u32 4294901760, %v5980_v29 }
 0x142   :  { %v6037_v41 = vsub.f32 %v5943_v31, %v7874_v58  ;;  %7875 = vst [vmem:[#allocation22_spill] sm:$0xff] %v6041_v27  ;;  %4435 = vmatprep.subr.mxu1 %v2303_v30  ;;  %v6053_v58 = vand.u32 4294901760, %v162_v39  ;;  %v7879_v31 = vand.u32 4294901760, %v7878_v6  ;;  %3915 = vmatprep.mubr.msk.f32.mxu1 %vm54_vm6, %v7681_v4  ;;  %v2205_v30 = vand.u32 4294901760, %v2204_v45 }
 0x143   :  { %v6050_v59 = vsub.f32 %v5958_v32, %v7877_v53  ;;  %v6064_v42 = vsub.f32 %v5968_v15, %v7881_v50  ;;  %7882 = vst [vmem:[#allocation24_spill] sm:$0xff] %v6068_v37  ;;  %v176_v32 = vld [vmem:[#allocation2 + $0x2a8] sm:$0xff]  ;;  %4436 = vmatpush3.msra.mxu1 %v2191_v22  ;;  %v2324_v6 = vand.u32 4294901760, %v6025_v24  ;;  %v6076_v45 = vsub.f32 %v5980_v29, %v7884_v62  ;;  %v175_v29 = vld [vmem:[#allocation2 + $0x2a0] sm:$0xff] }
 0x144   :  { %4345 = vmatprep.subr.mxu0 %v7879_v31  ;;  %v7883_v31 = vand.u32 4294901760, %v5574_v57  ;;  %v6079_v15 = vand.u32 4294901760, %v177_v38  ;;  %v160_v53 = vld [vmem:[#allocation2 + $0x228] sm:$0xff]  ;;  %4437 = vmatprep.subr.mxu1 %v2310_v48  ;;  %v7886_v25 = vand.u32 4294901760, %v5584_v35  ;;  %v2212_v22 = vand.u32 4294901760, %v6037_v41 }
 0x145   :  { %v7887_v57 = vand.u32 4294901760, %v5992_v8  ;;  %v6090_v62 = vand.u32 4294901760, %v161_v36  ;;  %4438 = vmatpush3.msra.mxu1 %v2198_v23  ;;  %v7889_v50 = vand.u32 4294901760, %v5594_v60  ;;  %v2331_v48 = vand.u32 4294901760, %v6050_v59 }
 0x146   :  { %4346 = vmatpush3.msra.mxu0 %v7883_v31  ;;  %7885 = vst [vmem:[#allocation28_spill] sm:$0xff] %v6079_v15  ;;  %v7890_v35 = vand.u32 4294901760, %v6005_v17  ;;  %v159_v31 = vld [vmem:[#allocation2 + $0x220] sm:$0xff]  ;;  %3916 = vmatmul.mubr.msk.f32.gmra.mxu1 %vm53_vm7, %v7681_v4  ;;  %v2219_v60 = vand.u32 4294901760, %v6064_v42  ;;  %v7892_v23 = vand.u32 4294901760, %v6015_v21  ;;  %v6127_v28 = vsub.f32 %v177_v38, %v6079_v15 }
 0x147   :  { %4347 = vmatprep.subr.mxu0 %v7886_v25  ;;  %v6087_v24 = vsub.f32 %v5992_v8, %v7887_v57  ;;  %7888 = vst [vmem:[#allocation33_spill] sm:$0xff] %v6090_v62  ;;  %v6101_v25 = vsub.f32 %v162_v39, %v6053_v58  ;;  %v6103_v57 = vand.u32 4294901760, %v176_v32  ;;  %4439 = vmatprep.subr.mxu1 %v2317_v0  ;;  %v6116_v39 = vand.u32 4294901760, %v160_v53 }
 0x148   :  { %4348 = vmatpush3.msra.mxu0 %v7889_v50  ;;  %v6098_v41 = vsub.f32 %v6005_v17, %v7890_v35  ;;  %v6113_v59 = vsub.f32 %v6015_v21, %v7892_v23  ;;  %v174_v35 = vld [vmem:[#allocation2 + $0x298] sm:$0xff]  ;;  %v7894_v17 = vand.u32 4294901760, %v5604_v63  ;;  %4440 = vmatpush3.msra.mxu1 %v2205_v30  ;;  %v2338_v8 = vand.u32 4294901760, %v6076_v45  ;;  %7896 = vst [vmem:[#allocation40_spill] sm:$0xff] %v6127_v28 }
 0x149   :  { %7891 = vst [vmem:[#allocation36_spill] sm:$0xff] %v6101_v25  ;;  %7893 = vst [vmem:[#allocation38_spill] sm:$0xff] %v6116_v39  ;;  %v7895_v0 = vand.u32 4294901760, %v6029_v49  ;;  %v6129_v23 = vand.u32 4294901760, %v175_v29  ;;  %v158_v50 = vld [vmem:[#allocation2 + $0x218] sm:$0xff]  ;;  %3917 = vmatprep.mubr.msk.f32.mxu1 %vm48_vm8, %v7681_v4  ;;  %v7897_v63 = vand.u32 4294901760, %v5612_v40  ;;  %v6144_v38 = vsub.f32 %v161_v36, %v6090_v62  ;;  %4441 = vmatprep.subr.mxu1 %v2324_v6 }
 0x14a   :  { %4349 = vmatprep.subr.mxu0 %v7894_v17  ;;  %v2226_v17 = vand.u32 4294901760, %v6087_v24  ;;  %v7898_v30 = vand.u32 4294901760, %v6041_v27  ;;  %v7901_v21 = vand.u32 4294901760, %v5620_v18  ;;  %v2345_v40 = vand.u32 4294901760, %v6098_v41  ;;  %4442 = vmatpush3.msra.mxu1 %v2212_v22  ;;  %v155_v22 = vld [vmem:[#allocation2 + $0x200] sm:$0xff] }
 0x14b   :  { %v6124_v42 = vsub.f32 %v6029_v49, %v7895_v0  ;;  %4350 = vmatpush3.msra.mxu0 %v7897_v63  ;;  %7899 = vst [vmem:[#allocation42_spill] sm:$0xff] %v6144_v38  ;;  %v6146_v0 = vand.u32 4294901760, %v159_v31  ;;  %v173_v49 = vld [vmem:[#allocation2 + $0x290] sm:$0xff]  ;;  %v6153_v24 = vsub.f32 %v176_v32, %v6103_v57  ;;  %v6155_v26 = vand.u32 4294901760, %v174_v35  ;;  %v172_v32 = vld [vmem:[#allocation2 + $0x288] sm:$0xff]  ;;  %4443 = vmatprep.subr.mxu1 %v2331_v48 }
 0x14c   :  { %v6141_v45 = vsub.f32 %v6041_v27, %v7898_v30  ;;  %4351 = vmatprep.subr.mxu0 %v7901_v21  ;;  %v157_v30 = vld [vmem:[#allocation2 + $0x210] sm:$0xff]  ;;  %v7903_v36 = vand.u32 4294901760, %v5628_v7  ;;  %v2233_v27 = vand.u32 4294901760, %v6113_v59  ;;  %v7904_v6 = vand.u32 4294901760, %v6068_v37  ;;  %4444 = vmatpush3.msra.mxu1 %v2219_v60 }
 0x14d   :  { %7900 = vst [vmem:[#allocation41_spill] sm:$0xff] %v6146_v0  ;;  %7902 = vst [vmem:[#allocation44_spill] sm:$0xff] %v6153_v24  ;;  %v6166_v21 = vsub.f32 %v160_v53, %v6116_v39  ;;  %v6168_v41 = vand.u32 4294901760, %v158_v50  ;;  %v2352_v7 = vand.u32 4294901760, %v6124_v42  ;;  %v6177_v59 = vsub.f32 %v175_v29, %v6129_v23  ;;  %v156_v53 = vld [vmem:[#allocation2 + $0x208] sm:$0xff]  ;;  %v171_v42 = vld [vmem:[#allocation2 + $0x280] sm:$0xff]  ;;  %4445 = vmatprep.subr.mxu1 %v2338_v8 }
 0x14e   :  { %4352 = vmatpush3.msra.mxu0 %v7903_v36  ;;  %v6163_v18 = vsub.f32 %v6068_v37, %v7904_v6  ;;  %v6179_v36 = vand.u32 4294901760, %v173_v49  ;;  %v2240_v48 = vand.u32 4294901760, %v6141_v45  ;;  %v6185_v63 = vsub.f32 %v159_v31, %v6146_v0  ;;  %4446 = vmatpush3.msra.mxu1 %v2226_v17 }
 0x14f   :  { %7905 = vst [vmem:[#allocation43_spill] sm:$0xff] %v6168_v41  ;;  %3910 = vmatmul.mubr.msk.f32.vlgmr.msra.gmra.mxu0 %vm45_vm5, %v7681_v4  ;;  %4397 = vmatprep.subr.mxu0 %v5838_v55  ;;  %v6187_v37 = vand.u32 4294901760, %v157_v30  ;;  %v7906_v29 = vand.u32 4294901760, %v6101_v25  ;;  %v6199_v6 = vsub.f32 %v174_v35, %v6155_v26  ;;  %v6201_v31 = vand.u32 4294901760, %v172_v32  ;;  %v4011_v55 = vpop.f32.mrf.mxu1 }
 0x150   :  { %3911 = vmatprep.mubr.msk.f32.mxu0 %vm54_vm6, %v7681_v4  ;;  %4398 = vmatpush3.msra.mxu0 %v5850_v54  ;;  %v2359_v3 = vand.u32 4294901760, %v6163_v18  ;;  %v6207_v54 = vsub.f32 %v158_v50, %v6168_v41  ;;  %v6209_v0 = vand.u32 4294901760, %v156_v53  ;;  %v7908_v35 = vand.u32 4294901760, %v6127_v28 }
 0x151   :  { %v2246_v60 = vsub.f32 %v6101_v25, %v7906_v29  ;;  %7907 = vst [vmem:[#allocation45_spill] sm:$0xff] %v6199_v6  ;;  %4399 = vmatprep.subr.mxu0 %v5864_v2  ;;  %v6217_v45 = vsub.f32 %v173_v49, %v6179_v36  ;;  %v6219_v18 = vand.u32 4294901760, %v171_v42  ;;  %4447 = vmatprep.subr.mxu1 %v2345_v40  ;;  %v7909_v50 = vand.u32 4294901760, %v6144_v38 }
 0x152   :  { %4400 = vmatpush3.msra.mxu0 %v5869_v1  ;;  %v2365_v29 = vsub.f32 %v6127_v28, %v7908_v35  ;;  %v6230_v8 = vsub.f32 %v157_v30, %v6187_v37  ;;  %v6232_v49 = vand.u32 4294901760, %v155_v22  ;;  %4448 = vmatpush3.msra.mxu1 %v2233_v27  ;;  %v7910_v28 = vand.u32 4294901760, %v6153_v24 }
 0x153   :  { %3912 = vmatmul.mubr.msk.f32.gmra.mxu0 %vm53_vm7, %v7681_v4  ;;  %v2253_v17 = vsub.f32 %v6144_v38, %v7909_v50  ;;  %4401 = vmatprep.subr.mxu0 %v5878_v20  ;;  %v2247_v40 = vand.u32 4294901760, %v2246_v60  ;;  %v6240_v1 = vsub.f32 %v172_v32, %v6201_v31  ;;  %v4012_v50 = vpop.f32.mrf.mxu1  ;;  %v7911_v30 = vand.u32 4294901760, %v5905_v61 }
 0x154   :  { %v2372_v51 = vsub.f32 %v6153_v24, %v7910_v28  ;;  %4402 = vmatpush3.msra.mxu0 %v5884_v10  ;;  %v7912_v35 = vand.u32 4294901760, %v6166_v21  ;;  %v7549_v60 = vand.u32 4294901760, %v6207_v54  ;;  %v6250_v38 = vsub.f32 %v156_v53, %v6209_v0  ;;  %4449 = vmatprep.subr.mxu1 %v2352_v7 }
 0x155   :  { %2160 = vmatprep.mubr.f32.mxu0 %v7911_v30  ;;  %v4013_v28 = vadd.f32 %v4012_v50, %v4011_v55  ;;  %4403 = vmatprep.subr.mxu0 %v5892_v12  ;;  %v2366_v32 = vand.u32 4294901760, %v2365_v29  ;;  %v7913_v25 = vand.u32 4294901760, %v6177_v59  ;;  %v6258_v30 = vsub.f32 %v171_v42, %v6219_v18 }
 0x156   :  { %v2260_v27 = vsub.f32 %v6166_v21, %v7912_v35  ;;  %v4014_v35 = vpop.f32.mrf.mxu1  ;;  %4450 = vmatpush3.msra.mxu1 %v2240_v48  ;;  %4404 = vmatpush3.msra.mxu0 %v5900_v16  ;;  %v2254_v53 = vand.u32 4294901760, %v2253_v17  ;;  %v7914_v55 = vand.u32 4294901760, %v6185_v63  ;;  %v6266_v50 = vsub.f32 %v155_v22, %v6232_v49 }
 0x157   :  { %v2379_v24 = vsub.f32 %v6177_v59, %v7913_v25  ;;  %4451 = vmatprep.subr.mxu1 %v2359_v3  ;;  %4405 = vmatprep.subr.mxu0 %v5914_v43  ;;  %v2373_v25 = vand.u32 4294901760, %v2372_v51  ;;  %v7915_v42 = vand.u32 4294901760, %v6199_v6  ;;  %v2274_v22 = vsub.f32 %v6207_v54, %v7549_v60 }
 0x158   :  { %v2267_v7 = vsub.f32 %v6185_v63, %v7914_v55  ;;  %v4015_v17 = vpop.f32.mrf.mxu1  ;;  %4452 = vmatpush3.msra.mxu1 %v2247_v40  ;;  %4406 = vmatpush3.msra.mxu0 %v5927_v33  ;;  %v2261_v55 = vand.u32 4294901760, %v2260_v27  ;;  %v7550_v3 = vand.u32 4294901760, %v6250_v38  ;;  %v7918_v60 = vand.u32 4294901760, %v6230_v8 }
 0x159   :  { %v2386_v48 = vsub.f32 %v6199_v6, %v7915_v42  ;;  %v4016_v29 = vadd.f32 %v4015_v17, %v4014_v35  ;;  %4453 = vmatprep.subr.mxu1 %v2366_v32  ;;  %4407 = vmatprep.subr.mxu0 %v5936_v19  ;;  %v2380_v51 = vand.u32 4294901760, %v2379_v24  ;;  %v7916_v42 = vand.u32 4294901760, %v6217_v45  ;;  %v3973_v24 = vpop.f32.mrf.mxu0 }
 0x15a   :  { %v6284_v6 = vadd.s32 512, %v7811_v44  ;;  %4454 = vmatpush3.msra.mxu1 %v2254_v53  ;;  %4408 = vmatpush3.msra.mxu0 %v5945_v5  ;;  %v2268_v27 = vand.u32 4294901760, %v2267_v7  ;;  %v2281_v32 = vsub.f32 %v6230_v8, %v7918_v60  ;;  %v2275_v53 = vand.u32 4294901760, %v2274_v22  ;;  %v7935_v44 = vld [vmem:[#allocation25_spill] sm:$0xff] }
 0x15b   :  { %v2393_v61 = vsub.f32 %v6217_v45, %v7916_v42  ;;  %4455 = vmatprep.subr.mxu1 %v2373_v25  ;;  %4409 = vmatprep.subr.mxu0 %v5960_v56  ;;  %v2387_v17 = vand.u32 4294901760, %v2386_v48  ;;  %v7919_v42 = vand.u32 4294901760, %v6240_v1  ;;  %v2288_v7 = vsub.f32 %v6250_v38, %v7550_v3  ;;  %v3974_v60 = vpop.f32.mrf.mxu0 }
 0x15c   :  { %7917 = vst [vmem:[#allocation46_spill] sm:$0xff] %v6284_v6  ;;  %4456 = vmatpush3.msra.mxu1 %v2261_v55  ;;  %4410 = vmatpush3.msra.mxu0 %v5970_v46  ;;  %v7920_v35 = vand.u32 4294901760, %v6258_v30  ;;  %vm47_vm9 = vcmp.eq.s32.totalorder %v5038_v52, %v6284_v6  ;;  %v3975_v55 = vadd.f32 %v3974_v60, %v3973_v24  ;;  %v2282_v22 = vand.u32 4294901760, %v2281_v32 }
 0x15d   :  { %v2400_v40 = vsub.f32 %v6240_v1, %v7919_v42  ;;  %4457 = vmatprep.subr.mxu1 %v2380_v51  ;;  %4411 = vmatprep.subr.mxu0 %v5982_v47  ;;  %v2394_v25 = vand.u32 4294901760, %v2393_v61  ;;  %v7921_v42 = vand.u32 4294901760, %v6266_v50  ;;  %vm56_vm10 = vcmp.eq.s32.totalorder %v7880_v14, %v5808_v9 }
 0x15e   :  { %v2407_v48 = vsub.f32 %v6258_v30, %v7920_v35  ;;  %4458 = vmatpush3.msra.mxu1 %v2268_v27  ;;  %4412 = vmatpush3.msra.mxu0 %v5994_v34  ;;  %v6312_v51 = vadd.f32 %v4013_v28, %v3975_v55  ;;  %v3976_v35 = vpop.f32.mrf.mxu0  ;;  %v2289_v27 = vand.u32 4294901760, %v2288_v7  ;;  %v3881_v32 = vsel %vm47_vm9, 1.0, %v7736_v11 }
 0x15f   :  { %v2295_v3 = vsub.f32 %v6266_v50, %v7921_v42  ;;  %4459 = vmatprep.subr.mxu1 %v2387_v17  ;;  %4413 = vmatprep.subr.mxu0 %v6017_v13  ;;  %v2401_v61 = vand.u32 4294901760, %v2400_v40  ;;  %v3890_v17 = vsel %vm56_vm10, 1.0, %v7736_v11  ;;  %vm55_vm11 = vcmp.eq.s32.totalorder %v7880_v14, %v6284_v6  ;;  %v7924_v42 = vld [vmem:[#allocation34_spill] sm:$0xff] }
 0x160   :  { %4460 = vmatpush3.msra.mxu1 %v2275_v53  ;;  %4414 = vmatpush3.msra.mxu0 %v6053_v58  ;;  %v2408_v24 = vand.u32 4294901760, %v2407_v48  ;;  %v3977_v40 = vpop.f32.mrf.mxu0  ;;  %v6328_v7 = vsub.f32 %v3881_v32, %v3881_v32  ;;  %v7922_v48 = vld [vmem:[#allocation41_spill] sm:$0xff] }
 0x161   :  { %4461 = vmatprep.subr.mxu1 %v2394_v25  ;;  %4415 = vmatprep.subr.mxu0 %v6079_v15  ;;  %v2296_v28 = vand.u32 4294901760, %v2295_v3  ;;  %v3978_v53 = vadd.f32 %v3977_v40, %v3976_v35  ;;  %v6334_v3 = vsub.f32 %v3890_v17, %v3890_v17  ;;  %v3889_v25 = vsel %vm55_vm11, 1.0, %v7736_v11  ;;  %v7925_v35 = vld [vmem:[#allocation12_spill] sm:$0xff]  ;;  %v7926_v40 = vld [vmem:[#allocation10_spill] sm:$0xff] }
 0x162   :  { %4462 = vmatpush3.msra.mxu1 %v2282_v22  ;;  %4416 = vmatpush3.msra.mxu0 %v6090_v62  ;;  %v7552_v55 = vand.u32 4294901760, %v6328_v7  ;;  %v6352_v22 = vsub.f32 %v3889_v25, %v3889_v25 }
 0x163   :  { %4463 = vmatprep.subr.mxu1 %v2401_v61  ;;  %4417 = vmatprep.subr.mxu0 %v6103_v57  ;;  %v6331_v60 = vadd.f32 %v4016_v29, %v3978_v53  ;;  %v7923_v29 = vld [vmem:[#allocation9_spill] sm:$0xff]  ;;  %v7551_v61 = vand.u32 4294901760, %v6334_v3 }
 0x164   :  { %4464 = vmatpush3.msra.mxu1 %v2289_v27  ;;  %4418 = vmatpush3.msra.mxu0 %v6116_v39  ;;  %v2164_v27 = vsub.f32 %v6328_v7, %v7552_v55  ;;  %v7554_v32 = vand.u32 4294901760, %v6352_v22  ;;  %v7930_v55 = vld [vmem:[#allocation14_spill] sm:$0xff] }
 0x165   :  { %4465 = vmatprep.subr.mxu1 %v2408_v24  ;;  %4419 = vmatprep.subr.mxu0 %v6129_v23  ;;  %v2173_v24 = vsub.f32 %v6334_v3, %v7551_v61  ;;  %v7929_v61 = vld [vmem:[#allocation13_spill] sm:$0xff] }
 0x166   :  { %4466 = vmatpush3.msra.mxu1 %v2296_v28  ;;  %4420 = vmatpush3.msra.mxu0 %v7922_v48  ;;  %v7927_v28 = vand.u32 4294901760, %v7926_v40  ;;  %v2165_v17 = vand.u32 4294901760, %v2164_v27  ;;  %v2179_v53 = vsub.f32 %v6352_v22, %v7554_v32  ;;  %v7931_v32 = vld [vmem:[#allocation15_spill] sm:$0xff] }
 0x167   :  { %3918 = vmatmul.mubr.msk.f32.vlgmr.msra.gmra.mxu1 %vm47_vm9, %v7681_v4  ;;  %4511 = vmatprep.subr.mxu1 %v7923_v29  ;;  %v2174_v25 = vand.u32 4294901760, %v2173_v24 }
 0x168   :  { %4421 = vmatprep.subr.mxu0 %v6155_v26  ;;  %3919 = vmatprep.mubr.msk.f32.mxu1 %vm56_vm10, %v7681_v4  ;;  %v2180_v14 = vand.u32 4294901760, %v2179_v53  ;;  %v7934_v53 = vld [vmem:[#allocation21_spill] sm:$0xff] }
 0x169   :  { %4512 = vmatpush3.msra.mxu1 %v7924_v42  ;;  %4422 = vmatpush3.msra.mxu0 %v6168_v41 }
 0x16a   :  { %4513 = vmatprep.subr.mxu1 %v5864_v2  ;;  %4423 = vmatprep.subr.mxu0 %v6179_v36 }
 0x16b   :  { %4514 = vmatpush3.msra.mxu1 %v7925_v35  ;;  %4424 = vmatpush3.msra.mxu0 %v6187_v37 }
 0x16c   :  { %3920 = vmatmul.mubr.msk.f32.gmra.mxu1 %vm55_vm11, %v7681_v4  ;;  %4515 = vmatprep.subr.mxu1 %v5878_v20 }
 0x16d   :  { %4425 = vmatprep.subr.mxu0 %v6201_v31  ;;  %4516 = vmatpush3.msra.mxu1 %v5884_v10 }
 0x16e   :  { %2671 = vmatprep.mubr.f32.mxu1 %v7927_v28  ;;  %4426 = vmatpush3.msra.mxu0 %v6209_v0  ;;  %v7928_v28 = vld [vmem:[#allocation11_spill] sm:$0xff] }
 0x16f   :  { %4517 = vmatprep.subr.mxu1 %v5892_v12  ;;  %4427 = vmatprep.subr.mxu0 %v6219_v18 }
 0x170   :  { %4518 = vmatpush3.msra.mxu1 %v5900_v16  ;;  %4428 = vmatpush3.msra.mxu0 %v6232_v49  ;;  %v4087_v27 = vpop.f32.mrf.mxu1 }
 0x171   :  { %4519 = vmatprep.subr.mxu1 %v5914_v43  ;;  %2166 = vmatmul.mubr.f32.vlgmr.msra.gmra.mxu0 %v2165_v17  ;;  %v7932_v17 = vld [vmem:[#allocation16_spill] sm:$0xff] }
 0x172   :  { %4473 = vmatprep.subr.mxu0 %v7928_v28  ;;  %4520 = vmatpush3.msra.mxu1 %v5927_v33  ;;  %v4088_v6 = vpop.f32.mrf.mxu1 }
 0x173   :  { %2175 = vmatprep.mubr.f32.mxu0 %v2174_v25  ;;  %4474 = vmatpush3.msra.mxu0 %v7929_v61  ;;  %v4089_v24 = vadd.f32 %v4088_v6, %v4087_v27  ;;  %v7933_v25 = vld [vmem:[#allocation17_spill] sm:$0xff] }
 0x174   :  { %4521 = vmatprep.subr.mxu1 %v5936_v19  ;;  %4475 = vmatprep.subr.mxu0 %v7930_v55  ;;  %v7937_v27 = vld [vmem:[#allocation29_spill] sm:$0xff] }
 0x175   :  { %4522 = vmatpush3.msra.mxu1 %v5945_v5  ;;  %4476 = vmatpush3.msra.mxu0 %v7931_v32  ;;  %v4090_v11 = vpop.f32.mrf.mxu1 }
 0x176   :  { %4523 = vmatprep.subr.mxu1 %v5960_v56  ;;  %2181 = vmatmul.mubr.f32.gmra.mxu0 %v2180_v14  ;;  %v7936_v14 = vld [vmem:[#allocation26_spill] sm:$0xff] }
 0x177   :  { %4477 = vmatprep.subr.mxu0 %v7932_v17  ;;  %4524 = vmatpush3.msra.mxu1 %v5970_v46  ;;  %v4091_v56 = vpop.f32.mrf.mxu1 }
 0x178   :  { %4478 = vmatpush3.msra.mxu0 %v7933_v25  ;;  %2555 = vmatprep.mubr.f32.mxu0 %v7926_v40  ;;  %v4092_v6 = vadd.f32 %v4091_v56, %v4090_v11  ;;  %v7938_v40 = vld [vmem:[#allocation8_spill] sm:$0xff]  ;;  %v7941_v11 = vld [vmem:[#allocation35_spill] sm:$0xff] }
 0x179   :  { %4525 = vmatprep.subr.mxu1 %v5982_v47  ;;  %4479 = vmatprep.subr.mxu0 %v7934_v53 }
 0x17a   :  { %4526 = vmatpush3.msra.mxu1 %v5994_v34  ;;  %4480 = vmatpush3.msra.mxu0 %v7935_v44  ;;  %v4049_v47 = vpop.f32.mrf.mxu0  ;;  %v7939_v34 = vld [vmem:[#allocation20_spill] sm:$0xff]  ;;  %v7940_v44 = vld [vmem:[#allocation18_spill] sm:$0xff] }
 0x17b   :  { %4527 = vmatprep.subr.mxu1 %v6017_v13  ;;  %4481 = vmatprep.subr.mxu0 %v7936_v14 }
 0x17c   :  { %4528 = vmatpush3.msra.mxu1 %v6053_v58  ;;  %4482 = vmatpush3.msra.mxu0 %v7937_v27  ;;  %v4050_v13 = vpop.f32.mrf.mxu0 }
 0x17d   :  { %4529 = vmatprep.subr.mxu1 %v6079_v15  ;;  %4483 = vmatprep.subr.mxu0 %v7938_v40  ;;  %v4051_v56 = vadd.f32 %v4050_v13, %v4049_v47  ;;  %v7942_v15 = vld [vmem:[#allocation39_spill] sm:$0xff]  ;;  %v7943_v40 = vld [vmem:[#allocation22_spill] sm:$0xff] }
 0x17e   :  { %4530 = vmatpush3.msra.mxu1 %v6090_v62  ;;  %4484 = vmatpush3.msra.mxu0 %v7939_v34 }
 0x17f   :  { %4531 = vmatprep.subr.mxu1 %v6103_v57  ;;  %4485 = vmatprep.subr.mxu0 %v7940_v44  ;;  %v724_v34 = vadd.f32 %v4051_v56, %v6312_v51  ;;  %v4052_v62 = vpop.f32.mrf.mxu0  ;;  %v7944_v44 = vld [vmem:[#allocation24_spill] sm:$0xff]  ;;  %v7947_v51 = vld [vmem:[#allocation42_spill] sm:$0xff] }
 0x180   :  { %4532 = vmatpush3.msra.mxu1 %v6116_v39  ;;  %4486 = vmatpush3.msra.mxu0 %v7941_v11  ;;  %v7945_v39 = vld [vmem:[#allocation36_spill] sm:$0xff] }
 0x181   :  { %4533 = vmatprep.subr.mxu1 %v6129_v23  ;;  %4487 = vmatprep.subr.mxu0 %v7942_v15  ;;  %v4053_v47 = vpop.f32.mrf.mxu0  ;;  %v6423_v13 = vadd.f32 %v4089_v24, %v724_v34  ;;  %v7946_v15 = vld [vmem:[#allocation40_spill] sm:$0xff] }
 0x182   :  { %4534 = vmatpush3.msra.mxu1 %v7922_v48  ;;  %4488 = vmatpush3.msra.mxu0 %v7943_v40  ;;  %v4054_v48 = vadd.f32 %v4053_v47, %v4052_v62  ;;  %v7948_v56 = vld [vmem:[#allocation44_spill] sm:$0xff]  ;;  %v7949_v62 = vand.u32 4294901760, %v6328_v7 }
 0x183   :  { %4535 = vmatprep.subr.mxu1 %v6155_v26  ;;  %4489 = vmatprep.subr.mxu0 %v7944_v44 }
 0x184   :  { %4536 = vmatpush3.msra.mxu1 %v6168_v41  ;;  %4490 = vmatpush3.msra.mxu0 %v7945_v39  ;;  %v733_v41 = vadd.f32 %v4054_v48, %v6331_v60  ;;  %v7950_v60 = vld [vmem:[#allocation45_spill] sm:$0xff]  ;;  %v7951_v48 = vand.u32 4294901760, %v6334_v3 }
 0x185   :  { %4537 = vmatprep.subr.mxu1 %v6179_v36  ;;  %4491 = vmatprep.subr.mxu0 %v7946_v15 }
 0x186   :  { %4538 = vmatpush3.msra.mxu1 %v6187_v37  ;;  %4492 = vmatpush3.msra.mxu0 %v7947_v51  ;;  %v6436_v34 = vadd.f32 %v4092_v6, %v733_v41  ;;  %v7952_v41 = vand.u32 4294901760, %v6352_v22 }
 0x187   :  { %4539 = vmatprep.subr.mxu1 %v6201_v31  ;;  %4493 = vmatprep.subr.mxu0 %v7948_v56 }
 0x188   :  { %4540 = vmatpush3.msra.mxu1 %v6209_v0  ;;  %4494 = vmatpush3.msra.mxu0 %v6166_v21 }
 0x189   :  { %4541 = vmatprep.subr.mxu1 %v6219_v18  ;;  %4495 = vmatprep.subr.mxu0 %v6177_v59 }
 0x18a   :  { %4542 = vmatpush3.msra.mxu1 %v6232_v49  ;;  %4496 = vmatpush3.msra.mxu0 %v6185_v63 }
 0x18b   :  { %2675 = vmatmul.mubr.f32.vlgmr.msra.gmra.mxu1 %v7949_v62  ;;  %4587 = vmatprep.subr.mxu1 %v7923_v29  ;;  %v7957_v29 = vld [vmem:[#allocation27_spill] sm:$0xff] }
 0x18c   :  { %4497 = vmatprep.subr.mxu0 %v7950_v60  ;;  %2682 = vmatprep.mubr.f32.mxu1 %v7951_v48  ;;  %v7968_v48 = vld [vmem:[#allocation28_spill] sm:$0xff] }
 0x18d   :  { %4588 = vmatpush3.msra.mxu1 %v7924_v42  ;;  %4498 = vmatpush3.msra.mxu0 %v6207_v54 }
 0x18e   :  { %4589 = vmatprep.subr.mxu1 %v5864_v2  ;;  %4499 = vmatprep.subr.mxu0 %v6217_v45  ;;  %v7953_v2 = vand.u32 4294901760, %v7928_v28  ;;  %v200_v28 = vld [vmem:[#allocation2 + $0x368] sm:$0xff] }
 0x18f   :  { %4590 = vmatpush3.msra.mxu1 %v7925_v35  ;;  %4500 = vmatpush3.msra.mxu0 %v6230_v8  ;;  %v7962_v35 = vld [vmem:[#allocation23_spill] sm:$0xff] }
 0x190   :  { %2686 = vmatmul.mubr.f32.gmra.mxu1 %v7952_v41  ;;  %4591 = vmatprep.subr.mxu1 %v5878_v20  ;;  %v7954_v20 = vand.u32 4294901760, %v7929_v61  ;;  %v7960_v61 = vld [vmem:[#allocation19_spill] sm:$0xff]  ;;  %v7969_v41 = vld [vmem:[#allocation8_spill] sm:$0xff] }
 0x191   :  { %4501 = vmatprep.subr.mxu0 %v6240_v1  ;;  %4592 = vmatpush3.msra.mxu1 %v5884_v10 }
 0x192   :  { %3925 = vmatprep.mubr.msk.f32.mxu1 %vm48_vm8, %v7681_v4  ;;  %4502 = vmatpush3.msra.mxu0 %v6250_v38 }
 0x193   :  { %4593 = vmatprep.subr.mxu1 %v5892_v12  ;;  %4503 = vmatprep.subr.mxu0 %v6258_v30  ;;  %v7955_v12 = vand.u32 4294901760, %v7930_v55  ;;  %v201_v55 = vld [vmem:[#allocation2 + $0x370] sm:$0xff] }
 0x194   :  { %4594 = vmatpush3.msra.mxu1 %v5900_v16  ;;  %4504 = vmatpush3.msra.mxu0 %v6266_v50  ;;  %v4163_v10 = vpop.f32.mrf.mxu1  ;;  %v7956_v16 = vand.u32 4294901760, %v7931_v32  ;;  %v6502_v6 = vand.u32 4294901760, %v201_v55 }
 0x195   :  { %4595 = vmatprep.subr.mxu1 %v5914_v43  ;;  %2558 = vmatmul.mubr.f32.vlgmr.msra.gmra.mxu0 %v6328_v7  ;;  %v202_v43 = vld [vmem:[#allocation2 + $0x378] sm:$0xff] }
 0x196   :  { %4549 = vmatprep.subr.mxu0 %v7953_v2  ;;  %4596 = vmatpush3.msra.mxu1 %v5927_v33  ;;  %v4164_v7 = vpop.f32.mrf.mxu1  ;;  %v7970_v2 = vand.u32 4294901760, %v7969_v41 }
 0x197   :  { %2564 = vmatprep.mubr.f32.mxu0 %v6334_v3  ;;  %4550 = vmatpush3.msra.mxu0 %v7954_v20  ;;  %v4165_v33 = vadd.f32 %v4164_v7, %v4163_v10  ;;  %v7958_v3 = vand.u32 4294901760, %v7932_v17  ;;  %v7965_v17 = vld [vmem:[#allocation37_spill] sm:$0xff]  ;;  %v6515_v20 = vand.u32 4294901760, %v200_v28 }
 0x198   :  { %4597 = vmatprep.subr.mxu1 %v5936_v19  ;;  %4551 = vmatprep.subr.mxu0 %v7955_v12  ;;  %v7959_v19 = vand.u32 4294901760, %v7933_v25  ;;  %v7966_v25 = vand.u32 4294901760, %v7936_v14  ;;  %v199_v14 = vld [vmem:[#allocation2 + $0x360] sm:$0xff] }
 0x199   :  { %4598 = vmatpush3.msra.mxu1 %v5945_v5  ;;  %4552 = vmatpush3.msra.mxu0 %v7956_v16  ;;  %v6491_v5 = vand.u32 4294901760, %v202_v43  ;;  %v4166_v42 = vpop.f32.mrf.mxu1  ;;  %v7971_v12 = vld [vmem:[#allocation33_spill] sm:$0xff]  ;;  %v7972_v16 = vld [vmem:[#allocation20_spill] sm:$0xff] }
 0x19a   :  { %4599 = vmatprep.subr.mxu1 %v7957_v29  ;;  %2567 = vmatmul.mubr.f32.gmra.mxu0 %v6352_v22  ;;  %v7961_v22 = vand.u32 4294901760, %v7934_v53  ;;  %v7967_v53 = vand.u32 4294901760, %v7937_v27  ;;  %v7973_v7 = vand.u32 4294901760, %v7972_v16  ;;  %v7976_v29 = vld [vmem:[#allocation30_spill] sm:$0xff]  ;;  %v7986_v16 = vand.u32 4294901760, %v7946_v15 }
 0x19b   :  { %4553 = vmatprep.subr.mxu0 %v7958_v3  ;;  %4600 = vmatpush3.msra.mxu1 %v5970_v46  ;;  %v7963_v46 = vld [vmem:[#allocation25_spill] sm:$0xff]  ;;  %v4167_v24 = vpop.f32.mrf.mxu1  ;;  %v6510_v62 = vsub.f32 %v202_v43, %v6491_v5  ;;  %v6524_v43 = vsub.f32 %v201_v55, %v6502_v6  ;;  %v6527_v3 = vadd.s32 896, %v7976_v29  ;;  %v7988_v15 = vand.u32 4294901760, %v7948_v56 }
 0x19c   :  { %4554 = vmatpush3.msra.mxu0 %v7959_v19  ;;  %3921 = vmatprep.mubr.msk.f32.mxu0 %vm48_vm8, %v7681_v4  ;;  %v7964_v32 = vand.u32 4294901760, %v7963_v46  ;;  %v6504_v47 = vadd.f32 %v4167_v24, %v4166_v42  ;;  %v198_v19 = vld [vmem:[#allocation2 + $0x358] sm:$0xff]  ;;  %v6533_v46 = vand.u32 4294901760, %v199_v14  ;;  %v6539_v24 = vsub.f32 %v200_v28, %v6515_v20  ;;  %v7984_v28 = vld [vmem:[#allocation43_spill] sm:$0xff] }
 0x19d   :  { %4601 = vmatprep.subr.mxu1 %v7960_v61  ;;  %4555 = vmatprep.subr.mxu0 %v7961_v22  ;;  %v7977_v61 = vld [vmem:[#allocation38_spill] sm:$0xff]  ;;  %v7978_v22 = vand.u32 4294901760, %v7941_v11  ;;  %v6544_v11 = vand.u32 4294901760, %v198_v19  ;;  %vm50_vm12 = vcmp.eq.s32.totalorder %v5038_v52, %v6527_v3 }
 0x19e   :  { %4602 = vmatpush3.msra.mxu1 %v7962_v35  ;;  %4556 = vmatpush3.msra.mxu0 %v7964_v32  ;;  %v7579_v35 = vand.u32 4294901760, %v6510_v62  ;;  %v7979_v32 = vld [vmem:[#allocation39_spill] sm:$0xff] }
 0x19f   :  { %4603 = vmatprep.subr.mxu1 %v7965_v17  ;;  %4557 = vmatprep.subr.mxu0 %v7966_v25  ;;  %v7980_v55 = vand.u32 4294901760, %v7979_v32  ;;  %v7981_v17 = vld [vmem:[#allocation41_spill] sm:$0xff]  ;;  %v7982_v25 = vand.u32 4294901760, %v7943_v40  ;;  %v7985_v40 = vand.u32 4294901760, %v7945_v39 }
 0x1a0   :  { %4604 = vmatpush3.msra.mxu1 %v6053_v58  ;;  %4558 = vmatpush3.msra.mxu0 %v7967_v53  ;;  %v7974_v58 = vld [vmem:[#allocation18_spill] sm:$0xff] }
 0x1a1   :  { %4605 = vmatprep.subr.mxu1 %v7968_v48  ;;  %4559 = vmatprep.subr.mxu0 %v7970_v2  ;;  %v4125_v10 = vpop.f32.mrf.mxu0  ;;  %v7975_v27 = vand.u32 4294901760, %v7974_v58  ;;  %v197_v48 = vld [vmem:[#allocation2 + $0x350] sm:$0xff]  ;;  %v7577_v2 = vand.u32 4294901760, %v6524_v43 }
 0x1a2   :  { %4606 = vmatpush3.msra.mxu1 %v7971_v12  ;;  %4560 = vmatpush3.msra.mxu0 %v7973_v7  ;;  %v7576_v7 = vand.u32 4294901760, %v6539_v24  ;;  %v6568_v39 = vand.u32 4294901760, %v197_v48 }
 0x1a3   :  { %4607 = vmatprep.subr.mxu1 %v6103_v57  ;;  %4561 = vmatprep.subr.mxu0 %v7975_v27  ;;  %v4126_v42 = vpop.f32.mrf.mxu0  ;;  %v7987_v27 = vand.u32 4294901760, %v7947_v51 }
 0x1a4   :  { %4608 = vmatpush3.msra.mxu1 %v7977_v61  ;;  %4562 = vmatpush3.msra.mxu0 %v7978_v22  ;;  %v4127_v57 = vadd.f32 %v4126_v42, %v4125_v10  ;;  %v6560_v10 = vsub.f32 %v199_v14, %v6533_v46  ;;  %v6574_v14 = vsub.f32 %v198_v19, %v6544_v11  ;;  %v7989_v42 = vmov 0.0  }
 0x1a5   :  { %4609 = vmatprep.subr.mxu1 %v6129_v23  ;;  %4563 = vmatprep.subr.mxu0 %v7980_v55  ;;  %v4128_v41 = vpop.f32.mrf.mxu0  ;;  %v7983_v23 = vand.u32 4294901760, %v7944_v44  ;;  %v7992_v22 = vand.u32 4294901760, %v6177_v59  ;;  %v6602_v32 = vsub.f32 %v197_v48, %v6568_v39 }
 0x1a6   :  { %4610 = vmatpush3.msra.mxu1 %v7981_v17  ;;  %4564 = vmatpush3.msra.mxu0 %v7982_v25  ;;  %v1020_v53 = vadd.f32 %v4127_v57, %v6423_v13  ;;  %v3105_v13 = vsub.f32 %v6510_v62, %v7579_v35  ;;  %v7575_v61 = vand.u32 4294901760, %v6560_v10  ;;  %v3119_v57 = vsub.f32 %v6539_v24, %v7576_v7  ;;  %v212_v7 = vld [vmem:[#allocation2 + $0x3c8] sm:$0xff] }
 0x1a7   :  { %4611 = vmatprep.subr.mxu1 %v6155_v26  ;;  %4565 = vmatprep.subr.mxu0 %v7983_v23  ;;  %v196_v26 = vld [vmem:[#allocation2 + $0x348] sm:$0xff]  ;;  %v4129_v44 = vpop.f32.mrf.mxu0  ;;  %v7573_v55 = vand.u32 4294901760, %v6574_v14  ;;  %v7997_v23 = vand.u32 4294901760, %v6207_v54 }
 0x1a8   :  { %4612 = vmatpush3.msra.mxu1 %v7984_v28  ;;  %4566 = vmatpush3.msra.mxu0 %v7985_v40  ;;  %v6562_v12 = vadd.f32 %v4165_v33, %v1020_v53  ;;  %v4130_v58 = vadd.f32 %v4129_v44, %v4128_v41  ;;  %v195_v33 = vld [vmem:[#allocation2 + $0x340] sm:$0xff]  ;;  %v6588_v51 = vand.u32 4294901760, %v196_v26  ;;  %v3106_v56 = vand.u32 4294901760, %v3105_v13  ;;  %v7996_v53 = vld [vmem:[#allocation32_spill] sm:$0xff] }
 0x1a9   :  { %4613 = vmatprep.subr.mxu1 %v6179_v36  ;;  %4567 = vmatprep.subr.mxu0 %v7986_v16  ;;  %v3112_v36 = vsub.f32 %v6524_v43, %v7577_v2  ;;  %v3126_v48 = vsub.f32 %v6560_v10, %v7575_v61  ;;  %v3120_v28 = vand.u32 4294901760, %v3119_v57  ;;  %v7998_v44 = vand.u32 4294901760, %v6217_v45 }
 0x1aa   :  { %4614 = vmatpush3.msra.mxu1 %v6187_v37  ;;  %4568 = vmatpush3.msra.mxu0 %v7987_v27  ;;  %v6586_v37 = vsel %vm50_vm12, 1.0, %v7989_v42  ;;  %v1027_v19 = vadd.f32 %v4130_v58, %v6436_v34  ;;  %v6604_v34 = vand.u32 4294901760, %v195_v33  ;;  %v3133_v16 = vsub.f32 %v6574_v14, %v7573_v55 }
 0x1ab   :  { %4615 = vmatprep.subr.mxu1 %v6201_v31  ;;  %4569 = vmatprep.subr.mxu0 %v7988_v15  ;;  %7990 = vst [vmem:[#allocation9_spill] sm:$0xff] %v6586_v37  ;;  %v7991_v31 = vand.u32 4294901760, %v6166_v21  ;;  %v218_v59 = vsel %vm216_vm13, %v6586_v37, 0  ;;  %v3113_v25 = vand.u32 4294901760, %v3112_v36  ;;  %v7999_v58 = vand.u32 4294901760, %v6230_v8 }
 0x1ac   :  { %4616 = vmatpush3.msra.mxu1 %v6209_v0  ;;  %v194_v0 = vld [vmem:[#allocation2 + $0x338] sm:$0xff]  ;;  %v6607_v21 = vadd.f32 %v6504_v47, %v1027_v19  ;;  %v6621_v47 = vsub.f32 %v196_v26, %v6588_v51  ;;  %v6636_v40 = vsub.f32 %v218_v59, %v218_v59  ;;  %v6640_v13 = vsub.f32 %v195_v33, %v6604_v34  ;;  %v192_v26 = vld [vmem:[#allocation2 + $0x328] sm:$0xff]  ;;  %v191_v33 = vld [vmem:[#allocation2 + $0x320] sm:$0xff] }
 0x1ad   :  { %4570 = vmatpush3.msra.mxu0 %v7991_v31  ;;  %4617 = vmatprep.subr.mxu1 %v6219_v18  ;;  %v7993_v18 = vand.u32 4294901760, %v6185_v63  ;;  %v7995_v63 = vand.u32 4294901760, %v7950_v60  ;;  %v6632_v41 = vand.u32 4294901760, %v194_v0  ;;  %v7572_v60 = vand.u32 4294901760, %v6602_v32  ;;  %v189_v59 = vld [vmem:[#allocation2 + $0x310] sm:$0xff] }
 0x1ae   :  { %4571 = vmatprep.subr.mxu0 %v7992_v22  ;;  %4618 = vmatpush3.msra.mxu1 %v6232_v49  ;;  %v193_v49 = vld [vmem:[#allocation2 + $0x330] sm:$0xff]  ;;  %v7569_v27 = vand.u32 4294901760, %v6621_v47  ;;  %v3127_v45 = vand.u32 4294901760, %v3126_v48  ;;  %v6661_v36 = vand.u32 4294901760, %v192_v26  ;;  %v8000_v19 = vand.u32 4294901760, %v6240_v1  ;;  %v190_v22 = vld [vmem:[#allocation2 + $0x318] sm:$0xff] }
 0x1af   :  { %4572 = vmatpush3.msra.mxu0 %v7993_v18  ;;  %3926 = vmatmul.mubr.msk.f32.vlgmr.msra.gmra.mxu1 %vm47_vm9, %v7681_v4  ;;  %v6648_v54 = vand.u32 4294901760, %v193_v49  ;;  %v6659_v15 = vsub.f32 %v194_v0, %v6632_v41  ;;  %v3140_v8 = vsub.f32 %v6602_v32, %v7572_v60  ;;  %v7580_v31 = vand.u32 4294901760, %v6636_v40 }
 0x1b0   :  { %3101 = vmatprep.subr.mxu1 %v7989_v42  ;;  %4573 = vmatprep.subr.mxu0 %v7995_v63  ;;  %v8001_v57 = vand.u32 4294901760, %v6250_v38  ;;  %v3134_v0 = vand.u32 4294901760, %v3133_v16  ;;  %v6677_v18 = vand.u32 4294901760, %v191_v33  ;;  %v3147_v63 = vsub.f32 %v6621_v47, %v7569_v27 }
 0x1b1   :  { %3927 = vmatprep.mubr.msk.f32.mxu1 %vm56_vm10, %v7681_v4  ;;  %3107 = vmatpush1.msra.mxu1 %v3106_v56  ;;  %v7568_v56 = vand.u32 4294901760, %v6640_v13  ;;  %v6675_v1 = vsub.f32 %v193_v49, %v6648_v54  ;;  %v8004_v38 = vand.u32 4294901760, %v6266_v50  ;;  %v7570_v48 = vand.u32 4294901760, %v6659_v15 }
 0x1b2   :  { %4574 = vmatpush3.msra.mxu0 %v7997_v23  ;;  %3108 = vmatprep.subr.mxu1 %v7989_v42  ;;  %v6689_v49 = vsub.f32 %v192_v26, %v6661_v36  ;;  %v6691_v23 = vand.u32 4294901760, %v190_v22  ;;  %v3073_v50 = vsub.f32 %v6636_v40, %v7580_v31  ;;  %v211_v31 = vld [vmem:[#allocation2 + $0x3c0] sm:$0xff]  ;;  %vm58_vm14 = vcmp.eq.s32.totalorder %v7996_v53, %v6527_v3 }
 0x1b3   :  { %4575 = vmatprep.subr.mxu0 %v7998_v44  ;;  %3114 = vmatpush1.msra.mxu1 %v3113_v25  ;;  %8002 = vst [vmem:[#allocation34_spill] sm:$0xff] %v6675_v1  ;;  %v8003_v25 = vand.u32 4294901760, %v6258_v30  ;;  %v3141_v30 = vand.u32 4294901760, %v3140_v8  ;;  %v3154_v26 = vsub.f32 %v6640_v13, %v7568_v56  ;;  %v6704_v44 = vand.u32 4294901760, %v189_v59  ;;  %v187_v8 = vld [vmem:[#allocation2 + $0x300] sm:$0xff] }
 0x1b4   :  { %4576 = vmatpush3.msra.mxu0 %v7999_v58  ;;  %3928 = vmatmul.mubr.msk.f32.gmra.mxu1 %vm55_vm11, %v7681_v4  ;;  %8005 = vst [vmem:[#allocation12_spill] sm:$0xff] %v6689_v49  ;;  %v7571_v16 = vand.u32 4294901760, %v6675_v1  ;;  %v6709_v58 = vsub.f32 %v191_v33, %v6677_v18  ;;  %v3161_v33 = vsub.f32 %v6659_v15, %v7570_v48  ;;  %v215_v56 = vld [vmem:[#allocation2 + $0x3e0] sm:$0xff]  ;;  %v214_v48 = vld [vmem:[#allocation2 + $0x3d8] sm:$0xff]  ;;  %v6965_v3 = vsel %vm58_vm14, 1.0, %v7989_v42 }
 0x1b5   :  { %3115 = vmatprep.subr.mxu1 %v7989_v42  ;;  %4577 = vmatprep.subr.mxu0 %v8000_v19  ;;  %v6725_v9 = vsub.f32 %v190_v22, %v6691_v23  ;;  %v6753_v55 = vand.u32 4294901760, %v215_v56  ;;  %8035 = vst [vmem:[#allocation27_spill] sm:$0xff] %v6965_v3 }
 0x1b6   :  { %3121 = vmatpush1.msra.mxu1 %v3120_v28  ;;  %3929 = vmatprep.mubr.msk.f32.mxu1 %vm216_vm13, %v6586_v37  ;;  %v188_v28 = vld [vmem:[#allocation2 + $0x308] sm:$0xff]  ;;  %8006 = vst [vmem:[#allocation10_spill] sm:$0xff] %v6709_v58  ;;  %v3168_v22 = vsub.f32 %v6675_v1, %v7571_v16  ;;  %v3162_v17 = vand.u32 4294901760, %v3161_v33  ;;  %v6798_v37 = vand.u32 4294901760, %v211_v31 }
 0x1b7   :  { %4578 = vmatpush3.msra.mxu0 %v8001_v57  ;;  %3122 = vmatprep.subr.mxu1 %v7989_v42  ;;  %v6716_v19 = vand.u32 4294901760, %v188_v28  ;;  %8007 = vst [vmem:[#allocation11_spill] sm:$0xff] %v6725_v9  ;;  %v7581_v60 = vand.u32 4294901760, %v6725_v9 }
 0x1b8   :  { %4579 = vmatprep.subr.mxu0 %v8003_v25  ;;  %3128 = vmatpush1.msra.mxu1 %v3127_v45  ;;  %v3148_v45 = vand.u32 4294901760, %v3147_v63  ;;  %v3074_v25 = vand.u32 4294901760, %v3073_v50  ;;  %v3155_v63 = vand.u32 4294901760, %v3154_v26  ;;  %v6740_v50 = vand.u32 4294901760, %v187_v8 }
 0x1b9   :  { %4580 = vmatpush3.msra.mxu0 %v8004_v38  ;;  %3129 = vmatprep.subr.mxu1 %v7989_v42  ;;  %v4239_v57 = vpop.f32.mrf.mxu1  ;;  %v6729_v38 = vsub.f32 %v189_v59, %v6704_v44  ;;  %v6746_v59 = vsub.f32 %v188_v28, %v6716_v19 }
 0x1ba   :  { %3922 = vmatmul.mubr.msk.f32.vlgmr.msra.gmra.mxu0 %vm47_vm9, %v7681_v4  ;;  %2977 = vmatprep.subr.mxu0 %v7989_v42 }
 0x1bb   :  { %3135 = vmatpush1.msra.mxu1 %v3134_v0  ;;  %3923 = vmatprep.mubr.msk.f32.mxu0 %vm56_vm10, %v7681_v4  ;;  %v7574_v0 = vand.u32 4294901760, %v6689_v49  ;;  %8008 = vst [vmem:[#allocation13_spill] sm:$0xff] %v6729_v38  ;;  %v4240_v27 = vpop.f32.mrf.mxu1  ;;  %8009 = vst [vmem:[#allocation14_spill] sm:$0xff] %v6746_v59  ;;  %v7582_v28 = vand.u32 4294901760, %v6729_v38 }
 0x1bc   :  { %2979 = vmatpush1.msra.mxu0 %v6491_v5  ;;  %3136 = vmatprep.subr.mxu1 %v7989_v42  ;;  %v6742_v26 = vadd.f32 %v4240_v27, %v4239_v57  ;;  %v3169_v57 = vand.u32 4294901760, %v3168_v22 }
 0x1bd   :  { %2980 = vmatprep.subr.mxu0 %v7989_v42  ;;  %3142 = vmatpush1.msra.mxu1 %v3141_v30  ;;  %v7578_v30 = vand.u32 4294901760, %v6709_v58  ;;  %v3175_v16 = vsub.f32 %v6689_v49, %v7574_v0  ;;  %v6765_v0 = vand.u32 4294901760, %v214_v48 }
 0x1be   :  { %2982 = vmatpush1.msra.mxu0 %v6502_v6  ;;  %3143 = vmatprep.subr.mxu1 %v7989_v42  ;;  %v4242_v27 = vpop.f32.mrf.mxu1 }
 0x1bf   :  { %3924 = vmatmul.mubr.msk.f32.gmra.mxu0 %vm55_vm11, %v7681_v4  ;;  %2983 = vmatprep.subr.mxu0 %v7989_v42  ;;  %v3182_v33 = vsub.f32 %v6709_v58, %v7578_v30  ;;  %v3176_v22 = vand.u32 4294901760, %v3175_v16  ;;  %v6777_v30 = vsub.f32 %v215_v56, %v6753_v55 }
 0x1c0   :  { %3149 = vmatpush1.msra.mxu1 %v3148_v45  ;;  %2985 = vmatpush1.msra.mxu0 %v6515_v20  ;;  %v213_v45 = vld [vmem:[#allocation2 + $0x3d0] sm:$0xff]  ;;  %v4243_v61 = vpop.f32.mrf.mxu1 }
 0x1c1   :  { %3075 = vmatprep.mubr.f32.mxu0 %v3074_v25  ;;  %3150 = vmatprep.subr.mxu1 %v7989_v42  ;;  %v6763_v25 = vsub.f32 %v187_v8, %v6740_v50  ;;  %v6770_v2 = vadd.f32 %v4243_v61, %v4242_v27  ;;  %v3189_v8 = vsub.f32 %v6725_v9, %v7581_v60  ;;  %v6779_v35 = vand.u32 4294901760, %v213_v45 }
 0x1c2   :  { %2986 = vmatprep.subr.mxu0 %v7989_v42  ;;  %3156 = vmatpush1.msra.mxu1 %v3155_v63  ;;  %v7591_v63 = vand.u32 4294901760, %v6746_v59  ;;  %8011 = vst [vmem:[#allocation16_spill] sm:$0xff] %v6777_v30  ;;  %v3196_v61 = vsub.f32 %v6729_v38, %v7582_v28  ;;  %v3183_v27 = vand.u32 4294901760, %v3182_v33  ;;  %v6791_v60 = vsub.f32 %v214_v48, %v6765_v0 }
 0x1c3   :  { %2988 = vmatpush1.msra.mxu0 %v6533_v46  ;;  %8010 = vst [vmem:[#allocation15_spill] sm:$0xff] %v6763_v25  ;;  %3157 = vmatprep.subr.mxu1 %v7989_v42  ;;  %v3190_v33 = vand.u32 4294901760, %v3189_v8  ;;  %v6803_v48 = vsub.f32 %v213_v45, %v6779_v35 }
 0x1c4   :  { %2989 = vmatprep.subr.mxu0 %v7989_v42  ;;  %3163 = vmatpush1.msra.mxu1 %v3162_v17  ;;  %v6786_v17 = vand.u32 4294901760, %v212_v7  ;;  %v4201_v16 = vpop.f32.mrf.mxu0  ;;  %8012 = vst [vmem:[#allocation17_spill] sm:$0xff] %v6791_v60  ;;  %v3203_v28 = vsub.f32 %v6746_v59, %v7591_v63  ;;  %v3197_v58 = vand.u32 4294901760, %v3196_v61  ;;  %v209_v59 = vld [vmem:[#allocation2 + $0x3b0] sm:$0xff]  ;;  %v6821_v61 = vsub.f32 %v211_v31, %v6798_v37 }
 0x1c5   :  { %2991 = vmatpush1.msra.mxu0 %v6544_v11  ;;  %3164 = vmatprep.subr.mxu1 %v7989_v42  ;;  %8013 = vst [vmem:[#allocation21_spill] sm:$0xff] %v6803_v48 }
 0x1c6   :  { %2992 = vmatprep.subr.mxu0 %v7989_v42  ;;  %3170 = vmatpush1.msra.mxu1 %v3169_v57  ;;  %v4202_v38 = vpop.f32.mrf.mxu0  ;;  %v210_v57 = vld [vmem:[#allocation2 + $0x3b8] sm:$0xff]  ;;  %v6808_v63 = vsub.f32 %v212_v7, %v6786_v17  ;;  %v3204_v7 = vand.u32 4294901760, %v3203_v28  ;;  %8016 = vst [vmem:[#allocation29_spill] sm:$0xff] %v6821_v61 }
 0x1c7   :  { %2994 = vmatpush1.msra.mxu0 %v6568_v39  ;;  %3171 = vmatprep.subr.mxu1 %v7989_v42  ;;  %v4203_v9 = vadd.f32 %v4202_v38, %v4201_v16  ;;  %v6816_v16 = vand.u32 4294901760, %v210_v57 }
 0x1c8   :  { %2995 = vmatprep.subr.mxu0 %v7989_v42  ;;  %3177 = vmatpush1.msra.mxu1 %v3176_v22  ;;  %8014 = vst [vmem:[#allocation26_spill] sm:$0xff] %v6808_v63  ;;  %v8015_v22 = vand.u32 4294901760, %v6763_v25 }
 0x1c9   :  { %2997 = vmatpush1.msra.mxu0 %v6588_v51  ;;  %3178 = vmatprep.subr.mxu1 %v7989_v42  ;;  %v1250_v38 = vadd.f32 %v4203_v9, %v6562_v12  ;;  %v4204_v56 = vpop.f32.mrf.mxu0  ;;  %v6828_v9 = vand.u32 4294901760, %v209_v59  ;;  %v8018_v12 = vand.u32 4294901760, %v6791_v60  ;;  %v6841_v1 = vsub.f32 %v210_v57, %v6816_v16 }
 0x1ca   :  { %2998 = vmatprep.subr.mxu0 %v7989_v42  ;;  %3184 = vmatpush1.msra.mxu1 %v3183_v27  ;;  %v3210_v8 = vsub.f32 %v6763_v25, %v8015_v22  ;;  %v208_v27 = vld [vmem:[#allocation2 + $0x3a8] sm:$0xff]  ;;  %v8017_v22 = vand.u32 4294901760, %v6777_v30 }
 0x1cb   :  { %3000 = vmatpush1.msra.mxu0 %v6604_v34  ;;  %3185 = vmatprep.subr.mxu1 %v7989_v42  ;;  %v4205_v25 = vpop.f32.mrf.mxu0  ;;  %v6831_v49 = vadd.f32 %v6742_v26, %v1250_v38  ;;  %8019 = vst [vmem:[#allocation35_spill] sm:$0xff] %v6841_v1  ;;  %v6843_v26 = vand.u32 4294901760, %v208_v27  ;;  %v8020_v38 = vand.u32 4294901760, %v6803_v48 }
 0x1cc   :  { %3001 = vmatprep.subr.mxu0 %v7989_v42  ;;  %3191 = vmatpush1.msra.mxu1 %v3190_v33  ;;  %v3223_v45 = vsub.f32 %v6777_v30, %v8017_v22  ;;  %v4206_v28 = vadd.f32 %v4205_v25, %v4204_v56  ;;  %v207_v33 = vld [vmem:[#allocation2 + $0x3a0] sm:$0xff]  ;;  %v3211_v22 = vand.u32 4294901760, %v3210_v8  ;;  %v3230_v30 = vsub.f32 %v6791_v60, %v8018_v12  ;;  %v206_v56 = vld [vmem:[#allocation2 + $0x398] sm:$0xff] }
 0x1cd   :  { %3003 = vmatpush1.msra.mxu0 %v6632_v41  ;;  %3192 = vmatprep.subr.mxu1 %v7989_v42  ;;  %v3237_v57 = vsub.f32 %v6803_v48, %v8020_v38  ;;  %v6854_v12 = vsub.f32 %v209_v59, %v6828_v9  ;;  %v6856_v31 = vand.u32 4294901760, %v207_v33  ;;  %v6869_v25 = vsub.f32 %v208_v27, %v6843_v26  ;;  %v203_v60 = vld [vmem:[#allocation2 + $0x380] sm:$0xff] }
 0x1ce   :  { %3004 = vmatprep.subr.mxu0 %v7989_v42  ;;  %3198 = vmatpush1.msra.mxu1 %v3197_v58  ;;  %v1265_v58 = vadd.f32 %v4206_v28, %v6607_v21  ;;  %v3224_v8 = vand.u32 4294901760, %v3223_v45  ;;  %v8022_v21 = vand.u32 4294901760, %v6808_v63  ;;  %v205_v28 = vld [vmem:[#allocation2 + $0x390] sm:$0xff]  ;;  %v3231_v38 = vand.u32 4294901760, %v3230_v30 }
 0x1cf   :  { %3006 = vmatpush1.msra.mxu0 %v6648_v54  ;;  %3199 = vmatprep.subr.mxu1 %v7989_v42  ;;  %8021 = vst [vmem:[#allocation22_spill] sm:$0xff] %v6854_v12  ;;  %8023 = vst [vmem:[#allocation24_spill] sm:$0xff] %v6869_v25  ;;  %v6871_v48 = vand.u32 4294901760, %v206_v56  ;;  %v3238_v30 = vand.u32 4294901760, %v3237_v57  ;;  %v6881_v27 = vsub.f32 %v207_v33, %v6856_v31  ;;  %v6883_v59 = vand.u32 4294901760, %v205_v28 }
 0x1d0   :  { %3007 = vmatprep.subr.mxu0 %v7989_v42  ;;  %3205 = vmatpush1.msra.mxu1 %v3204_v7  ;;  %v3244_v7 = vsub.f32 %v6808_v63, %v8022_v21  ;;  %v6864_v45 = vadd.f32 %v6770_v2, %v1265_v58  ;;  %v8025_v21 = vand.u32 4294901760, %v6821_v61  ;;  %v204_v58 = vld [vmem:[#allocation2 + $0x388] sm:$0xff] }
 0x1d1   :  { %3009 = vmatpush1.msra.mxu0 %v6661_v36  ;;  %3206 = vmatprep.subr.mxu1 %v7989_v42  ;;  %8024 = vst [vmem:[#allocation36_spill] sm:$0xff] %v6871_v48  ;;  %8026 = vst [vmem:[#allocation40_spill] sm:$0xff] %v6883_v59  ;;  %v6893_v33 = vsub.f32 %v206_v56, %v6871_v48  ;;  %v6907_v56 = vand.u32 4294901760, %v203_v60 }
 0x1d2   :  { %3010 = vmatprep.subr.mxu0 %v7989_v42  ;;  %3212 = vmatpush1.msra.mxu1 %v3211_v22  ;;  %v3251_v2 = vsub.f32 %v6821_v61, %v8025_v21  ;;  %v3245_v63 = vand.u32 4294901760, %v3244_v7  ;;  %v6895_v22 = vand.u32 4294901760, %v204_v58  ;;  %v6905_v21 = vsub.f32 %v205_v28, %v6883_v59 }
 0x1d3   :  { %3012 = vmatpush1.msra.mxu0 %v6677_v18  ;;  %3219 = vmatprep.subr.mxu1 %v7989_v42  ;;  %8028 = vst [vmem:[#allocation42_spill] sm:$0xff] %v6893_v33  ;;  %v8032_v28 = vand.u32 4294901760, %v6881_v27 }
 0x1d4   :  { %3013 = vmatprep.subr.mxu0 %v7989_v42  ;;  %3225 = vmatpush2.msra.mxu1 %v3224_v8  ;;  %v8027_v8 = vand.u32 4294901760, %v6841_v1  ;;  %8029 = vst [vmem:[#allocation44_spill] sm:$0xff] %v6895_v22  ;;  %v3252_v7 = vand.u32 4294901760, %v3251_v2 }
 0x1d5   :  { %3015 = vmatpush1.msra.mxu0 %v6691_v23  ;;  %3226 = vmatprep.subr.mxu1 %v7989_v42 }
 0x1d6   :  { %3016 = vmatprep.subr.mxu0 %v7989_v42  ;;  %3232 = vmatpush2.msra.mxu1 %v3231_v38  ;;  %v3258_v57 = vsub.f32 %v6841_v1, %v8027_v8  ;;  %v8030_v38 = vand.u32 4294901760, %v6854_v12  ;;  %v6917_v8 = vsub.f32 %v204_v58, %v6895_v22 }
 0x1d7   :  { %3018 = vmatpush1.msra.mxu0 %v6704_v44  ;;  %3233 = vmatprep.subr.mxu1 %v7989_v42 }
 0x1d8   :  { %3019 = vmatprep.subr.mxu0 %v7989_v42  ;;  %3239 = vmatpush2.msra.mxu1 %v3238_v30  ;;  %v3265_v61 = vsub.f32 %v6854_v12, %v8030_v38  ;;  %v3259_v2 = vand.u32 4294901760, %v3258_v57  ;;  %v8031_v30 = vand.u32 4294901760, %v6869_v25  ;;  %v7614_v38 = vand.u32 4294901760, %v6893_v33 }
 0x1d9   :  { %3021 = vmatpush1.msra.mxu0 %v6716_v19  ;;  %3240 = vmatprep.subr.mxu1 %v7989_v42  ;;  %v3279_v57 = vsub.f32 %v6881_v27, %v8032_v28  ;;  %v7618_v12 = vand.u32 4294901760, %v6905_v21 }
 0x1da   :  { %3022 = vmatprep.subr.mxu0 %v7989_v42  ;;  %3246 = vmatpush2.msra.mxu1 %v3245_v63  ;;  %v3272_v1 = vsub.f32 %v6869_v25, %v8031_v30  ;;  %v3266_v63 = vand.u32 4294901760, %v3265_v61  ;;  %v6927_v30 = vsub.f32 %v203_v60, %v6907_v56  ;;  %v3286_v61 = vsub.f32 %v6893_v33, %v7614_v38 }
 0x1db   :  { %3024 = vmatpush1.msra.mxu0 %v6740_v50  ;;  %3247 = vmatprep.subr.mxu1 %v7989_v42  ;;  %v6939_v60 = vadd.s32 768, %v7976_v29 }
 0x1dc   :  { %3031 = vmatprep.subr.mxu0 %v7989_v42  ;;  %3253 = vmatpush2.msra.mxu1 %v3252_v7  ;;  %v3273_v58 = vand.u32 4294901760, %v3272_v1  ;;  %v3293_v1 = vsub.f32 %v6905_v21, %v7618_v12  ;;  %v7617_v38 = vand.u32 4294901760, %v6927_v30  ;;  %v3287_v29 = vand.u32 4294901760, %v3286_v61 }
 0x1dd   :  { %3033 = vmatpush2.msra.mxu0 %v6753_v55  ;;  %3254 = vmatprep.subr.mxu1 %v7989_v42  ;;  %8033 = vst [vmem:[#allocation45_spill] sm:$0xff] %v6939_v60  ;;  %v4315_v28 = vpop.f32.mrf.mxu1  ;;  %vm49_vm15 = vcmp.eq.s32.totalorder %v5038_v52, %v6939_v60  ;;  %vm57_vm0 = vcmp.eq.s32.totalorder %v7996_v53, %v6939_v60  ;;  %v8046_v52 = vld [vmem:[#allocation15_spill] sm:$0xff] }
 0x1de   :  { %3034 = vmatprep.subr.mxu0 %v7989_v42  ;;  %3260 = vmatpush2.msra.mxu1 %v3259_v2  ;;  %v3280_v2 = vand.u32 4294901760, %v3279_v57  ;;  %v3307_v61 = vsub.f32 %v6927_v30, %v7617_v38 }
 0x1df   :  { %3036 = vmatpush2.msra.mxu0 %v6765_v0  ;;  %3261 = vmatprep.subr.mxu1 %v7989_v42  ;;  %v4316_v7 = vpop.f32.mrf.mxu1 }
 0x1e0   :  { %3037 = vmatprep.subr.mxu0 %v7989_v42  ;;  %3267 = vmatpush2.msra.mxu1 %v3266_v63  ;;  %v8034_v63 = vand.u32 4294901760, %v6917_v8  ;;  %v4317_v57 = vadd.f32 %v4316_v7, %v4315_v28  ;;  %v3883_v28 = vsel %vm49_vm15, 1.0, %v7989_v42  ;;  %v3308_v38 = vand.u32 4294901760, %v3307_v61 }
 0x1e1   :  { %3039 = vmatpush2.msra.mxu0 %v6779_v35  ;;  %3268 = vmatprep.subr.mxu1 %v7989_v42  ;;  %v3891_v61 = vsel %vm57_vm0, 1.0, %v7989_v42 }
 0x1e2   :  { %3040 = vmatprep.subr.mxu0 %v7989_v42  ;;  %3274 = vmatpush2.msra.mxu1 %v3273_v58  ;;  %v3300_v33 = vsub.f32 %v6917_v8, %v8034_v63  ;;  %v3294_v58 = vand.u32 4294901760, %v3293_v1  ;;  %v4318_v63 = vpop.f32.mrf.mxu1 }
 0x1e3   :  { %3042 = vmatpush2.msra.mxu0 %v6786_v17  ;;  %3275 = vmatprep.subr.mxu1 %v7989_v42 }
 0x1e4   :  { %3043 = vmatprep.subr.mxu0 %v7989_v42  ;;  %3281 = vmatpush2.msra.mxu1 %v3280_v2  ;;  %v3301_v7 = vand.u32 4294901760, %v3300_v33  ;;  %v4319_v2 = vpop.f32.mrf.mxu1  ;;  %v6981_v33 = vsub.f32 %v3883_v28, %v3883_v28 }
 0x1e5   :  { %3045 = vmatpush2.msra.mxu0 %v6798_v37  ;;  %3282 = vmatprep.subr.mxu1 %v7989_v42  ;;  %v4320_v1 = vadd.f32 %v4319_v2, %v4318_v63  ;;  %v7002_v2 = vsub.f32 %v3891_v61, %v3891_v61 }
 0x1e6   :  { %3046 = vmatprep.subr.mxu0 %v7989_v42  ;;  %3288 = vmatpush2.msra.mxu1 %v3287_v29  ;;  %v221_v29 = vsel %vm216_vm13, %v6965_v3, 0 }
 0x1e7   :  { %3048 = vmatpush2.msra.mxu0 %v6816_v16  ;;  %3289 = vmatprep.subr.mxu1 %v7989_v42 }
 0x1e8   :  { %3049 = vmatprep.subr.mxu0 %v7989_v42  ;;  %3295 = vmatpush2.msra.mxu1 %v3294_v58  ;;  %v4277_v12 = vpop.f32.mrf.mxu0  ;;  %v6986_v58 = vsub.f32 %v221_v29, %v221_v29 }
 0x1e9   :  { %3051 = vmatpush2.msra.mxu0 %v6828_v9  ;;  %3296 = vmatprep.subr.mxu1 %v7989_v42 }
 0x1ea   :  { %3052 = vmatprep.subr.mxu0 %v7989_v42  ;;  %3302 = vmatpush2.msra.mxu1 %v3301_v7  ;;  %v4278_v63 = vpop.f32.mrf.mxu0 }
 0x1eb   :  { %3054 = vmatpush2.msra.mxu0 %v6843_v26  ;;  %3303 = vmatprep.subr.mxu1 %v7989_v42  ;;  %v4279_v28 = vadd.f32 %v4278_v63, %v4277_v12 }
 0x1ec   :  { %3055 = vmatprep.subr.mxu0 %v7989_v42  ;;  %3309 = vmatpush2.msra.mxu1 %v3308_v38 }
 0x1ed   :  { %3057 = vmatpush2.msra.mxu0 %v6856_v31  ;;  %3930 = vmatmul.mubr.msk.f32.vlgmr.msra.gmra.mxu1 %vm49_vm15, %v7681_v4  ;;  %v1642_v38 = vadd.f32 %v4279_v28, %v6831_v49  ;;  %v4280_v29 = vpop.f32.mrf.mxu0  ;;  %v8036_v49 = vand.u32 4294901760, %v6981_v33 }
 0x1ee   :  { %3466 = vmatprep.subr.mxu1 %v7989_v42  ;;  %3058 = vmatprep.subr.mxu0 %v7989_v42 }
 0x1ef   :  { %3931 = vmatprep.mubr.msk.f32.mxu1 %vm216_vm13, %v6965_v3  ;;  %3468 = vmatpush1.msra.mxu1 %v6491_v5  ;;  %v4281_v63 = vpop.f32.mrf.mxu0  ;;  %v7010_v7 = vadd.f32 %v4317_v57, %v1642_v38  ;;  %v3079_v61 = vsub.f32 %v6981_v33, %v8036_v49  ;;  %v8037_v57 = vand.u32 4294901760, %v6986_v58  ;;  %v8044_v3 = vld [vmem:[#allocation13_spill] sm:$0xff] }
 0x1f0   :  { %3060 = vmatpush2.msra.mxu0 %v6871_v48  ;;  %3469 = vmatprep.subr.mxu1 %v7989_v42  ;;  %v4282_v28 = vadd.f32 %v4281_v63, %v4280_v29  ;;  %v8038_v29 = vand.u32 4294901760, %v6636_v40 }
 0x1f1   :  { %3061 = vmatprep.subr.mxu0 %v7989_v42  ;;  %3471 = vmatpush1.msra.mxu1 %v6502_v6  ;;  %v3088_v38 = vsub.f32 %v6986_v58, %v8037_v57  ;;  %v3080_v63 = vand.u32 4294901760, %v3079_v61  ;;  %v8039_v57 = vand.u32 4294901760, %v7002_v2 }
 0x1f2   :  { %3063 = vmatpush2.msra.mxu0 %v6883_v59  ;;  %3932 = vmatmul.mubr.msk.f32.gmra.mxu1 %vm57_vm0, %v7681_v4  ;;  %v1651_v49 = vadd.f32 %v4282_v28, %v6864_v45 }
 0x1f3   :  { %3472 = vmatprep.subr.mxu1 %v7989_v42  ;;  %3064 = vmatprep.subr.mxu0 %v7989_v42  ;;  %v3094_v45 = vsub.f32 %v7002_v2, %v8039_v57  ;;  %v3089_v28 = vand.u32 4294901760, %v3088_v38  ;;  %v8040_v57 = vld [vmem:[#allocation34_spill] sm:$0xff] }
 0x1f4   :  { %3474 = vmatpush1.msra.mxu1 %v6515_v20  ;;  %3562 = vmatprep.mubr.f32.mxu1 %v8038_v29  ;;  %v7034_v12 = vadd.f32 %v4320_v1, %v1651_v49 }
 0x1f5   :  { %3066 = vmatpush2.msra.mxu0 %v6895_v22  ;;  %3475 = vmatprep.subr.mxu1 %v7989_v42  ;;  %v3095_v1 = vand.u32 4294901760, %v3094_v45 }
 0x1f6   :  { %3067 = vmatprep.subr.mxu0 %v7989_v42  ;;  %3477 = vmatpush1.msra.mxu1 %v6533_v46 }
 0x1f7   :  { %3069 = vmatpush2.msra.mxu0 %v6907_v56  ;;  %3478 = vmatprep.subr.mxu1 %v7989_v42 }
 0x1f8   :  { %3081 = vmatmul.mubr.f32.vlgmr.msra.gmra.mxu0 %v3080_v63  ;;  %3325 = vmatprep.subr.mxu0 %v7989_v42 }
 0x1f9   :  { %3480 = vmatpush1.msra.mxu1 %v6544_v11  ;;  %3090 = vmatprep.mubr.f32.mxu0 %v3089_v28  ;;  %v8041_v28 = vld [vmem:[#allocation12_spill] sm:$0xff] }
 0x1fa   :  { %3328 = vmatpush1.msra.mxu0 %v6510_v62  ;;  %3481 = vmatprep.subr.mxu1 %v7989_v42 }
 0x1fb   :  { %3329 = vmatprep.subr.mxu0 %v7989_v42  ;;  %3483 = vmatpush1.msra.mxu1 %v6568_v39 }
 0x1fc   :  { %3332 = vmatpush1.msra.mxu0 %v6524_v43  ;;  %3484 = vmatprep.subr.mxu1 %v7989_v42 }
 0x1fd   :  { %3096 = vmatmul.mubr.f32.gmra.mxu0 %v3095_v1  ;;  %3333 = vmatprep.subr.mxu0 %v7989_v42 }
 0x1fe   :  { %3486 = vmatpush1.msra.mxu1 %v6588_v51  ;;  %3336 = vmatpush1.msra.mxu0 %v6539_v24 }
 0x1ff   :  { %3449 = vmatprep.mubr.f32.mxu0 %v6636_v40  ;;  %3487 = vmatprep.subr.mxu1 %v7989_v42 }
 0x200   :  { %3337 = vmatprep.subr.mxu0 %v7989_v42  ;;  %3489 = vmatpush1.msra.mxu1 %v6604_v34 }
 0x201   :  { %3340 = vmatpush1.msra.mxu0 %v6560_v10  ;;  %3490 = vmatprep.subr.mxu1 %v7989_v42  ;;  %v4391_v40 = vpop.f32.mrf.mxu1 }
 0x202   :  { %3341 = vmatprep.subr.mxu0 %v7989_v42  ;;  %3492 = vmatpush1.msra.mxu1 %v6632_v41 }
 0x203   :  { %3344 = vmatpush1.msra.mxu0 %v6574_v14  ;;  %3493 = vmatprep.subr.mxu1 %v7989_v42  ;;  %v4392_v61 = vpop.f32.mrf.mxu1 }
 0x204   :  { %3345 = vmatprep.subr.mxu0 %v7989_v42  ;;  %3495 = vmatpush1.msra.mxu1 %v6648_v54  ;;  %v4393_v38 = vadd.f32 %v4392_v61, %v4391_v40  ;;  %v8042_v40 = vld [vmem:[#allocation10_spill] sm:$0xff] }
 0x205   :  { %3348 = vmatpush1.msra.mxu0 %v6602_v32  ;;  %3496 = vmatprep.subr.mxu1 %v7989_v42 }
 0x206   :  { %3349 = vmatprep.subr.mxu0 %v7989_v42  ;;  %3498 = vmatpush1.msra.mxu1 %v6661_v36  ;;  %v4394_v49 = vpop.f32.mrf.mxu1 }
 0x207   :  { %3352 = vmatpush1.msra.mxu0 %v6621_v47  ;;  %3499 = vmatprep.subr.mxu1 %v7989_v42 }
 0x208   :  { %3353 = vmatprep.subr.mxu0 %v7989_v42  ;;  %3501 = vmatpush1.msra.mxu1 %v6677_v18  ;;  %v4395_v29 = vpop.f32.mrf.mxu1 }
 0x209   :  { %3356 = vmatpush1.msra.mxu0 %v6640_v13  ;;  %3502 = vmatprep.subr.mxu1 %v7989_v42  ;;  %v4396_v63 = vadd.f32 %v4395_v29, %v4394_v49  ;;  %v8043_v49 = vld [vmem:[#allocation11_spill] sm:$0xff] }
 0x20a   :  { %3357 = vmatprep.subr.mxu0 %v7989_v42  ;;  %3504 = vmatpush1.msra.mxu1 %v6691_v23 }
 0x20b   :  { %3360 = vmatpush1.msra.mxu0 %v6659_v15  ;;  %3505 = vmatprep.subr.mxu1 %v7989_v42 }
 0x20c   :  { %3361 = vmatprep.subr.mxu0 %v7989_v42  ;;  %3507 = vmatpush1.msra.mxu1 %v6704_v44 }
 0x20d   :  { %3364 = vmatpush1.msra.mxu0 %v8040_v57  ;;  %3508 = vmatprep.subr.mxu1 %v7989_v42 }
 0x20e   :  { %3365 = vmatprep.subr.mxu0 %v7989_v42  ;;  %3510 = vmatpush1.msra.mxu1 %v6716_v19 }
 0x20f   :  { %v4353_v45 = vpop.f32.mrf.mxu0  ;;  %3368 = vmatpush1.msra.mxu0 %v8041_v28  ;;  %3511 = vmatprep.subr.mxu1 %v7989_v42 }
 0x210   :  { %3369 = vmatprep.subr.mxu0 %v7989_v42  ;;  %3513 = vmatpush1.msra.mxu1 %v6740_v50 }
 0x211   :  { %v4354_v1 = vpop.f32.mrf.mxu0  ;;  %3372 = vmatpush1.msra.mxu0 %v8042_v40  ;;  %3520 = vmatprep.subr.mxu1 %v7989_v42 }
 0x212   :  { %v4355_v61 = vadd.f32 %v4354_v1, %v4353_v45  ;;  %3373 = vmatprep.subr.mxu0 %v7989_v42  ;;  %3522 = vmatpush2.msra.mxu1 %v6753_v55 }
 0x213   :  { %3376 = vmatpush1.msra.mxu0 %v8043_v49  ;;  %v4356_v53 = vpop.f32.mrf.mxu0  ;;  %3523 = vmatprep.subr.mxu1 %v7989_v42 }
 0x214   :  { %v1938_v29 = vadd.f32 %v4355_v61, %v7010_v7  ;;  %3377 = vmatprep.subr.mxu0 %v7989_v42  ;;  %3525 = vmatpush2.msra.mxu1 %v6765_v0  ;;  %v8045_v7 = vld [vmem:[#allocation14_spill] sm:$0xff] }
 0x215   :  { %3380 = vmatpush1.msra.mxu0 %v8044_v3  ;;  %v4357_v45 = vpop.f32.mrf.mxu0  ;;  %3526 = vmatprep.subr.mxu1 %v7989_v42 }
 0x216   :  { %v7099_v1 = vadd.f32 %v4393_v38, %v1938_v29  ;;  %3381 = vmatprep.subr.mxu0 %v7989_v42  ;;  %v4358_v60 = vadd.f32 %v4357_v45, %v4356_v53  ;;  %3528 = vmatpush2.msra.mxu1 %v6779_v35  ;;  %v8047_v53 = vld [vmem:[#allocation16_spill] sm:$0xff]  ;;  %v8051_v29 = vld [vmem:[#allocation29_spill] sm:$0xff]  ;;  %v8052_v45 = vld [vmem:[#allocation35_spill] sm:$0xff] }
 0x217   :  { %3384 = vmatpush1.msra.mxu0 %v8045_v7  ;;  %3529 = vmatprep.subr.mxu1 %v7989_v42 }
 0x218   :  { %3385 = vmatprep.subr.mxu0 %v7989_v42  ;;  %v1945_v61 = vadd.f32 %v4358_v60, %v7034_v12  ;;  %3531 = vmatpush2.msra.mxu1 %v6786_v17  ;;  %v8048_v60 = vld [vmem:[#allocation17_spill] sm:$0xff] }
 0x219   :  { %3388 = vmatpush1.msra.mxu0 %v8046_v52  ;;  %3532 = vmatprep.subr.mxu1 %v7989_v42  ;;  %v8049_v12 = vld [vmem:[#allocation21_spill] sm:$0xff] }
 0x21a   :  { %3395 = vmatprep.subr.mxu0 %v7989_v42  ;;  %v7112_v38 = vadd.f32 %v4396_v63, %v1945_v61  ;;  %3534 = vmatpush2.msra.mxu1 %v6798_v37  ;;  %v8050_v63 = vld [vmem:[#allocation26_spill] sm:$0xff] }
 0x21b   :  { %3398 = vmatpush2.msra.mxu0 %v8047_v53  ;;  %3535 = vmatprep.subr.mxu1 %v7989_v42  ;;  %v8053_v61 = vld [vmem:[#allocation22_spill] sm:$0xff] }
 0x21c   :  { %3399 = vmatprep.subr.mxu0 %v7989_v42  ;;  %3537 = vmatpush2.msra.mxu1 %v6816_v16 }
 0x21d   :  { %3402 = vmatpush2.msra.mxu0 %v8048_v60  ;;  %3538 = vmatprep.subr.mxu1 %v7989_v42 }
 0x21e   :  { %3403 = vmatprep.subr.mxu0 %v7989_v42  ;;  %3540 = vmatpush2.msra.mxu1 %v6828_v9 }
 0x21f   :  { %3406 = vmatpush2.msra.mxu0 %v8049_v12  ;;  %3541 = vmatprep.subr.mxu1 %v7989_v42 }
 0x220   :  { %3407 = vmatprep.subr.mxu0 %v7989_v42  ;;  %3543 = vmatpush2.msra.mxu1 %v6843_v26 }
 0x221   :  { %3410 = vmatpush2.msra.mxu0 %v8050_v63  ;;  %3544 = vmatprep.subr.mxu1 %v7989_v42 }
 0x222   :  { %3411 = vmatprep.subr.mxu0 %v7989_v42  ;;  %3546 = vmatpush2.msra.mxu1 %v6856_v31 }
 0x223   :  { %3414 = vmatpush2.msra.mxu0 %v8051_v29  ;;  %3547 = vmatprep.subr.mxu1 %v7989_v42 }
 0x224   :  { %3415 = vmatprep.subr.mxu0 %v7989_v42  ;;  %3549 = vmatpush2.msra.mxu1 %v6871_v48  ;;  %v8056_v48 = vld [vmem:[#allocation42_spill] sm:$0xff] }
 0x225   :  { %3418 = vmatpush2.msra.mxu0 %v8052_v45  ;;  %3550 = vmatprep.subr.mxu1 %v7989_v42 }
 0x226   :  { %3419 = vmatprep.subr.mxu0 %v7989_v42  ;;  %3552 = vmatpush2.msra.mxu1 %v6883_v59 }
 0x227   :  { %3422 = vmatpush2.msra.mxu0 %v8053_v61  ;;  %3553 = vmatprep.subr.mxu1 %v7989_v42  ;;  %v4467_v4 = vpop.f32.mrf.mxu1  ;;  %v8054_v61 = vand.u32 4294901760, %v6981_v33 }
 0x228   :  { %3423 = vmatprep.subr.mxu0 %v7989_v42  ;;  %3555 = vmatpush2.msra.mxu1 %v6895_v22  ;;  %v8055_v22 = vand.u32 4294901760, %v6986_v58 }
 0x229   :  { %3426 = vmatpush2.msra.mxu0 %v6869_v25  ;;  %3556 = vmatprep.subr.mxu1 %v7989_v42  ;;  %v4468_v45 = vpop.f32.mrf.mxu1 }
 0x22a   :  { %3427 = vmatprep.subr.mxu0 %v7989_v42  ;;  %3558 = vmatpush2.msra.mxu1 %v6907_v56  ;;  %v4469_v59 = vadd.f32 %v4468_v45, %v4467_v4 }
 0x22b   :  { %3430 = vmatpush2.msra.mxu0 %v6881_v27  ;;  %3566 = vmatmul.mubr.f32.vlgmr.msra.gmra.mxu1 %v8054_v61  ;;  %v8057_v61 = vand.u32 4294901760, %v7002_v2 }
 0x22c   :  { %3748 = vmatprep.subr.mxu1 %v7989_v42  ;;  %3431 = vmatprep.subr.mxu0 %v7989_v42  ;;  %v4470_v25 = vpop.f32.mrf.mxu1 }
 0x22d   :  { %3573 = vmatprep.mubr.f32.mxu1 %v8055_v22  ;;  %3750 = vmatpush1.msra.mxu1 %v6491_v5  ;;  %v8058_v22 = vld [vmem:[#allocation9_spill] sm:$0xff] }
 0x22e   :  { %3434 = vmatpush2.msra.mxu0 %v8056_v48  ;;  %3751 = vmatprep.subr.mxu1 %v7989_v42  ;;  %v4471_v4 = vpop.f32.mrf.mxu1 }
 0x22f   :  { %3435 = vmatprep.subr.mxu0 %v7989_v42  ;;  %3753 = vmatpush1.msra.mxu1 %v6502_v6  ;;  %v4472_v45 = vadd.f32 %v4471_v4, %v4470_v25 }
 0x230   :  { %3438 = vmatpush2.msra.mxu0 %v6905_v21  ;;  %3577 = vmatmul.mubr.f32.gmra.mxu1 %v8057_v61  ;;  %v8059_v61 = vand.u32 4294901760, %v6510_v62 }
 0x231   :  { %3754 = vmatprep.subr.mxu1 %v7989_v42  ;;  %3439 = vmatprep.subr.mxu0 %v7989_v42  ;;  %v4429_v5 = vpop.f32.mrf.mxu0 }
 0x232   :  { %3756 = vmatpush1.msra.mxu1 %v6515_v20  ;;  %3937 = vmatprep.mubr.msk.f32.mxu1 %vm216_vm13, %v8058_v22 }
 0x233   :  { %3442 = vmatpush2.msra.mxu0 %v6917_v8  ;;  %3757 = vmatprep.subr.mxu1 %v7989_v42  ;;  %v4430_v6 = vpop.f32.mrf.mxu0 }
 0x234   :  { %3443 = vmatprep.subr.mxu0 %v7989_v42  ;;  %3759 = vmatpush1.msra.mxu1 %v6533_v46  ;;  %v4431_v25 = vadd.f32 %v4430_v6, %v4429_v5 }
 0x235   :  { %3446 = vmatpush2.msra.mxu0 %v6927_v30  ;;  %3760 = vmatprep.subr.mxu1 %v7989_v42 }
 0x236   :  { %3452 = vmatmul.mubr.f32.vlgmr.msra.gmra.mxu0 %v6981_v33  ;;  %3582 = vmatprep.subr.mxu0 %v7989_v42  ;;  %v2168_v20 = vadd.f32 %v4431_v25, %v7099_v1  ;;  %v4432_v4 = vpop.f32.mrf.mxu0  ;;  %v8060_v33 = vand.u32 4294901760, %v6524_v43 }
 0x237   :  { %3762 = vmatpush1.msra.mxu1 %v6544_v11  ;;  %3458 = vmatprep.mubr.f32.mxu0 %v6986_v58  ;;  %v8061_v58 = vand.u32 4294901760, %v6539_v24  ;;  %v8063_v24 = vand.u32 4294901760, %v6574_v14  ;;  %v8066_v14 = vand.u32 4294901760, %v6640_v13 }
 0x238   :  { %3586 = vmatpush1.msra.mxu0 %v8059_v61  ;;  %3763 = vmatprep.subr.mxu1 %v7989_v42  ;;  %v4433_v46 = vpop.f32.mrf.mxu0  ;;  %v7182_v5 = vadd.f32 %v4469_v59, %v2168_v20  ;;  %v8093_v20 = vld [vmem:[#allocation27_spill] sm:$0xff]  ;;  %v8097_v61 = vand.u32 4294901760, %v6917_v8 }
 0x239   :  { %3587 = vmatprep.subr.mxu0 %v7989_v42  ;;  %3765 = vmatpush1.msra.mxu1 %v6568_v39  ;;  %v4434_v11 = vadd.f32 %v4433_v46, %v4432_v4  ;;  %v8062_v39 = vand.u32 4294901760, %v6560_v10  ;;  %v8065_v10 = vand.u32 4294901760, %v6621_v47  ;;  %v8094_v4 = vand.u32 4294901760, %v8056_v48 }
 0x23a   :  { %3591 = vmatpush1.msra.mxu0 %v8060_v33  ;;  %3766 = vmatprep.subr.mxu1 %v7989_v42  ;;  %v8098_v48 = vand.u32 4294901760, %v6927_v30 }
 0x23b   :  { %3461 = vmatmul.mubr.f32.gmra.mxu0 %v7002_v2  ;;  %3592 = vmatprep.subr.mxu0 %v7989_v42  ;;  %v2183_v62 = vadd.f32 %v4434_v11, %v7112_v38 }
 0x23c   :  { %3768 = vmatpush1.msra.mxu1 %v6588_v51  ;;  %3596 = vmatpush1.msra.mxu0 %v8061_v58  ;;  %v8064_v51 = vand.u32 4294901760, %v6602_v32  ;;  %v8067_v32 = vand.u32 4294901760, %v6659_v15 }
 0x23d   :  { %3933 = vmatprep.mubr.msk.f32.mxu0 %vm216_vm13, %v8058_v22  ;;  %3769 = vmatprep.subr.mxu1 %v7989_v42  ;;  %v7198_v43 = vadd.f32 %v4472_v45, %v2183_v62  ;;  %v8089_v45 = vand.u32 4294901760, %v6881_v27  ;;  %v8090_v22 = vmov 1.0  }
 0x23e   :  { %3597 = vmatprep.subr.mxu0 %v7989_v42  ;;  %3771 = vmatpush1.msra.mxu1 %v6604_v34  ;;  %v8068_v34 = vand.u32 4294901760, %v8040_v57 }
 0x23f   :  { %3601 = vmatpush1.msra.mxu0 %v8062_v39  ;;  %3772 = vmatprep.subr.mxu1 %v7989_v42 }
 0x240   :  { %3602 = vmatprep.subr.mxu0 %v7989_v42  ;;  %3774 = vmatpush1.msra.mxu1 %v6632_v41  ;;  %v8069_v41 = vand.u32 4294901760, %v8041_v28 }
 0x241   :  { %3606 = vmatpush1.msra.mxu0 %v8063_v24  ;;  %3775 = vmatprep.subr.mxu1 %v7989_v42 }
 0x242   :  { %3607 = vmatprep.subr.mxu0 %v7989_v42  ;;  %3777 = vmatpush1.msra.mxu1 %v6648_v54  ;;  %v8070_v54 = vand.u32 4294901760, %v8042_v40  ;;  %v8078_v40 = vand.u32 4294901760, %v8050_v63  ;;  %v8087_v63 = vld [vmem:[#allocation24_spill] sm:$0xff] }
 0x243   :  { %3611 = vmatpush1.msra.mxu0 %v8064_v51  ;;  %3778 = vmatprep.subr.mxu1 %v7989_v42 }
 0x244   :  { %3612 = vmatprep.subr.mxu0 %v7989_v42  ;;  %3780 = vmatpush1.msra.mxu1 %v6661_v36  ;;  %v8071_v36 = vand.u32 4294901760, %v8043_v49  ;;  %v8079_v49 = vand.u32 4294901760, %v8051_v29  ;;  %v8088_v29 = vand.u32 4294901760, %v8087_v63 }
 0x245   :  { %3616 = vmatpush1.msra.mxu0 %v8065_v10  ;;  %3781 = vmatprep.subr.mxu1 %v7989_v42 }
 0x246   :  { %3617 = vmatprep.subr.mxu0 %v7989_v42  ;;  %3783 = vmatpush1.msra.mxu1 %v6677_v18 }
 0x247   :  { %3621 = vmatpush1.msra.mxu0 %v8066_v14  ;;  %3784 = vmatprep.subr.mxu1 %v7989_v42 }
 0x248   :  { %3622 = vmatprep.subr.mxu0 %v7989_v42  ;;  %3786 = vmatpush1.msra.mxu1 %v6691_v23  ;;  %v8072_v23 = vand.u32 4294901760, %v8044_v3 }
 0x249   :  { %3626 = vmatpush1.msra.mxu0 %v8067_v32  ;;  %3787 = vmatprep.subr.mxu1 %v7989_v42 }
 0x24a   :  { %3627 = vmatprep.subr.mxu0 %v7989_v42  ;;  %3789 = vmatpush1.msra.mxu1 %v6704_v44 }
 0x24b   :  { %3631 = vmatpush1.msra.mxu0 %v8068_v34  ;;  %3790 = vmatprep.subr.mxu1 %v7989_v42  ;;  %v4543_v47 = vpop.f32.mrf.mxu1 }
 0x24c   :  { %3632 = vmatprep.subr.mxu0 %v7989_v42  ;;  %3792 = vmatpush1.msra.mxu1 %v6716_v19 }
 0x24d   :  { %3636 = vmatpush1.msra.mxu0 %v8069_v41  ;;  %3793 = vmatprep.subr.mxu1 %v7989_v42  ;;  %v4544_v13 = vpop.f32.mrf.mxu1 }
 0x24e   :  { %3637 = vmatprep.subr.mxu0 %v7989_v42  ;;  %3795 = vmatpush1.msra.mxu1 %v6740_v50  ;;  %v4545_v15 = vadd.f32 %v4544_v13, %v4543_v47 }
 0x24f   :  { %3641 = vmatpush1.msra.mxu0 %v8070_v54  ;;  %3802 = vmatprep.subr.mxu1 %v7989_v42 }
 0x250   :  { %3642 = vmatprep.subr.mxu0 %v7989_v42  ;;  %3804 = vmatpush2.msra.mxu1 %v6753_v55  ;;  %v4546_v18 = vpop.f32.mrf.mxu1  ;;  %v8073_v55 = vand.u32 4294901760, %v8045_v7  ;;  %v8081_v7 = vld [vmem:[#allocation35_spill] sm:$0xff] }
 0x251   :  { %3646 = vmatpush1.msra.mxu0 %v8071_v36  ;;  %3805 = vmatprep.subr.mxu1 %v7989_v42  ;;  %v8082_v38 = vand.u32 4294901760, %v8081_v7 }
 0x252   :  { %3647 = vmatprep.subr.mxu0 %v7989_v42  ;;  %3807 = vmatpush2.msra.mxu1 %v6765_v0  ;;  %v4547_v44 = vpop.f32.mrf.mxu1  ;;  %v8074_v0 = vand.u32 4294901760, %v8046_v52  ;;  %v8076_v52 = vand.u32 4294901760, %v8048_v60 }
 0x253   :  { %3651 = vmatpush1.msra.mxu0 %v8072_v23  ;;  %3808 = vmatprep.subr.mxu1 %v7989_v42  ;;  %v4548_v19 = vadd.f32 %v4547_v44, %v4546_v18 }
 0x254   :  { %3652 = vmatprep.subr.mxu0 %v7989_v42  ;;  %3810 = vmatpush2.msra.mxu1 %v6779_v35  ;;  %v8075_v35 = vand.u32 4294901760, %v8047_v53  ;;  %v8083_v53 = vld [vmem:[#allocation40_spill] sm:$0xff] }
 0x255   :  { %3656 = vmatpush1.msra.mxu0 %v8073_v55  ;;  %3811 = vmatprep.subr.mxu1 %v7989_v42  ;;  %v4505_v50 = vpop.f32.mrf.mxu0 }
 0x256   :  { %3657 = vmatprep.subr.mxu0 %v7989_v42  ;;  %3813 = vmatpush2.msra.mxu1 %v6786_v17 }
 0x257   :  { %3661 = vmatpush1.msra.mxu0 %v8074_v0  ;;  %3814 = vmatprep.subr.mxu1 %v7989_v42  ;;  %v4506_v59 = vpop.f32.mrf.mxu0 }
 0x258   :  { %3668 = vmatprep.subr.mxu0 %v7989_v42  ;;  %3816 = vmatpush2.msra.mxu1 %v6798_v37  ;;  %v4507_v3 = vadd.f32 %v4506_v59, %v4505_v50  ;;  %v8077_v37 = vand.u32 4294901760, %v8049_v12  ;;  %v8086_v12 = vld [vmem:[#allocation44_spill] sm:$0xff] }
 0x259   :  { %3672 = vmatpush2.msra.mxu0 %v8075_v35  ;;  %3817 = vmatprep.subr.mxu1 %v7989_v42 }
 0x25a   :  { %3673 = vmatprep.subr.mxu0 %v7989_v42  ;;  %3819 = vmatpush2.msra.mxu1 %v6816_v16  ;;  %v2560_v17 = vadd.f32 %v4507_v3, %v7182_v5  ;;  %v4508_v2 = vpop.f32.mrf.mxu0 }
 0x25b   :  { %3677 = vmatpush2.msra.mxu0 %v8076_v52  ;;  %3820 = vmatprep.subr.mxu1 %v7989_v42 }
 0x25c   :  { %3678 = vmatprep.subr.mxu0 %v7989_v42  ;;  %3822 = vmatpush2.msra.mxu1 %v6828_v9  ;;  %v4509_v57 = vpop.f32.mrf.mxu0  ;;  %v2677_v28 = vadd.f32 %v4545_v15, %v2560_v17 }
 0x25d   :  { %3682 = vmatpush2.msra.mxu0 %v8077_v37  ;;  %3823 = vmatprep.subr.mxu1 %v7989_v42  ;;  %v4510_v16 = vadd.f32 %v4509_v57, %v4508_v2 }
 0x25e   :  { %3683 = vmatprep.subr.mxu0 %v7989_v42  ;;  %3825 = vmatpush2.msra.mxu1 %v6843_v26  ;;  %v8080_v26 = vld [vmem:[#allocation36_spill] sm:$0xff] }
 0x25f   :  { %3687 = vmatpush2.msra.mxu0 %v8078_v40  ;;  %3826 = vmatprep.subr.mxu1 %v7989_v42  ;;  %v2569_v9 = vadd.f32 %v4510_v16, %v7198_v43 }
 0x260   :  { %3688 = vmatprep.subr.mxu0 %v7989_v42  ;;  %3828 = vmatpush2.msra.mxu1 %v6856_v31  ;;  %v8084_v31 = vld [vmem:[#allocation22_spill] sm:$0xff] }
 0x261   :  { %3692 = vmatpush2.msra.mxu0 %v8079_v49  ;;  %3829 = vmatprep.subr.mxu1 %v7989_v42  ;;  %v2688_v1 = vadd.f32 %v4548_v19, %v2569_v9  ;;  %v8085_v60 = vand.u32 4294901760, %v8084_v31 }
 0x262   :  { %3693 = vmatprep.subr.mxu0 %v7989_v42  ;;  %3831 = vmatpush2.msra.mxu1 %v8080_v26 }
 0x263   :  { %3697 = vmatpush2.msra.mxu0 %v8082_v38  ;;  %3832 = vmatprep.subr.mxu1 %v7989_v42 }
 0x264   :  { %3698 = vmatprep.subr.mxu0 %v7989_v42  ;;  %3834 = vmatpush2.msra.mxu1 %v8083_v53 }
 0x265   :  { %3702 = vmatpush2.msra.mxu0 %v8085_v60  ;;  %3835 = vmatprep.subr.mxu1 %v7989_v42 }
 0x266   :  { %3703 = vmatprep.subr.mxu0 %v7989_v42  ;;  %3837 = vmatpush2.msra.mxu1 %v8086_v12 }
 0x267   :  { %3707 = vmatpush2.msra.mxu0 %v8088_v29  ;;  %3838 = vmatprep.subr.mxu1 %v7989_v42 }
 0x268   :  { %3708 = vmatprep.subr.mxu0 %v7989_v42  ;;  %3840 = vmatpush2.msra.mxu1 %v6907_v56  ;;  %v8095_v56 = vand.u32 4294901760, %v6905_v21 }
 0x269   :  { %3712 = vmatpush2.msra.mxu0 %v8089_v45  ;;  %3938 = vmatmul.mubr.msk.f32.vlgmr.msra.gmra.mxu1 %vm49_vm15, %v8090_v22 }
 0x26a   :  { %3713 = vmatprep.subr.mxu0 %v7989_v42  ;;  %3939 = vmatprep.mubr.msk.f32.mxu1 %vm216_vm13, %v8093_v20 }
 0x26b   :  { %3717 = vmatpush2.msra.mxu0 %v8094_v4 }
 0x26c   :  { %3718 = vmatprep.subr.mxu0 %v7989_v42 }
 0x26d   :  { %3722 = vmatpush2.msra.mxu0 %v8095_v56  ;;  %3940 = vmatmul.mubr.msk.f32.gmra.mxu1 %vm57_vm0, %v8090_v22 }
 0x26e   :  { %3723 = vmatprep.subr.mxu0 %v7989_v42 }
 0x26f   :  { %3727 = vmatpush2.msra.mxu0 %v8097_v61  ;;  %v4619_v46 = vpop.f32.mrf.mxu1 }
 0x270   :  { %3728 = vmatprep.subr.mxu0 %v7989_v42 }
 0x271   :  { %3732 = vmatpush2.msra.mxu0 %v8098_v48  ;;  %v4620_v21 = vpop.f32.mrf.mxu1 }
 0x272   :  { %3934 = vmatmul.mubr.msk.f32.vlgmr.msra.gmra.mxu0 %vm49_vm15, %v8090_v22  ;;  %v4621_v5 = vadd.f32 %v4620_v21, %v4619_v46 }
 0x273   :  { %3935 = vmatprep.mubr.msk.f32.mxu0 %vm216_vm13, %v8093_v20 }
 0x274   :  { %v4622_v33 = vpop.f32.mrf.mxu1 }
 0x276   :  { %3936 = vmatmul.mubr.msk.f32.gmra.mxu0 %vm57_vm0, %v8090_v22  ;;  %v4623_v42 = vpop.f32.mrf.mxu1 }
 0x277   :  { %v4624_v8 = vadd.f32 %v4623_v42, %v4622_v33 }
 0x27a   :  { %v4581_v30 = vpop.f32.mrf.mxu0 }
 0x27c   :  { %v4582_v11 = vpop.f32.mrf.mxu0 }
 0x27d   :  { %v4583_v62 = vadd.f32 %v4582_v11, %v4581_v30 }
 0x27f   :  { %v2856_v58 = vadd.f32 %v4583_v62, %v2677_v28  ;;  %v4584_v43 = vpop.f32.mrf.mxu0 }
 0x281   :  { %v4585_v39 = vpop.f32.mrf.mxu0  ;;  %v2967_v24 = vadd.f32 %v4621_v5, %v2856_v58 }
 0x282   :  { %v4586_v51 = vadd.f32 %v4585_v39, %v4584_v43 }
 0x284   :  { %v2863_v10 = vadd.f32 %v4586_v51, %v2688_v1 }
 0x286   :  { %v2974_v14 = vadd.f32 %v4624_v8, %v2863_v10 }
 0x2ad   :  { %v3314_v32 = vpop.f32.mrf.mxu1 }
 0x2af   :  { %v3316_v34 = vpop.f32.mrf.mxu1 }
 0x2b2   :  { %v3321_v47 = vpop.f32.mrf.mxu1 }
 0x2b4   :  { %v3323_v41 = vpop.f32.mrf.mxu1 }
 0x2b8   :  { %v3082_v13 = vpop.f32.mrf.mxu0 }
 0x2b9   :  { %v3083_v54 = vadd.f32 %v3082_v13, %v2967_v24 }
 0x2ba   :  { %v3084_v15 = vpop.f32.mrf.mxu0 }
 0x2bb   :  { %v3315_v36 = vadd.f32 %v3314_v32, %v3083_v54 }
 0x2bd   :  { %v3097_v18 = vpop.f32.mrf.mxu0 }
 0x2be   :  { %v3098_v23 = vadd.f32 %v3097_v18, %v2974_v14 }
 0x2bf   :  { %v3099_v44 = vpop.f32.mrf.mxu0 }
 0x2c0   :  { %v3322_v19 = vadd.f32 %v3321_v47, %v3098_v23 }
 0x2eb   :  { %v3567_v55 = vpop.f32.mrf.mxu1 }
 0x2ed   :  { %v3569_v50 = vpop.f32.mrf.mxu1 }
 0x2f0   :  { %v3578_v0 = vpop.f32.mrf.mxu1 }
 0x2f2   :  { %v3580_v59 = vpop.f32.mrf.mxu1 }
 0x2f6   :  { %v3453_v35 = vpop.f32.mrf.mxu0 }
 0x2f7   :  { %v3454_v3 = vadd.f32 %v3453_v35, %v3315_v36 }
 0x2f8   :  { %v3455_v52 = vpop.f32.mrf.mxu0 }
 0x2f9   :  { %v3568_v17 = vadd.f32 %v3567_v55, %v3454_v3 }
 0x2fb   :  { %v3462_v2 = vpop.f32.mrf.mxu0 }
 0x2fc   :  { %v3463_v37 = vadd.f32 %v3462_v2, %v3322_v19 }
 0x2fd   :  { %v3464_v57 = vpop.f32.mrf.mxu0 }
 0x2fe   :  { %v3579_v28 = vadd.f32 %v3578_v0, %v3463_v37 }
 0x329   :  { %v3845_v16 = vpop.f32.mrf.mxu1 }
 0x32b   :  { %v3847_v40 = vpop.f32.mrf.mxu1 }
 0x32d   :  { %v3852_v9 = vpop.f32.mrf.mxu1 }
 0x32f   :  { %v3854_v49 = vpop.f32.mrf.mxu1 }
 0x332   :  { %v3737_v1 = vpop.f32.mrf.mxu0 }
 0x333   :  { %v3738_v26 = vadd.f32 %v3737_v1, %v3568_v17 }
 0x334   :  { %v3739_v7 = vpop.f32.mrf.mxu0 }
 0x335   :  { %v3846_v38 = vadd.f32 %v3845_v16, %v3738_v26 }
 0x336   :  { %v3744_v53 = vpop.f32.mrf.mxu0 }
 0x337   :  { %v3856_v31 = vmul.f32 11.313708, %v3846_v38  ;;  %v3745_v60 = vadd.f32 %v3744_v53, %v3579_v28 }
 0x338   :  { %v3746_v12 = vpop.f32.mrf.mxu0 }
 0x339   :  { %3858 = vst [vmem:[#allocation5] sm:$0xff] %v3856_v31  ;;  %v3853_v63 = vadd.f32 %v3852_v9, %v3745_v60 }
 0x33b   :  { %v3857_v29 = vmul.f32 11.313708, %v3853_v63 }
 0x33d   :  { %3859 = vst [vmem:[#allocation5 + $0x8] sm:$0xff] %v3857_v29 }
 0x33e   :  { %4664 = shalt.err (!%p4661_p9)
}
 0x33f   :  { %3871 = dma.vmem_to_hbm [thread:$0]  %s3866_s1, 256, %s7350_s2, [#allocation4], %s4678_s12, %s4678_s12, %s4679_s13  }
 0x340   :  { %4675 = dma.done.wait [#allocation4], 256  }
 0x341   :  { %4676 = vsyncadd [#allocation4], 4294967040 }
 0x342   :  { %3875 = vsyncpa [#allocation3], 1 }
 0x343   :  { %3876 = vsyncpa [#allocation4], 1 }

</bundles_post_ra>
